<compile_context>
chip_gen: v5e
topology: v5e:2x2
jax: 0.10.0
libtpu: 0.0.40
codegen_flags: <defaults>
</compile_context>

<pallas_src>
import jax
import jax.numpy as jnp
from jax.experimental import pallas as pl
from jax.experimental.pallas import tpu as pltpu

LANE = 128


def _round_up(x, m):
    return (x + m - 1) // m * m


def dqn_kernel(x_ref,
               w1_ref, b1_ref,
               w2_ref, b2_ref,
               w3_ref, b3_ref,
               w4_ref, b4_ref,
               o_ref):
    # Layer 1: Linear(input_dim, 1024) + ReLU  (bf16 MXU inputs, f32 accumulate)
    h = jnp.dot(x_ref[...].astype(jnp.bfloat16), w1_ref[...],
                preferred_element_type=jnp.float32)
    h = jnp.maximum(h + b1_ref[...], 0.0)
    # Layer 2: Linear(1024, 1024) + ReLU
    h = jnp.dot(h.astype(jnp.bfloat16), w2_ref[...],
                preferred_element_type=jnp.float32)
    h = jnp.maximum(h + b2_ref[...], 0.0)
    # Layer 3: Linear(1024, 512) + ReLU
    h = jnp.dot(h.astype(jnp.bfloat16), w3_ref[...],
                preferred_element_type=jnp.float32)
    h = jnp.maximum(h + b3_ref[...], 0.0)
    # Layer 4: Linear(512, out_pad)  (lane-dense padded output, no activation)
    h = jnp.dot(h.astype(jnp.bfloat16), w4_ref[...],
                preferred_element_type=jnp.float32)
    o_ref[...] = (h + b4_ref[...]).astype(o_ref.dtype)


def dqn_forward(x, params, *, batch_tile=512):
    """x: (B, input_dim) float32. params: dict from init_dqn_params."""
    B, in_dim = x.shape
    out_dim = params["out_dim"]
    out_pad = params["w4"].shape[1]

    # Batch tile: multiple of 8 sublanes; 512 caps per-tile activation footprint
    # (~2 MB f32) so double-buffered tiles + resident bf16 weights fit 32 MiB VMEM.
    tb = min(batch_tile, _round_up(B, 8))
    b_pad = _round_up(B, tb)
    if b_pad != B:
        x = jnp.pad(x, ((0, b_pad - B), (0, 0)))

    grid = (b_pad // tb,)

    def const_map(i):          # weights/biases: single block, stays VMEM-resident
        return (0, 0)

    x_spec = pl.BlockSpec((tb, in_dim), lambda i: (i, 0))
    o_spec = pl.BlockSpec((tb, out_pad), lambda i: (i, 0))
    w_specs = [pl.BlockSpec(params[k].shape, const_map)
               for k in ("w1", "b1", "w2", "b2", "w3", "b3", "w4", "b4")]

    out = pl.pallas_call(
        dqn_kernel,
        out_shape=jax.ShapeDtypeStruct((b_pad, out_pad), jnp.float32),
        grid=grid,
        in_specs=[x_spec] + w_specs,
        out_specs=o_spec,
        compiler_params=pltpu.CompilerParams(
            dimension_semantics=("parallel",),   # shard batch tiles across TCs (v7x)
            vmem_limit_bytes=32 << 20,           # fits v7x's 64 MiB physical VMEM
        ),
    )(x,
      params["w1"], params["b1"],
      params["w2"], params["b2"],
      params["w3"], params["b3"],
      params["w4"], params["b4"])

    return out[:B, :out_dim]


def init_dqn_params(key, input_dim, output_dim):
    """Deterministic PyTorch nn.Linear-style init.
    PyTorch Linear weight is (out, in); we store (in, out) == W.T so the kernel
    computes x @ W.T + b exactly as nn.Linear. Weights are cast to bfloat16 on
    the host; biases kept f32. Last layer zero-padded to a 128-lane output."""
    out_pad = _round_up(output_dim, LANE)
    dims = [(input_dim, 1024), (1024, 1024), (1024, 512), (512, output_dim)]
    params = {"out_dim": output_dim}
    for i, (fan_in, fan_out) in enumerate(dims, start=1):
        key, kw, kb = jax.random.split(key, 3)
        bound = 1.0 / (fan_in ** 0.5)  # PyTorch Linear default uniform bound
        w = jax.random.uniform(kw, (fan_in, fan_out), jnp.float32,
                               minval=-bound, maxval=bound)
        b = jax.random.uniform(kb, (1, fan_out), jnp.float32,
                               minval=-bound, maxval=bound)
        if i == len(dims) and fan_out != out_pad:   # lane-dense padded output
            w = jnp.pad(w, ((0, 0), (0, out_pad - fan_out)))
            b = jnp.pad(b, ((0, 0), (0, out_pad - fan_out)))
        params[f"w{i}"] = w.astype(jnp.bfloat16)
        params[f"b{i}"] = b
    return params


def dqn_reference(x, params):
    """Pure-JAX reference using the same mixed-precision recipe as the kernel
    (bf16 dot inputs, f32 accumulation / bias / ReLU)."""
    def layer(h, w, b, relu):
        y = jnp.dot(h.astype(jnp.bfloat16), w,
                    preferred_element_type=jnp.float32) + b
        return jnp.maximum(y, 0.0) if relu else y

    h = layer(x, params["w1"], params["b1"], True)
    h = layer(h, params["w2"], params["b2"], True)
    h = layer(h, params["w3"], params["b3"], True)
    h = layer(h, params["w4"], params["b4"], False)
    return h[:, :params["out_dim"]]


if __name__ == "__main__":
    input_dim = 32
    output_dim = 8
    batch = 2

    key = jax.random.PRNGKey(0)
    key, kx = jax.random.split(key)
    x = jax.random.normal(kx, (batch, input_dim), jnp.float32)
    params = init_dqn_params(key, input_dim, output_dim)

    out = dqn_forward(x, params)
    out = jax.block_until_ready(out)

    ref = dqn_reference(x, params)
    assert out.shape == (batch, output_dim)
    assert jnp.allclose(out, ref, atol=1e-2, rtol=1e-2), "mismatch vs JAX reference"

    print("KERNEL_OK")
</pallas_src>

<mosaic_0001>
module attributes {stable_mosaic.version = 11 : i64} {
  func.func @dqn_kernel(%arg0: i32, %arg1: memref<8x32xf32, #tpu.memory_space<vmem>>, %arg2: memref<32x1024xbf16, #tpu.memory_space<vmem>>, %arg3: memref<1x1024xf32, #tpu.memory_space<vmem>>, %arg4: memref<1024x1024xbf16, #tpu.memory_space<vmem>>, %arg5: memref<1x1024xf32, #tpu.memory_space<vmem>>, %arg6: memref<1024x512xbf16, #tpu.memory_space<vmem>>, %arg7: memref<1x512xf32, #tpu.memory_space<vmem>>, %arg8: memref<512x128xbf16, #tpu.memory_space<vmem>>, %arg9: memref<1x128xf32, #tpu.memory_space<vmem>>, %arg10: memref<8x128xf32, #tpu.memory_space<vmem>>) attributes {dimension_semantics = [#tpu.dimension_semantics<parallel>], iteration_bounds = array<i64: 1>, scalar_prefetch = 0 : i64, scratch_operands = 0 : i64, tpu.core_type = #tpu.core_type<tc>, window_params = [{transform_indices = @transform_0, window_bounds = array<i64: 8, 32>}, {pipeline_mode = #tpu.pipeline_mode<synchronous>, transform_indices = @transform_1, window_bounds = array<i64: 32, 1024>}, {pipeline_mode = #tpu.pipeline_mode<synchronous>, transform_indices = @transform_2, window_bounds = array<i64: 1, 1024>}, {pipeline_mode = #tpu.pipeline_mode<synchronous>, transform_indices = @transform_3, window_bounds = array<i64: 1024, 1024>}, {pipeline_mode = #tpu.pipeline_mode<synchronous>, transform_indices = @transform_4, window_bounds = array<i64: 1, 1024>}, {pipeline_mode = #tpu.pipeline_mode<synchronous>, transform_indices = @transform_5, window_bounds = array<i64: 1024, 512>}, {pipeline_mode = #tpu.pipeline_mode<synchronous>, transform_indices = @transform_6, window_bounds = array<i64: 1, 512>}, {pipeline_mode = #tpu.pipeline_mode<synchronous>, transform_indices = @transform_7, window_bounds = array<i64: 512, 128>}, {pipeline_mode = #tpu.pipeline_mode<synchronous>, transform_indices = @transform_8, window_bounds = array<i64: 1, 128>}, {transform_indices = @transform_9, window_bounds = array<i64: 8, 128>}]} {
    %c0 = arith.constant 0 : index
    %c0_0 = arith.constant 0 : index
    %0 = vector.load %arg1[%c0, %c0_0] : memref<8x32xf32, #tpu.memory_space<vmem>>, vector<8x32xf32>
    %1 = arith.truncf %0 : vector<8x32xf32> to vector<8x32xbf16>
    %c0_1 = arith.constant 0 : index
    %c0_2 = arith.constant 0 : index
    %2 = vector.load %arg2[%c0_1, %c0_2] : memref<32x1024xbf16, #tpu.memory_space<vmem>>, vector<32x1024xbf16>
    %cst = arith.constant dense<0.000000e+00> : vector<8x1024xf32>
    %3 = tpu.matmul %1, %2, %cst {dimension_numbers = #tpu.dot_dimension_numbers<[1], [0], [0], [1], [0, 0, 1, 1], [], []>} : vector<8x32xbf16>, vector<32x1024xbf16>, vector<8x1024xf32> -> vector<8x1024xf32>
    %c0_3 = arith.constant 0 : index
    %c0_4 = arith.constant 0 : index
    %4 = vector.load %arg3[%c0_3, %c0_4] : memref<1x1024xf32, #tpu.memory_space<vmem>>, vector<1x1024xf32>
    %5 = vector.broadcast %4 : vector<1x1024xf32> to vector<8x1024xf32>
    %6 = arith.addf %3, %5 : vector<8x1024xf32>
    %cst_5 = arith.constant 0.000000e+00 : f32
    %7 = vector.broadcast %cst_5 : f32 to vector<8x1024xf32>
    %8 = arith.maximumf %6, %7 : vector<8x1024xf32>
    %9 = arith.truncf %8 : vector<8x1024xf32> to vector<8x1024xbf16>
    %c0_6 = arith.constant 0 : index
    %c0_7 = arith.constant 0 : index
    %10 = vector.load %arg4[%c0_6, %c0_7] : memref<1024x1024xbf16, #tpu.memory_space<vmem>>, vector<1024x1024xbf16>
    %cst_8 = arith.constant dense<0.000000e+00> : vector<8x1024xf32>
    %11 = tpu.matmul %9, %10, %cst_8 {dimension_numbers = #tpu.dot_dimension_numbers<[1], [0], [0], [1], [0, 0, 1, 1], [], []>} : vector<8x1024xbf16>, vector<1024x1024xbf16>, vector<8x1024xf32> -> vector<8x1024xf32>
    %c0_9 = arith.constant 0 : index
    %c0_10 = arith.constant 0 : index
    %12 = vector.load %arg5[%c0_9, %c0_10] : memref<1x1024xf32, #tpu.memory_space<vmem>>, vector<1x1024xf32>
    %13 = vector.broadcast %12 : vector<1x1024xf32> to vector<8x1024xf32>
    %14 = arith.addf %11, %13 : vector<8x1024xf32>
    %cst_11 = arith.constant 0.000000e+00 : f32
    %15 = vector.broadcast %cst_11 : f32 to vector<8x1024xf32>
    %16 = arith.maximumf %14, %15 : vector<8x1024xf32>
    %17 = arith.truncf %16 : vector<8x1024xf32> to vector<8x1024xbf16>
    %c0_12 = arith.constant 0 : index
    %c0_13 = arith.constant 0 : index
    %18 = vector.load %arg6[%c0_12, %c0_13] : memref<1024x512xbf16, #tpu.memory_space<vmem>>, vector<1024x512xbf16>
    %cst_14 = arith.constant dense<0.000000e+00> : vector<8x512xf32>
    %19 = tpu.matmul %17, %18, %cst_14 {dimension_numbers = #tpu.dot_dimension_numbers<[1], [0], [0], [1], [0, 0, 1, 1], [], []>} : vector<8x1024xbf16>, vector<1024x512xbf16>, vector<8x512xf32> -> vector<8x512xf32>
    %c0_15 = arith.constant 0 : index
    %c0_16 = arith.constant 0 : index
    %20 = vector.load %arg7[%c0_15, %c0_16] : memref<1x512xf32, #tpu.memory_space<vmem>>, vector<1x512xf32>
    %21 = vector.broadcast %20 : vector<1x512xf32> to vector<8x512xf32>
    %22 = arith.addf %19, %21 : vector<8x512xf32>
    %cst_17 = arith.constant 0.000000e+00 : f32
    %23 = vector.broadcast %cst_17 : f32 to vector<8x512xf32>
    %24 = arith.maximumf %22, %23 : vector<8x512xf32>
    %25 = arith.truncf %24 : vector<8x512xf32> to vector<8x512xbf16>
    %c0_18 = arith.constant 0 : index
    %c0_19 = arith.constant 0 : index
    %26 = vector.load %arg8[%c0_18, %c0_19] : memref<512x128xbf16, #tpu.memory_space<vmem>>, vector<512x128xbf16>
    %cst_20 = arith.constant dense<0.000000e+00> : vector<8x128xf32>
    %27 = tpu.matmul %25, %26, %cst_20 {dimension_numbers = #tpu.dot_dimension_numbers<[1], [0], [0], [1], [0, 0, 1, 1], [], []>} : vector<8x512xbf16>, vector<512x128xbf16>, vector<8x128xf32> -> vector<8x128xf32>
    %c0_21 = arith.constant 0 : index
    %c0_22 = arith.constant 0 : index
    %28 = vector.load %arg9[%c0_21, %c0_22] : memref<1x128xf32, #tpu.memory_space<vmem>>, vector<1x128xf32>
    %29 = vector.broadcast %28 : vector<1x128xf32> to vector<8x128xf32>
    %30 = arith.addf %27, %29 : vector<8x128xf32>
    %c0_23 = arith.constant 0 : index
    %c0_24 = arith.constant 0 : index
    %31 = vector.load %arg10[%c0_23, %c0_24] : memref<8x128xf32, #tpu.memory_space<vmem>>, vector<8x128xf32>
    tpu.vector_store %arg10[%c0_23, %c0_24], %30 {strides = array<i32>} : memref<8x128xf32, #tpu.memory_space<vmem>>, vector<8x128xf32>,
    return
  }
  func.func @transform_0(%arg0: i32) -> (i32, i32) {
    %c0_i32 = arith.constant 0 : i32
    %c0_i32_0 = arith.constant 0 : i32
    return %arg0, %c0_i32 : i32, i32
  }
  func.func @transform_1(%arg0: i32) -> (i32, i32) {
    %c0_i32 = arith.constant 0 : i32
    %c0_i32_0 = arith.constant 0 : i32
    %c0_i32_1 = arith.constant 0 : i32
    return %c0_i32, %c0_i32_0 : i32, i32
  }
  func.func @transform_2(%arg0: i32) -> (i32, i32) {
    %c0_i32 = arith.constant 0 : i32
    %c0_i32_0 = arith.constant 0 : i32
    %c0_i32_1 = arith.constant 0 : i32
    return %c0_i32, %c0_i32_0 : i32, i32
  }
  func.func @transform_3(%arg0: i32) -> (i32, i32) {
    %c0_i32 = arith.constant 0 : i32
    %c0_i32_0 = arith.constant 0 : i32
    %c0_i32_1 = arith.constant 0 : i32
    return %c0_i32, %c0_i32_0 : i32, i32
  }
  func.func @transform_4(%arg0: i32) -> (i32, i32) {
    %c0_i32 = arith.constant 0 : i32
    %c0_i32_0 = arith.constant 0 : i32
    %c0_i32_1 = arith.constant 0 : i32
    return %c0_i32, %c0_i32_0 : i32, i32
  }
  func.func @transform_5(%arg0: i32) -> (i32, i32) {
    %c0_i32 = arith.constant 0 : i32
    %c0_i32_0 = arith.constant 0 : i32
    %c0_i32_1 = arith.constant 0 : i32
    return %c0_i32, %c0_i32_0 : i32, i32
  }
  func.func @transform_6(%arg0: i32) -> (i32, i32) {
    %c0_i32 = arith.constant 0 : i32
    %c0_i32_0 = arith.constant 0 : i32
    %c0_i32_1 = arith.constant 0 : i32
    return %c0_i32, %c0_i32_0 : i32, i32
  }
  func.func @transform_7(%arg0: i32) -> (i32, i32) {
    %c0_i32 = arith.constant 0 : i32
    %c0_i32_0 = arith.constant 0 : i32
    %c0_i32_1 = arith.constant 0 : i32
    return %c0_i32, %c0_i32_0 : i32, i32
  }
  func.func @transform_8(%arg0: i32) -> (i32, i32) {
    %c0_i32 = arith.constant 0 : i32
    %c0_i32_0 = arith.constant 0 : i32
    %c0_i32_1 = arith.constant 0 : i32
    return %c0_i32, %c0_i32_0 : i32, i32
  }
  func.func @transform_9(%arg0: i32) -> (i32, i32) {
    %c0_i32 = arith.constant 0 : i32
    %c0_i32_0 = arith.constant 0 : i32
    return %arg0, %c0_i32 : i32, i32
  }
}

</mosaic_0001>

<bundles_post_ra>
// kernel: tpu_custom_call.1
= control target key start
LH: loop header
LB: loop body
LE: loop exit
PB: predicated region body
PF: predicated region fallthrough
CT: control target
= control target key end

     0   :  { %14 = vsyncpa [#allocation3], 0  ;;  %s11376_s0 = inlined_call_operand.hbm [shape: f32[8,32], index: 0, kind: input, shape index: {}]   ;;  %s11377_s1 = inlined_call_operand.hbm [shape: bf16[32,1024], index: 1, kind: input, shape index: {}]   ;;  %s11378_s2 = inlined_call_operand.hbm [shape: f32[1,1024], index: 2, kind: input, shape index: {}]   ;;  %s11379_s3 = inlined_call_operand.hbm [shape: bf16[1024,1024], index: 3, kind: input, shape index: {}]   ;;  %s11380_s4 = inlined_call_operand.hbm [shape: f32[1,1024], index: 4, kind: input, shape index: {}]   ;;  %s11381_s5 = inlined_call_operand.hbm [shape: bf16[1024,512], index: 5, kind: input, shape index: {}]   ;;  %s11382_s6 = inlined_call_operand.hbm [shape: f32[1,512], index: 6, kind: input, shape index: {}]   ;;  %s11383_s7 = inlined_call_operand.hbm [shape: bf16[512,128], index: 7, kind: input, shape index: {}]   ;;  %s11384_s8 = inlined_call_operand.hbm [shape: f32[1,128], index: 8, kind: input, shape index: {}]   ;;  %s11385_s9 = inlined_call_operand.hbm [shape: f32[8,128], index: 9, kind: output, shape index: {}]  }
   0x1   :  { %15 = vsyncpa [#allocation6], 0 }
   0x2   :  { %16 = vsyncpa [#allocation9], 0 }
   0x3   :  { %17 = vsyncpa [#allocation12], 0 }
   0x4   :  { %18 = vsyncpa [#allocation15], 0  ;;  %s35_s11 = sshll.u32 %s11377_s1, 4  ;;  %s36_s11 = int_to_ptr.hbm [resolvable:$true] %s35_s11 }
   0x5   :  { %19 = vsyncpa [#allocation4], 0  ;;  %s11006_s12 = smov [#allocation5]   ;;  %s59_s16 = sshll.u32 %s11379_s3, 4  ;;  %s60_s16 = int_to_ptr.hbm [resolvable:$true] %s59_s16 }
   0x6   :  { %s37_s13 = sshll.u32 %s11006_s12, 4  ;;  %s11007_s17 = smov 512   ;;  %s38_s13 = int_to_ptr.vmem [resolvable:$true] %s37_s13 }
   0x7   :  { %s11008_s18 = smov 32   ;;  %s11009_s19 = smov [#allocation8]  }
   0x8   :  { %43 = dma.hbm_to_vmem [thread:$0]  %s36_s11, 2048, %s38_s13, [#allocation6], %s11007_s17, %s11007_s17, %s11008_s18  }
   0x9   :  { %s61_s20 = sshll.u32 %s11009_s19, 4  ;;  %s83_s23 = sshll.u32 %s11381_s5, 4  ;;  %s62_s20 = int_to_ptr.vmem [resolvable:$true] %s61_s20  ;;  %s84_s23 = int_to_ptr.hbm [resolvable:$true] %s83_s23 }
   0xa   :  { %67 = dma.hbm_to_vmem [thread:$0]  %s60_s16, 65536, %s62_s20, [#allocation9], %s11007_s17, %s11007_s17, %s11008_s18  }
   0xb   :  { %s11010_s1 = smov [#allocation11]   ;;  %s107_s3 = sshll.u32 %s11383_s7, 4  ;;  %s108_s3 = int_to_ptr.hbm [resolvable:$true] %s107_s3 }
   0xc   :  { %s85_s24 = sshll.u32 %s11010_s1, 4  ;;  %s11011_s27 = smov 256   ;;  %s86_s24 = int_to_ptr.vmem [resolvable:$true] %s85_s24 }
   0xd   :  { %s11012_s28 = smov 16   ;;  %s11013_s29 = smov [#allocation14]  }
   0xe   :  { %91 = dma.hbm_to_vmem [thread:$0]  %s84_s23, 32768, %s86_s24, [#allocation12], %s11011_s27, %s11011_s27, %s11012_s28  }
   0xf   :  { %s109_s30 = sshll.u32 %s11013_s29, 4  ;;  %s11014_s10 = smov 64   ;;  %s110_s30 = int_to_ptr.vmem [resolvable:$true] %s109_s30 }
  0x10   :  { %s11015_s11 = smov 4   ;;  %s25_s13 = sshll.u32 %s11376_s0, 4  ;;  %s26_s13 = int_to_ptr.hbm [resolvable:$true] %s25_s13 }
  0x11   :  { %115 = dma.hbm_to_vmem [thread:$0]  %s108_s3, 4096, %s110_s30, [#allocation15], %s11014_s10, %s11014_s10, %s11015_s11  }
  0x12   :  { %s11016_s14 = smov [#allocation2]   ;;  %s49_s17 = sshll.u32 %s11378_s2, 4  ;;  %s50_s17 = int_to_ptr.hbm [resolvable:$true] %s49_s17 }
  0x13   :  { %s27_s15 = sshll.u32 %s11016_s14, 4  ;;  %s11017_s18 = smov [#allocation7]   ;;  %s28_s15 = int_to_ptr.vmem [resolvable:$true] %s27_s15 }
  0x14   :  { %30 = dma.hbm_to_vmem [thread:$0]  %s26_s13, 128, %s28_s15, [#allocation3]  }
  0x15   :  { %s51_s19 = sshll.u32 %s11017_s18, 4  ;;  %s73_s22 = sshll.u32 %s11380_s4, 4  ;;  %s52_s19 = int_to_ptr.vmem [resolvable:$true] %s51_s19  ;;  %s74_s22 = int_to_ptr.hbm [resolvable:$true] %s73_s22 }
  0x16   :  { %54 = dma.hbm_to_vmem [thread:$0]  %s50_s17, 128, %s52_s19, [#allocation6]  }
  0x17   :  { %s97_s1 = sshll.u32 %s11382_s6, 4  ;;  %s11018_s24 = smov [#allocation10]   ;;  %s98_s1 = int_to_ptr.hbm [resolvable:$true] %s97_s1 }
  0x18   :  { %s75_s25 = sshll.u32 %s11018_s24, 4  ;;  %s11019_s2 = smov [#allocation13]   ;;  %s76_s25 = int_to_ptr.vmem [resolvable:$true] %s75_s25 }
  0x19   :  { %78 = dma.hbm_to_vmem [thread:$0]  %s74_s22, 128, %s76_s25, [#allocation9]  }
  0x1a   :  { %s99_s26 = sshll.u32 %s11019_s2, 4  ;;  %s121_s28 = sshll.u32 %s11384_s8, 4  ;;  %s100_s26 = int_to_ptr.vmem [resolvable:$true] %s99_s26  ;;  %s122_s28 = int_to_ptr.hbm [resolvable:$true] %s121_s28 }
  0x1b   :  { %102 = dma.hbm_to_vmem [thread:$0]  %s98_s1, 64, %s100_s26, [#allocation12]  }
  0x1c   :  { %s11020_s4 = smov [#allocation16]  }
  0x1d   :  { %s123_s29 = sshll.u32 %s11020_s4, 4  ;;  %s124_s29 = int_to_ptr.vmem [resolvable:$true] %s123_s29 }
  0x1e   :  { %126 = dma.hbm_to_vmem [thread:$0]  %s122_s28, 16, %s124_s29, [#allocation15]  }
  0x1f   :  { %10994 = dma.done.wait [#allocation3], 128  }
  0x20   :  { %10995 = vsyncadd [#allocation3], 4294967168 }
  0x21   :  { %10996 = dma.done.wait [#allocation6], 2176  }
  0x22   :  { %10997 = vsyncadd [#allocation6], 4294965120 }
  0x23   :  { %10998 = dma.done.wait [#allocation9], 65664  }
  0x24   :  { %10999 = vsyncadd [#allocation9], 4294901632 }
  0x25   :  { %11000 = dma.done.wait [#allocation12], 32832  }
  0x26   :  { %11001 = vsyncadd [#allocation12], 4294934464 }
  0x27   :  { %11002 = dma.done.wait [#allocation15], 4112  }
  0x28   :  { %11003 = vsyncadd [#allocation15], 4294963184  ;;  %v6680_v0 = vld [vmem:[#allocation5 + $0x40] sm:$0xf]  ;;  %v9926_v2 = vld [vmem:[#allocation5 + $0x44] sm:$0xf] }
  0x29   :  { %v9930_v1 = vld [vmem:[#allocation5 + $0x5c] sm:$0xf0]  ;;  %v6682_v4 = vld [vmem:[#allocation5 + $0x60] sm:$0xf0]  ;;  %v6688_v5 = vld [vmem:[#allocation5 + $0x48] sm:$0xf] }
  0x2a   :  { %v6681_v3 = vor.u32 %v9930_v1, %v6680_v0  ;;  %v9931_v6 = vld [vmem:[#allocation5 + $0x64] sm:$0xf0]  ;;  %v6685_v7 = vor.u32 %v9926_v2, %v6682_v4  ;;  %v9927_v9 = vld [vmem:[#allocation5 + $0x4c] sm:$0xf]  ;;  %v6648_v11 = vld [vmem:[#allocation5] sm:$0xf] }
  0x2b   :  { %v6689_v8 = vor.u32 %v9931_v6, %v6688_v5  ;;  %v6690_v10 = vld [vmem:[#allocation5 + $0x68] sm:$0xf0]  ;;  %v9922_v13 = vld [vmem:[#allocation5 + $0x1c] sm:$0xf0]  ;;  %v9918_v14 = vld [vmem:[#allocation5 + $0x4] sm:$0xf] }
  0x2c   :  { %290 = vmatpush.bf16.msra.mxu0 %v6681_v3  ;;  %v6693_v12 = vor.u32 %v9927_v9, %v6690_v10  ;;  %v6650_v15 = vld [vmem:[#allocation5 + $0x20] sm:$0xf0]  ;;  %303 = vmatpush.bf16.msra.mxu1 %v6685_v7  ;;  %v6649_v16 = vor.u32 %v9922_v13, %v6648_v11  ;;  %v6656_v18 = vld [vmem:[#allocation5 + $0x8] sm:$0xf]  ;;  %v9919_v20 = vld [vmem:[#allocation5 + $0xc] sm:$0xf] }
  0x2d   :  { %316 = vmatpush.bf16.msra.mxu2 %v6689_v8  ;;  %v6653_v17 = vor.u32 %v9918_v14, %v6650_v15  ;;  %v9923_v19 = vld [vmem:[#allocation5 + $0x24] sm:$0xf0]  ;;  %v6658_v22 = vld [vmem:[#allocation5 + $0x28] sm:$0xf0]  ;;  %v164_v23 = vld [vmem:[#allocation2] sm:$0xff]  ;;  %vm280_vm0 = vcmask 261120  }
  0x2e   :  { %329 = vmatpush.bf16.msra.mxu3 %v6693_v12  ;;  %v6657_v21 = vor.u32 %v9923_v19, %v6656_v18  ;;  %v6696_v24 = vld [vmem:[#allocation5 + $0x50] sm:$0xf]  ;;  %v6661_v25 = vor.u32 %v9919_v20, %v6658_v22  ;;  %v11099_v26 = vpack.c.bf16 %v164_v23, %v164_v23  ;;  %v9928_v28 = vld [vmem:[#allocation5 + $0x54] sm:$0xf]  ;;  %v6704_v32 = vld [vmem:[#allocation5 + $0x58] sm:$0xf] }
  0x2f   :  { %v9932_v27 = vld [vmem:[#allocation5 + $0x6c] sm:$0xf0]  ;;  %v6698_v29 = vld [vmem:[#allocation5 + $0x70] sm:$0xf0]  ;;  %v9933_v33 = vld [vmem:[#allocation5 + $0x74] sm:$0xf0] }
  0x30   :  { %291 = vmatpush.bf16.msra.mxu0 %v6649_v16  ;;  %v6697_v30 = vor.u32 %v9932_v27, %v6696_v24  ;;  %v6701_v31 = vor.u32 %v9928_v28, %v6698_v29  ;;  %v9929_v34 = vld [vmem:[#allocation5 + $0x5c] sm:$0xf]  ;;  %304 = vmatpush.bf16.msra.mxu1 %v6653_v17  ;;  %v6705_v35 = vor.u32 %v9933_v33, %v6704_v32  ;;  %v6664_v37 = vld [vmem:[#allocation5 + $0x10] sm:$0xf]  ;;  %v9920_v41 = vld [vmem:[#allocation5 + $0x14] sm:$0xf] }
  0x31   :  { %317 = vmatpush.bf16.msra.mxu2 %v6657_v21  ;;  %v6706_v36 = vld [vmem:[#allocation5 + $0x78] sm:$0xf0]  ;;  %v9924_v38 = vld [vmem:[#allocation5 + $0x2c] sm:$0xf0]  ;;  %v6666_v42 = vld [vmem:[#allocation5 + $0x30] sm:$0xf0] }
  0x32   :  { %330 = vmatpush.bf16.msra.mxu3 %v6661_v25  ;;  %v6709_v39 = vor.u32 %v9929_v34, %v6706_v36  ;;  %v6665_v40 = vor.u32 %v9924_v38, %v6664_v37  ;;  %v6672_v43 = vld [vmem:[#allocation5 + $0x18] sm:$0xf]  ;;  %v6669_v44 = vor.u32 %v9920_v41, %v6666_v42  ;;  %v9921_v46 = vld [vmem:[#allocation5 + $0x1c] sm:$0xf]  ;;  %v6944_v48 = vld [vmem:[#allocation8 + $0x1c0] sm:$0xf] }
  0x33   :  { %6710 = vmatmul.msk.bf16.vlgmr.msra.gmra.mxu0 %vm280_vm0, %v11099_v26  ;;  %v9925_v45 = vld [vmem:[#allocation5 + $0x34] sm:$0xf0]  ;;  %v6674_v47 = vld [vmem:[#allocation5 + $0x38] sm:$0xf0]  ;;  %6711 = vmatmul.msk.bf16.vlgmr.msra.gmra.mxu1 %vm280_vm0, %v11099_v26  ;;  %v9994_v49 = vld [vmem:[#allocation8 + $0x1dc] sm:$0xf0] }
  0x34   :  { %342 = vmatpush.bf16.msrb.mxu0 %v6697_v30  ;;  %355 = vmatpush.bf16.msrb.mxu1 %v6701_v31  ;;  %v7200_v50 = vld [vmem:[#allocation8 + $0x3c0] sm:$0xf]  ;;  %v6673_v51 = vor.u32 %v9925_v45, %v6672_v43  ;;  %v6945_v52 = vor.u32 %v9994_v49, %v6944_v48  ;;  %v6677_v56 = vor.u32 %v9921_v46, %v6674_v47  ;;  %s11021_s6 = smov [#allocation17]   ;;  %s6632_s11 = sshll.u32 %s11385_s9, 4  ;;  %s6633_s11 = int_to_ptr.hbm [resolvable:$true] %s6632_s11 }
  0x35   :  { %6712 = vmatmul.msk.bf16.vlgmr.msra.gmra.mxu2 %vm280_vm0, %v11099_v26  ;;  %6713 = vmatmul.msk.bf16.vlgmr.msra.gmra.mxu3 %vm280_vm0, %v11099_v26  ;;  %v10058_v53 = vld [vmem:[#allocation8 + $0x3dc] sm:$0xf0]  ;;  %s6630_s8 = sshll.u32 %s11021_s6, 4  ;;  %s6631_s8 = int_to_ptr.vmem [resolvable:$true] %s6630_s8 }
  0x36   :  { %368 = vmatpush.bf16.msrb.mxu2 %v6705_v35  ;;  %v6912_v54 = vld [vmem:[#allocation8 + $0x180] sm:$0xf]  ;;  %381 = vmatpush.bf16.msrb.mxu3 %v6709_v39  ;;  %v7201_v57 = vor.u32 %v10058_v53, %v7200_v50 }
  0x37   :  { %v9986_v55 = vld [vmem:[#allocation8 + $0x19c] sm:$0xf0] }
  0x38   :  { %343 = vmatpush.bf16.msrb.mxu0 %v6665_v40  ;;  %v7168_v58 = vld [vmem:[#allocation8 + $0x380] sm:$0xf]  ;;  %356 = vmatpush.bf16.msrb.mxu1 %v6669_v44  ;;  %v6913_v61 = vor.u32 %v9986_v55, %v6912_v54 }
  0x39   :  { %v10050_v59 = vld [vmem:[#allocation8 + $0x39c] sm:$0xf0] }
  0x3a   :  { %v7456_v60 = vld [vmem:[#allocation8 + $0x5c0] sm:$0xf]  ;;  %v7169_v1 = vor.u32 %v10050_v59, %v7168_v58  ;;  %369 = vmatpush.bf16.msrb.mxu2 %v6673_v51  ;;  %382 = vmatpush.bf16.msrb.mxu3 %v6677_v56 }
  0x3b   :  { %v10122_v62 = vld [vmem:[#allocation8 + $0x5dc] sm:$0xf0] }
  0x3c   :  { %3494 = vmatpush.bf16.msra.mxu0 %v6945_v52  ;;  %v7712_v63 = vld [vmem:[#allocation8 + $0x7c0] sm:$0xf]  ;;  %3507 = vmatpush.bf16.msra.mxu1 %v7201_v57  ;;  %v7457_v2 = vor.u32 %v10122_v62, %v7456_v60 }
  0x3d   :  { %v10186_v0 = vld [vmem:[#allocation8 + $0x7dc] sm:$0xf0] }
  0x3e   :  { %v7713_v3 = vor.u32 %v10186_v0, %v7712_v63  ;;  %v6880_v4 = vld [vmem:[#allocation8 + $0x140] sm:$0xf]  ;;  %3520 = vmatpush.bf16.msra.mxu2 %v7457_v2 }
  0x3f   :  { %v9978_v5 = vld [vmem:[#allocation8 + $0x15c] sm:$0xf0] }
  0x40   :  { %v7136_v6 = vld [vmem:[#allocation8 + $0x340] sm:$0xf]  ;;  %3495 = vmatpush.bf16.msra.mxu0 %v6913_v61  ;;  %3533 = vmatpush.bf16.msra.mxu3 %v7713_v3  ;;  %v6881_v13 = vor.u32 %v9978_v5, %v6880_v4 }
  0x41   :  { %v10042_v7 = vld [vmem:[#allocation8 + $0x35c] sm:$0xf0]  ;;  %3508 = vmatpush.bf16.msra.mxu1 %v7169_v1 }
  0x42   :  { %v7424_v8 = vld [vmem:[#allocation8 + $0x580] sm:$0xf]  ;;  %v7137_v15 = vor.u32 %v10042_v7, %v7136_v6 }
  0x43   :  { %v10114_v9 = vld [vmem:[#allocation8 + $0x59c] sm:$0xf0]  ;;  %6714 = vmatmul.msk.bf16.vlgmr.msrb.gmra.mxu0 %vm280_vm0, %v11099_v26  ;;  %6715 = vmatmul.msk.bf16.vlgmr.msrb.gmra.mxu1 %vm280_vm0, %v11099_v26 }
  0x44   :  { %v7425_v10 = vor.u32 %v10114_v9, %v7424_v8  ;;  %v7680_v11 = vld [vmem:[#allocation8 + $0x780] sm:$0xf]  ;;  %3496 = vmatpush.bf16.msra.mxu0 %v6881_v13 }
  0x45   :  { %v10178_v12 = vld [vmem:[#allocation8 + $0x79c] sm:$0xf0]  ;;  %3509 = vmatpush.bf16.msra.mxu1 %v7137_v15  ;;  %6716 = vmatmul.msk.bf16.vlgmr.msrb.gmra.mxu2 %vm280_vm0, %v11099_v26 }
  0x46   :  { %v7681_v14 = vor.u32 %v10178_v12, %v7680_v11  ;;  %v7392_v16 = vld [vmem:[#allocation8 + $0x540] sm:$0xf]  ;;  %3521 = vmatpush.bf16.msra.mxu2 %v7425_v10  ;;  %6717 = vmatmul.msk.bf16.vlgmr.msrb.gmra.mxu3 %vm280_vm0, %v11099_v26 }
  0x47   :  { %v10106_v17 = vld [vmem:[#allocation8 + $0x55c] sm:$0xf0] }
  0x48   :  { %v7648_v18 = vld [vmem:[#allocation8 + $0x740] sm:$0xf]  ;;  %v7393_v23 = vor.u32 %v10106_v17, %v7392_v16  ;;  %3534 = vmatpush.bf16.msra.mxu3 %v7681_v14 }
  0x49   :  { %v10170_v19 = vld [vmem:[#allocation8 + $0x75c] sm:$0xf0] }
  0x4a   :  { %v6848_v20 = vld [vmem:[#allocation8 + $0x100] sm:$0xf]  ;;  %v7649_v25 = vor.u32 %v10170_v19, %v7648_v18  ;;  %3522 = vmatpush.bf16.msra.mxu2 %v7393_v23 }
  0x4b   :  { %v9970_v21 = vld [vmem:[#allocation8 + $0x11c] sm:$0xf0] }
  0x4c   :  { %v7104_v22 = vld [vmem:[#allocation8 + $0x300] sm:$0xf]  ;;  %v6849_v31 = vor.u32 %v9970_v21, %v6848_v20  ;;  %3535 = vmatpush.bf16.msra.mxu3 %v7649_v25 }
  0x4d   :  { %v10034_v24 = vld [vmem:[#allocation8 + $0x31c] sm:$0xf0] }
  0x4e   :  { %v7360_v27 = vld [vmem:[#allocation8 + $0x500] sm:$0xf]  ;;  %v7105_v32 = vor.u32 %v10034_v24, %v7104_v22  ;;  %3497 = vmatpush.bf16.msra.mxu0 %v6849_v31 }
  0x4f   :  { %v10098_v28 = vld [vmem:[#allocation8 + $0x51c] sm:$0xf0] }
  0x50   :  { %v7616_v29 = vld [vmem:[#allocation8 + $0x700] sm:$0xf]  ;;  %v7361_v36 = vor.u32 %v10098_v28, %v7360_v27  ;;  %3510 = vmatpush.bf16.msra.mxu1 %v7105_v32 }
  0x51   :  { %v10162_v30 = vld [vmem:[#allocation8 + $0x71c] sm:$0xf0] }
  0x52   :  { %v6816_v33 = vld [vmem:[#allocation8 + $0xc0] sm:$0xf]  ;;  %v7617_v38 = vor.u32 %v10162_v30, %v7616_v29  ;;  %3523 = vmatpush.bf16.msra.mxu2 %v7361_v36 }
  0x53   :  { %v9962_v34 = vld [vmem:[#allocation8 + $0xdc] sm:$0xf0] }
  0x54   :  { %v7072_v35 = vld [vmem:[#allocation8 + $0x2c0] sm:$0xf]  ;;  %v6817_v43 = vor.u32 %v9962_v34, %v6816_v33  ;;  %3536 = vmatpush.bf16.msra.mxu3 %v7617_v38 }
  0x55   :  { %v10026_v37 = vld [vmem:[#allocation8 + $0x2dc] sm:$0xf0] }
  0x56   :  { %v7328_v39 = vld [vmem:[#allocation8 + $0x4c0] sm:$0xf]  ;;  %v7073_v44 = vor.u32 %v10026_v37, %v7072_v35  ;;  %3498 = vmatpush.bf16.msra.mxu0 %v6817_v43 }
  0x57   :  { %v10090_v40 = vld [vmem:[#allocation8 + $0x4dc] sm:$0xf0] }
  0x58   :  { %v7584_v41 = vld [vmem:[#allocation8 + $0x6c0] sm:$0xf]  ;;  %v7329_v48 = vor.u32 %v10090_v40, %v7328_v39  ;;  %3511 = vmatpush.bf16.msra.mxu1 %v7073_v44 }
  0x59   :  { %v10154_v42 = vld [vmem:[#allocation8 + $0x6dc] sm:$0xf0] }
  0x5a   :  { %v6784_v45 = vld [vmem:[#allocation8 + $0x80] sm:$0xf]  ;;  %v7585_v50 = vor.u32 %v10154_v42, %v7584_v41  ;;  %3524 = vmatpush.bf16.msra.mxu2 %v7329_v48 }
  0x5b   :  { %v9954_v46 = vld [vmem:[#allocation8 + $0x9c] sm:$0xf0] }
  0x5c   :  { %v7040_v47 = vld [vmem:[#allocation8 + $0x280] sm:$0xf]  ;;  %v6785_v55 = vor.u32 %v9954_v46, %v6784_v45  ;;  %3537 = vmatpush.bf16.msra.mxu3 %v7585_v50 }
  0x5d   :  { %v10018_v49 = vld [vmem:[#allocation8 + $0x29c] sm:$0xf0] }
  0x5e   :  { %v7296_v51 = vld [vmem:[#allocation8 + $0x480] sm:$0xf]  ;;  %v7041_v26 = vor.u32 %v10018_v49, %v7040_v47  ;;  %3499 = vmatpush.bf16.msra.mxu0 %v6785_v55 }
  0x5f   :  { %v10082_v52 = vld [vmem:[#allocation8 + $0x49c] sm:$0xf0] }
  0x60   :  { %v7552_v53 = vld [vmem:[#allocation8 + $0x680] sm:$0xf]  ;;  %v7297_v59 = vor.u32 %v10082_v52, %v7296_v51  ;;  %3512 = vmatpush.bf16.msra.mxu1 %v7041_v26 }
  0x61   :  { %v10146_v54 = vld [vmem:[#allocation8 + $0x69c] sm:$0xf0] }
  0x62   :  { %v6752_v56 = vld [vmem:[#allocation8 + $0x40] sm:$0xf]  ;;  %v7553_v61 = vor.u32 %v10146_v54, %v7552_v53  ;;  %3525 = vmatpush.bf16.msra.mxu2 %v7297_v59 }
  0x63   :  { %v9946_v57 = vld [vmem:[#allocation8 + $0x5c] sm:$0xf0] }
  0x64   :  { %v7008_v58 = vld [vmem:[#allocation8 + $0x240] sm:$0xf]  ;;  %v6753_v2 = vor.u32 %v9946_v57, %v6752_v56  ;;  %3538 = vmatpush.bf16.msra.mxu3 %v7553_v61 }
  0x65   :  { %v10010_v60 = vld [vmem:[#allocation8 + $0x25c] sm:$0xf0] }
  0x66   :  { %v7264_v62 = vld [vmem:[#allocation8 + $0x440] sm:$0xf]  ;;  %v7009_v5 = vor.u32 %v10010_v60, %v7008_v58  ;;  %3500 = vmatpush.bf16.msra.mxu0 %v6753_v2 }
  0x67   :  { %v10074_v63 = vld [vmem:[#allocation8 + $0x45c] sm:$0xf0] }
  0x68   :  { %v7520_v0 = vld [vmem:[#allocation8 + $0x640] sm:$0xf]  ;;  %v7265_v9 = vor.u32 %v10074_v63, %v7264_v62  ;;  %3513 = vmatpush.bf16.msra.mxu1 %v7009_v5 }
  0x69   :  { %v10138_v1 = vld [vmem:[#allocation8 + $0x65c] sm:$0xf0] }
  0x6a   :  { %v6720_v3 = vld [vmem:[#allocation8] sm:$0xf]  ;;  %v7521_v13 = vor.u32 %v10138_v1, %v7520_v0  ;;  %3526 = vmatpush.bf16.msra.mxu2 %v7265_v9 }
  0x6b   :  { %v9938_v4 = vld [vmem:[#allocation8 + $0x1c] sm:$0xf0] }
  0x6c   :  { %v6976_v6 = vld [vmem:[#allocation8 + $0x200] sm:$0xf]  ;;  %v6721_v17 = vor.u32 %v9938_v4, %v6720_v3  ;;  %3539 = vmatpush.bf16.msra.mxu3 %v7521_v13 }
  0x6d   :  { %v10002_v7 = vld [vmem:[#allocation8 + $0x21c] sm:$0xf0] }
  0x6e   :  { %v7968_v8 = vld [vmem:[#allocation8 + $0x9c0] sm:$0xf]  ;;  %v6977_v21 = vor.u32 %v10002_v7, %v6976_v6  ;;  %3501 = vmatpush.bf16.msra.mxu0 %v6721_v17 }
  0x6f   :  { %v10250_v10 = vld [vmem:[#allocation8 + $0x9dc] sm:$0xf0] }
  0x70   :  { %v8224_v11 = vld [vmem:[#allocation8 + $0xbc0] sm:$0xf]  ;;  %v7969_v22 = vor.u32 %v10250_v10, %v7968_v8  ;;  %3514 = vmatpush.bf16.msra.mxu1 %v6977_v21 }
  0x71   :  { %v10314_v12 = vld [vmem:[#allocation8 + $0xbdc] sm:$0xf0] }
  0x72   :  { %v7232_v14 = vld [vmem:[#allocation8 + $0x400] sm:$0xf]  ;;  %v8225_v25 = vor.u32 %v10314_v12, %v8224_v11  ;;  %3546 = vmatpush.bf16.msrb.mxu0 %v7969_v22 }
  0x73   :  { %v10066_v15 = vld [vmem:[#allocation8 + $0x41c] sm:$0xf0] }
  0x74   :  { %v7488_v16 = vld [vmem:[#allocation8 + $0x600] sm:$0xf]  ;;  %v7233_v29 = vor.u32 %v10066_v15, %v7232_v14  ;;  %3559 = vmatpush.bf16.msrb.mxu1 %v8225_v25 }
  0x75   :  { %v10130_v18 = vld [vmem:[#allocation8 + $0x61c] sm:$0xf0] }
  0x76   :  { %v8480_v19 = vld [vmem:[#allocation8 + $0xdc0] sm:$0xf]  ;;  %v7489_v32 = vor.u32 %v10130_v18, %v7488_v16  ;;  %3527 = vmatpush.bf16.msra.mxu2 %v7233_v29 }
  0x77   :  { %v10378_v20 = vld [vmem:[#allocation8 + $0xddc] sm:$0xf0] }
  0x78   :  { %v8736_v23 = vld [vmem:[#allocation8 + $0xfc0] sm:$0xf]  ;;  %v8481_v33 = vor.u32 %v10378_v20, %v8480_v19  ;;  %3540 = vmatpush.bf16.msra.mxu3 %v7489_v32 }
  0x79   :  { %v10442_v24 = vld [vmem:[#allocation8 + $0xfdc] sm:$0xf0] }
  0x7a   :  { %v7936_v27 = vld [vmem:[#allocation8 + $0x980] sm:$0xf]  ;;  %v8737_v34 = vor.u32 %v10442_v24, %v8736_v23  ;;  %3572 = vmatpush.bf16.msrb.mxu2 %v8481_v33 }
  0x7b   :  { %v10242_v28 = vld [vmem:[#allocation8 + $0x99c] sm:$0xf0] }
  0x7c   :  { %v8192_v30 = vld [vmem:[#allocation8 + $0xb80] sm:$0xf]  ;;  %v7937_v37 = vor.u32 %v10242_v28, %v7936_v27  ;;  %3585 = vmatpush.bf16.msrb.mxu3 %v8737_v34 }
  0x7d   :  { %v10306_v31 = vld [vmem:[#allocation8 + $0xb9c] sm:$0xf0] }
  0x7e   :  { %v8448_v35 = vld [vmem:[#allocation8 + $0xd80] sm:$0xf]  ;;  %v8193_v40 = vor.u32 %v10306_v31, %v8192_v30  ;;  %3547 = vmatpush.bf16.msrb.mxu0 %v7937_v37 }
  0x7f   :  { %v10370_v36 = vld [vmem:[#allocation8 + $0xd9c] sm:$0xf0] }
  0x80   :  { %v8704_v38 = vld [vmem:[#allocation8 + $0xf80] sm:$0xf]  ;;  %v8449_v45 = vor.u32 %v10370_v36, %v8448_v35  ;;  %3560 = vmatpush.bf16.msrb.mxu1 %v8193_v40 }
  0x81   :  { %v10434_v39 = vld [vmem:[#allocation8 + $0xf9c] sm:$0xf0] }
  0x82   :  { %v7904_v41 = vld [vmem:[#allocation8 + $0x940] sm:$0xf]  ;;  %v8705_v46 = vor.u32 %v10434_v39, %v8704_v38  ;;  %3573 = vmatpush.bf16.msrb.mxu2 %v8449_v45 }
  0x83   :  { %v10234_v42 = vld [vmem:[#allocation8 + $0x95c] sm:$0xf0] }
  0x84   :  { %v8160_v43 = vld [vmem:[#allocation8 + $0xb40] sm:$0xf]  ;;  %v7905_v49 = vor.u32 %v10234_v42, %v7904_v41  ;;  %3586 = vmatpush.bf16.msrb.mxu3 %v8705_v46 }
  0x85   :  { %v10298_v44 = vld [vmem:[#allocation8 + $0xb5c] sm:$0xf0] }
  0x86   :  { %v8416_v47 = vld [vmem:[#allocation8 + $0xd40] sm:$0xf]  ;;  %v8161_v52 = vor.u32 %v10298_v44, %v8160_v43  ;;  %3548 = vmatpush.bf16.msrb.mxu0 %v7905_v49 }
  0x87   :  { %v10362_v48 = vld [vmem:[#allocation8 + $0xd5c] sm:$0xf0] }
  0x88   :  { %v8672_v50 = vld [vmem:[#allocation8 + $0xf40] sm:$0xf]  ;;  %v8417_v56 = vor.u32 %v10362_v48, %v8416_v47  ;;  %3561 = vmatpush.bf16.msrb.mxu1 %v8161_v52 }
  0x89   :  { %v10426_v51 = vld [vmem:[#allocation8 + $0xf5c] sm:$0xf0] }
  0x8a   :  { %v7872_v53 = vld [vmem:[#allocation8 + $0x900] sm:$0xf]  ;;  %v8673_v57 = vor.u32 %v10426_v51, %v8672_v50  ;;  %3574 = vmatpush.bf16.msrb.mxu2 %v8417_v56  ;;  %v11117_v51 = vld [vmem:[#allocation7] sm:$0xff]  ;;  %v9990_v56 = vld [vmem:[#allocation8 + $0x1c4] sm:$0xf] }
  0x8b   :  { %v10226_v54 = vld [vmem:[#allocation8 + $0x91c] sm:$0xf0]  ;;  %v184_v52 = vperm.slane %v11117_v51, 0 }
  0x8c   :  { %v8128_v55 = vld [vmem:[#allocation8 + $0xb00] sm:$0xf]  ;;  %v7873_v60 = vor.u32 %v10226_v54, %v7872_v53  ;;  %3587 = vmatpush.bf16.msrb.mxu3 %v8673_v57  ;;  %v185_v53 = vperm.slane %v11117_v51, 1  ;;  %v6946_v57 = vld [vmem:[#allocation8 + $0x1e0] sm:$0xf0] }
  0x8d   :  { %v10290_v26 = vld [vmem:[#allocation8 + $0xb1c] sm:$0xf0] }
  0x8e   :  { %v8384_v58 = vld [vmem:[#allocation8 + $0xd00] sm:$0xf]  ;;  %v8129_v63 = vor.u32 %v10290_v26, %v8128_v55  ;;  %3549 = vmatpush.bf16.msrb.mxu0 %v7873_v60  ;;  %v7202_v60 = vld [vmem:[#allocation8 + $0x3e0] sm:$0xf0] }
  0x8f   :  { %v10354_v59 = vld [vmem:[#allocation8 + $0xd1c] sm:$0xf0] }
  0x90   :  { %v8640_v61 = vld [vmem:[#allocation8 + $0xf00] sm:$0xf]  ;;  %v8385_v4 = vor.u32 %v10354_v59, %v8384_v58  ;;  %3562 = vmatpush.bf16.msrb.mxu1 %v8129_v63  ;;  %v10054_v59 = vld [vmem:[#allocation8 + $0x3c4] sm:$0xf]  ;;  %v186_v63 = vperm.slane %v11117_v51, 2 }
  0x91   :  { %v10418_v62 = vld [vmem:[#allocation8 + $0xf1c] sm:$0xf0] }
  0x92   :  { %v7840_v0 = vld [vmem:[#allocation8 + $0x8c0] sm:$0xf]  ;;  %v8641_v5 = vor.u32 %v10418_v62, %v8640_v61  ;;  %3575 = vmatpush.bf16.msrb.mxu2 %v8385_v4  ;;  %v9982_v4 = vld [vmem:[#allocation8 + $0x184] sm:$0xf] }
  0x93   :  { %v10218_v1 = vld [vmem:[#allocation8 + $0x8dc] sm:$0xf0] }
  0x94   :  { %v8096_v2 = vld [vmem:[#allocation8 + $0xac0] sm:$0xf]  ;;  %v7841_v6 = vor.u32 %v10218_v1, %v7840_v0  ;;  %3588 = vmatpush.bf16.msrb.mxu3 %v8641_v5  ;;  %v6949_v0 = vor.u32 %v9990_v56, %v6946_v57  ;;  %v6914_v5 = vld [vmem:[#allocation8 + $0x1a0] sm:$0xf0] }
  0x95   :  { %v10282_v3 = vld [vmem:[#allocation8 + $0xadc] sm:$0xf0]  ;;  %v7650_v56 = vld [vmem:[#allocation8 + $0x760] sm:$0xf0] }
  0x96   :  { %v8097_v7 = vor.u32 %v10282_v3, %v8096_v2  ;;  %v7808_v8 = vld [vmem:[#allocation8 + $0x880] sm:$0xf]  ;;  %3550 = vmatpush.bf16.msrb.mxu0 %v7841_v6  ;;  %v187_v2 = vperm.slane %v11117_v51, 3  ;;  %v7205_v3 = vor.u32 %v10054_v59, %v7202_v60  ;;  %v9958_v57 = vld [vmem:[#allocation8 + $0xc4] sm:$0xf] }
  0x97   :  { %v10210_v9 = vld [vmem:[#allocation8 + $0x89c] sm:$0xf0]  ;;  %v6818_v59 = vld [vmem:[#allocation8 + $0xe0] sm:$0xf0] }
  0x98   :  { %v8064_v10 = vld [vmem:[#allocation8 + $0xa80] sm:$0xf]  ;;  %v7809_v12 = vor.u32 %v10210_v9, %v7808_v8  ;;  %3563 = vmatpush.bf16.msrb.mxu1 %v8097_v7  ;;  %v10046_v7 = vld [vmem:[#allocation8 + $0x384] sm:$0xf] }
  0x99   :  { %v10274_v11 = vld [vmem:[#allocation8 + $0xa9c] sm:$0xf0]  ;;  %v7170_v8 = vld [vmem:[#allocation8 + $0x3a0] sm:$0xf0] }
  0x9a   :  { %v8065_v13 = vor.u32 %v10274_v11, %v8064_v10  ;;  %3551 = vmatpush.bf16.msrb.mxu0 %v7809_v12  ;;  %v8352_v14 = vld [vmem:[#allocation8 + $0xcc0] sm:$0xf]  ;;  %v10022_v60 = vld [vmem:[#allocation8 + $0x2c4] sm:$0xf] }
  0x9b   :  { %v10346_v15 = vld [vmem:[#allocation8 + $0xcdc] sm:$0xf0] }
  0x9c   :  { %3564 = vmatpush.bf16.msrb.mxu1 %v8065_v13  ;;  %v8608_v16 = vld [vmem:[#allocation8 + $0xec0] sm:$0xf]  ;;  %v8353_v17 = vor.u32 %v10346_v15, %v8352_v14  ;;  %v6917_v13 = vor.u32 %v9982_v4, %v6914_v5  ;;  %v10118_v14 = vld [vmem:[#allocation8 + $0x5c4] sm:$0xf]  ;;  %v191_v4 = vperm.slane %v11117_v51, 7 }
  0x9d   :  { %v10410_v18 = vld [vmem:[#allocation8 + $0xedc] sm:$0xf0]  ;;  %v7458_v15 = vld [vmem:[#allocation8 + $0x5e0] sm:$0xf0] }
  0x9e   :  { %v8609_v19 = vor.u32 %v10410_v18, %v8608_v16  ;;  %v7776_v20 = vld [vmem:[#allocation8 + $0x840] sm:$0xf]  ;;  %3576 = vmatpush.bf16.msrb.mxu2 %v8353_v17  ;;  %v10182_v16 = vld [vmem:[#allocation8 + $0x7c4] sm:$0xf] }
  0x9f   :  { %v10202_v21 = vld [vmem:[#allocation8 + $0x85c] sm:$0xf0]  ;;  %v10094_v5 = vld [vmem:[#allocation8 + $0x504] sm:$0xf] }
  0xa0   :  { %v7777_v22 = vor.u32 %v10202_v21, %v7776_v20  ;;  %v8032_v23 = vld [vmem:[#allocation8 + $0xa40] sm:$0xf]  ;;  %3589 = vmatpush.bf16.msrb.mxu3 %v8609_v19  ;;  %v7173_v19 = vor.u32 %v10046_v7, %v7170_v8  ;;  %v7714_v20 = vld [vmem:[#allocation8 + $0x7e0] sm:$0xf0] }
  0xa1   :  { %v10266_v24 = vld [vmem:[#allocation8 + $0xa5c] sm:$0xf0]  ;;  %v9974_v21 = vld [vmem:[#allocation8 + $0x144] sm:$0xf] }
  0xa2   :  { %v8033_v25 = vor.u32 %v10266_v24, %v8032_v23  ;;  %v8320_v27 = vld [vmem:[#allocation8 + $0xc80] sm:$0xf]  ;;  %3552 = vmatpush.bf16.msrb.mxu0 %v7777_v22  ;;  %v6882_v22 = vld [vmem:[#allocation8 + $0x160] sm:$0xf0] }
  0xa3   :  { %v10338_v28 = vld [vmem:[#allocation8 + $0xc9c] sm:$0xf0]  ;;  %v10038_v24 = vld [vmem:[#allocation8 + $0x344] sm:$0xf] }
  0xa4   :  { %v8576_v29 = vld [vmem:[#allocation8 + $0xe80] sm:$0xf]  ;;  %v8321_v30 = vor.u32 %v10338_v28, %v8320_v27  ;;  %3565 = vmatpush.bf16.msrb.mxu1 %v8033_v25  ;;  %v7138_v25 = vld [vmem:[#allocation8 + $0x360] sm:$0xf0]  ;;  %v7461_v28 = vor.u32 %v10118_v14, %v7458_v15 }
  0xa5   :  { %v10402_v31 = vld [vmem:[#allocation8 + $0xe9c] sm:$0xf0]  ;;  %v7362_v7 = vld [vmem:[#allocation8 + $0x520] sm:$0xf0] }
  0xa6   :  { %v8577_v32 = vor.u32 %v10402_v31, %v8576_v29  ;;  %v7744_v33 = vld [vmem:[#allocation8 + $0x800] sm:$0xf]  ;;  %3577 = vmatpush.bf16.msrb.mxu2 %v8321_v30  ;;  %v188_v29 = vperm.slane %v11117_v51, 4  ;;  %v7717_v31 = vor.u32 %v10182_v16, %v7714_v20  ;;  %v6786_v15 = vld [vmem:[#allocation8 + $0xa0] sm:$0xf0] }
  0xa7   :  { %v10194_v34 = vld [vmem:[#allocation8 + $0x81c] sm:$0xf0]  ;;  %v10014_v16 = vld [vmem:[#allocation8 + $0x284] sm:$0xf] }
  0xa8   :  { %v8000_v35 = vld [vmem:[#allocation8 + $0xa00] sm:$0xf]  ;;  %v7745_v36 = vor.u32 %v10194_v34, %v7744_v33  ;;  %3590 = vmatpush.bf16.msrb.mxu3 %v8577_v32  ;;  %v6885_v32 = vor.u32 %v9974_v21, %v6882_v22  ;;  %v10110_v33 = vld [vmem:[#allocation8 + $0x584] sm:$0xf] }
  0xa9   :  { %v10258_v37 = vld [vmem:[#allocation8 + $0xa1c] sm:$0xf0]  ;;  %v7426_v34 = vld [vmem:[#allocation8 + $0x5a0] sm:$0xf0] }
  0xaa   :  { %v8001_v38 = vor.u32 %v10258_v37, %v8000_v35  ;;  %3553 = vmatpush.bf16.msrb.mxu0 %v7745_v36  ;;  %v8288_v39 = vld [vmem:[#allocation8 + $0xc40] sm:$0xf]  ;;  %v10174_v35 = vld [vmem:[#allocation8 + $0x784] sm:$0xf]  ;;  %v7141_v37 = vor.u32 %v10038_v24, %v7138_v25 }
  0xab   :  { %v10330_v40 = vld [vmem:[#allocation8 + $0xc5c] sm:$0xf0]  ;;  %v10086_v22 = vld [vmem:[#allocation8 + $0x4c4] sm:$0xf] }
  0xac   :  { %3566 = vmatpush.bf16.msrb.mxu1 %v8001_v38  ;;  %v8289_v41 = vor.u32 %v10330_v40, %v8288_v39  ;;  %v8544_v42 = vld [vmem:[#allocation8 + $0xe40] sm:$0xf]  ;;  %v7682_v38 = vld [vmem:[#allocation8 + $0x7a0] sm:$0xf0] }
  0xad   :  { %v10394_v43 = vld [vmem:[#allocation8 + $0xe5c] sm:$0xf0]  ;;  %v9966_v39 = vld [vmem:[#allocation8 + $0x104] sm:$0xf] }
  0xae   :  { %v8545_v44 = vor.u32 %v10394_v43, %v8544_v42  ;;  %3578 = vmatpush.bf16.msrb.mxu2 %v8289_v41  ;;  %v8256_v45 = vld [vmem:[#allocation8 + $0xc00] sm:$0xf]  ;;  %v6850_v40 = vld [vmem:[#allocation8 + $0x120] sm:$0xf0]  ;;  %v189_v41 = vperm.slane %v11117_v51, 5 }
  0xaf   :  { %v10322_v46 = vld [vmem:[#allocation8 + $0xc1c] sm:$0xf0]  ;;  %v10030_v42 = vld [vmem:[#allocation8 + $0x304] sm:$0xf] }
  0xb0   :  { %3591 = vmatpush.bf16.msrb.mxu3 %v8545_v44  ;;  %v8257_v47 = vor.u32 %v10322_v46, %v8256_v45  ;;  %v8512_v48 = vld [vmem:[#allocation8 + $0xe00] sm:$0xf]  ;;  %v293_v54 = vpop.f32.mrf.mxu0  ;;  %v306_v26 = vpop.f32.mrf.mxu1  ;;  %v7106_v43 = vld [vmem:[#allocation8 + $0x320] sm:$0xf0]  ;;  %v7429_v45 = vor.u32 %v10110_v33, %v7426_v34 }
  0xb1   :  { %v10386_v49 = vld [vmem:[#allocation8 + $0xe1c] sm:$0xf0]  ;;  %v294_v55 = vadd.f32 %v293_v54, %v184_v52  ;;  %v307_v58 = vadd.f32 %v306_v26, %v185_v53  ;;  %v7394_v52 = vld [vmem:[#allocation8 + $0x560] sm:$0xf0] }
  0xb2   :  { %v8513_v50 = vor.u32 %v10386_v49, %v8512_v48  ;;  %3579 = vmatpush.bf16.msrb.mxu2 %v8257_v47  ;;  %v7685_v48 = vor.u32 %v10174_v35, %v7682_v38  ;;  %v6853_v49 = vor.u32 %v9966_v39, %v6850_v40  ;;  %v10166_v26 = vld [vmem:[#allocation8 + $0x744] sm:$0xf] }
  0xb3   :  { %v388_v61 = vmax.f32 %v294_v55, 0.0  ;;  %v389_v62 = vmax.f32 %v307_v58, 0.0  ;;  %v7109_v55 = vor.u32 %v10030_v42, %v7106_v43  ;;  %v10150_v24 = vld [vmem:[#allocation8 + $0x6c4] sm:$0xf] }
  0xb4   :  { %3592 = vmatpush.bf16.msrb.mxu3 %v8513_v50  ;;  %v10102_v50 = vld [vmem:[#allocation8 + $0x544] sm:$0xf] }
  0xb5   :  { %v11122_v1 = vpack.c.bf16 %v388_v61, %v388_v61  ;;  %v11125_v6 = vpack.c.bf16 %v389_v62, %v389_v62  ;;  %v7074_v61 = vld [vmem:[#allocation8 + $0x2e0] sm:$0xf0] }
  0xb6   :  { %v6754_v33 = vld [vmem:[#allocation8 + $0x60] sm:$0xf0] }
  0xb7   :  { %3502 = vmatmul.bf16.vlgmr.msra.gmra.mxu0 %v11122_v1  ;;  %3515 = vmatmul.bf16.vlgmr.msra.gmra.mxu1 %v11125_v6  ;;  %v7010_v38 = vld [vmem:[#allocation8 + $0x260] sm:$0xf0] }
  0xb8   :  { %v319_v9 = vpop.f32.mrf.mxu2  ;;  %v332_v11 = vpop.f32.mrf.mxu3  ;;  %3598 = vmatpush.bf16.msra.mxu0 %v6949_v0  ;;  %3611 = vmatpush.bf16.msra.mxu1 %v7205_v3  ;;  %v190_v0 = vperm.slane %v11117_v51, 6  ;;  %v7653_v3 = vor.u32 %v10166_v26, %v7650_v56  ;;  %v7365_v51 = vor.u32 %v10094_v5, %v7362_v7  ;;  %v10078_v43 = vld [vmem:[#allocation8 + $0x484] sm:$0xf] }
  0xb9   :  { %v320_v10 = vadd.f32 %v319_v9, %v186_v63  ;;  %v295_v12 = vpop.f32.mrf.mxu0  ;;  %v333_v17 = vadd.f32 %v332_v11, %v187_v2  ;;  %v308_v18 = vpop.f32.mrf.mxu1  ;;  %v7397_v63 = vor.u32 %v10102_v50, %v7394_v52  ;;  %v6821_v9 = vor.u32 %v9958_v57, %v6818_v59  ;;  %v10158_v11 = vld [vmem:[#allocation8 + $0x704] sm:$0xf] }
  0xba   :  { %v7618_v12 = vld [vmem:[#allocation8 + $0x720] sm:$0xf0] }
  0xbb   :  { %v390_v23 = vmax.f32 %v320_v10, 0.0  ;;  %v391_v27 = vmax.f32 %v333_v17, 0.0  ;;  %v7077_v10 = vor.u32 %v10022_v60, %v7074_v61  ;;  %v7042_v17 = vld [vmem:[#allocation8 + $0x2a0] sm:$0xf0]  ;;  %v7621_v21 = vor.u32 %v10158_v11, %v7618_v12 }
  0xbc   :  { %3599 = vmatpush.bf16.msra.mxu0 %v6917_v13  ;;  %3612 = vmatpush.bf16.msra.mxu1 %v7173_v19  ;;  %v9950_v13 = vld [vmem:[#allocation8 + $0x84] sm:$0xf] }
  0xbd   :  { %v11130_v30 = vpack.c.bf16 %v390_v23, %v390_v23  ;;  %v11132_v36 = vpack.c.bf16 %v391_v27, %v391_v27  ;;  %v7330_v23 = vld [vmem:[#allocation8 + $0x4e0] sm:$0xf0] }
  0xbe   :  { %v7333_v40 = vor.u32 %v10086_v22, %v7330_v23  ;;  %v9934_v50 = vld [vmem:[#allocation8 + $0x4] sm:$0xf] }
  0xbf   :  { %3528 = vmatmul.bf16.vlgmr.msra.gmra.mxu2 %v11130_v30  ;;  %3541 = vmatmul.bf16.vlgmr.msra.gmra.mxu3 %v11132_v36  ;;  %v6722_v52 = vld [vmem:[#allocation8 + $0x20] sm:$0xf0] }
  0xc0   :  { %3624 = vmatpush.bf16.msra.mxu2 %v7461_v28  ;;  %v321_v44 = vpop.f32.mrf.mxu2  ;;  %3637 = vmatpush.bf16.msra.mxu3 %v7717_v31  ;;  %v334_v46 = vpop.f32.mrf.mxu3  ;;  %v6789_v28 = vor.u32 %v9950_v13, %v6786_v15  ;;  %v7586_v31 = vld [vmem:[#allocation8 + $0x6e0] sm:$0xf0] }
  0xc1   :  { %3600 = vmatpush.bf16.msra.mxu0 %v6885_v32  ;;  %v345_v47 = vpop.f32.mrf.mxu0  ;;  %3613 = vmatpush.bf16.msra.mxu1 %v7141_v37  ;;  %v358_v54 = vpop.f32.mrf.mxu1  ;;  %v9942_v32 = vld [vmem:[#allocation8 + $0x44] sm:$0xf]  ;;  %v7589_v42 = vor.u32 %v10150_v24, %v7586_v31 }
  0xc2   :  { %v346_v53 = vadd.f32 %v345_v47, %v188_v29  ;;  %v359_v58 = vadd.f32 %v358_v54, %v189_v41  ;;  %v7045_v29 = vor.u32 %v10014_v16, %v7042_v17  ;;  %v10006_v37 = vld [vmem:[#allocation8 + $0x244] sm:$0xf]  ;;  %v6757_v47 = vor.u32 %v9942_v32, %v6754_v33 }
  0xc3   :  { %v7298_v44 = vld [vmem:[#allocation8 + $0x4a0] sm:$0xf0] }
  0xc4   :  { %v392_v62 = vmax.f32 %v346_v53, 0.0  ;;  %3625 = vmatpush.bf16.msra.mxu2 %v7429_v45  ;;  %v393_v2 = vmax.f32 %v359_v58, 0.0  ;;  %3638 = vmatpush.bf16.msra.mxu3 %v7685_v48  ;;  %v10142_v45 = vld [vmem:[#allocation8 + $0x684] sm:$0xf]  ;;  %v7013_v48 = vor.u32 %v10006_v37, %v7010_v38  ;;  %v7301_v26 = vor.u32 %v10078_v43, %v7298_v44 }
  0xc5   :  { %3601 = vmatpush.bf16.msra.mxu0 %v6853_v49  ;;  %3614 = vmatpush.bf16.msra.mxu1 %v7109_v55  ;;  %v7554_v49 = vld [vmem:[#allocation8 + $0x6a0] sm:$0xf0] }
  0xc6   :  { %v11139_v8 = vpack.c.bf16 %v392_v62, %v392_v62  ;;  %v11141_v14 = vpack.c.bf16 %v393_v2, %v393_v2  ;;  %v9998_v53 = vld [vmem:[#allocation8 + $0x204] sm:$0xf]  ;;  %v7557_v60 = vor.u32 %v10142_v45, %v7554_v49 }
  0xc7   :  { %v6978_v54 = vld [vmem:[#allocation8 + $0x220] sm:$0xf0] }
  0xc8   :  { %3626 = vmatpush.bf16.msra.mxu2 %v7397_v63  ;;  %v371_v18 = vpop.f32.mrf.mxu2  ;;  %3554 = vmatmul.bf16.vlgmr.msrb.gmra.mxu0 %v11139_v8  ;;  %v10246_v55 = vld [vmem:[#allocation8 + $0x9c4] sm:$0xf]  ;;  %v6981_v2 = vor.u32 %v9998_v53, %v6978_v54 }
  0xc9   :  { %3639 = vmatpush.bf16.msra.mxu3 %v7653_v3  ;;  %v372_v19 = vadd.f32 %v371_v18, %v190_v0  ;;  %v384_v20 = vpop.f32.mrf.mxu3  ;;  %3567 = vmatmul.bf16.vlgmr.msrb.gmra.mxu1 %v11141_v14  ;;  %v347_v25 = vpop.f32.mrf.mxu0  ;;  %v7970_v57 = vld [vmem:[#allocation8 + $0x9e0] sm:$0xf0]  ;;  %v6725_v0 = vor.u32 %v9934_v50, %v6722_v52 }
  0xca   :  { %v385_v27 = vadd.f32 %v384_v20, %v191_v4  ;;  %3602 = vmatpush.bf16.msra.mxu0 %v6821_v9  ;;  %3615 = vmatpush.bf16.msra.mxu1 %v7077_v10  ;;  %v360_v34 = vpop.f32.mrf.mxu1  ;;  %v10310_v58 = vld [vmem:[#allocation8 + $0xbc4] sm:$0xf]  ;;  %v7973_v5 = vor.u32 %v10246_v55, %v7970_v57 }
  0xcb   :  { %v394_v35 = vmax.f32 %v372_v19, 0.0  ;;  %v8226_v59 = vld [vmem:[#allocation8 + $0xbe0] sm:$0xf0] }
  0xcc   :  { %v395_v39 = vmax.f32 %v385_v27, 0.0  ;;  %3627 = vmatpush.bf16.msra.mxu2 %v7365_v51  ;;  %v10070_v62 = vld [vmem:[#allocation8 + $0x444] sm:$0xf]  ;;  %v8229_v7 = vor.u32 %v10310_v58, %v8226_v59 }
  0xcd   :  { %v11145_v41 = vpack.c.bf16 %v394_v35, %v394_v35  ;;  %3640 = vmatpush.bf16.msra.mxu3 %v7621_v21  ;;  %v7266_v63 = vld [vmem:[#allocation8 + $0x460] sm:$0xf0] }
  0xce   :  { %v11147_v46 = vpack.c.bf16 %v395_v39, %v395_v39  ;;  %3603 = vmatpush.bf16.msra.mxu0 %v6789_v28  ;;  %3616 = vmatpush.bf16.msra.mxu1 %v7045_v29  ;;  %v10134_v3 = vld [vmem:[#allocation8 + $0x644] sm:$0xf]  ;;  %v7269_v10 = vor.u32 %v10070_v62, %v7266_v63 }
  0xcf   :  { %3580 = vmatmul.bf16.vlgmr.msrb.gmra.mxu2 %v11145_v41  ;;  %v7522_v4 = vld [vmem:[#allocation8 + $0x660] sm:$0xf0] }
  0xd0   :  { %3593 = vmatmul.bf16.vlgmr.msrb.gmra.mxu3 %v11147_v46  ;;  %3628 = vmatpush.bf16.msra.mxu2 %v7333_v40  ;;  %v373_v56 = vpop.f32.mrf.mxu2  ;;  %v10238_v9 = vld [vmem:[#allocation8 + $0x984] sm:$0xf]  ;;  %v7525_v15 = vor.u32 %v10134_v3, %v7522_v4 }
  0xd1   :  { %3641 = vmatpush.bf16.msra.mxu3 %v7589_v42  ;;  %v386_v61 = vpop.f32.mrf.mxu3  ;;  %v7938_v11 = vld [vmem:[#allocation8 + $0x9a0] sm:$0xf0] }
  0xd2   :  { %3604 = vmatpush.bf16.msra.mxu0 %v6757_v47  ;;  %3617 = vmatpush.bf16.msra.mxu1 %v7013_v48  ;;  %v10302_v12 = vld [vmem:[#allocation8 + $0xb84] sm:$0xf]  ;;  %v7941_v21 = vor.u32 %v10238_v9, %v7938_v11 }
  0xd3   :  { %v8194_v13 = vld [vmem:[#allocation8 + $0xba0] sm:$0xf0] }
  0xd4   :  { %3629 = vmatpush.bf16.msra.mxu2 %v7301_v26  ;;  %v10062_v16 = vld [vmem:[#allocation8 + $0x404] sm:$0xf]  ;;  %v8197_v22 = vor.u32 %v10302_v12, %v8194_v13 }
  0xd5   :  { %3642 = vmatpush.bf16.msra.mxu3 %v7557_v60  ;;  %v7234_v17 = vld [vmem:[#allocation8 + $0x420] sm:$0xf0] }
  0xd6   :  { %v10126_v18 = vld [vmem:[#allocation8 + $0x604] sm:$0xf]  ;;  %3605 = vmatpush.bf16.msra.mxu0 %v6725_v0  ;;  %3618 = vmatpush.bf16.msra.mxu1 %v6981_v2  ;;  %v7237_v27 = vor.u32 %v10062_v16, %v7234_v17 }
  0xd7   :  { %v7490_v51 = vld [vmem:[#allocation8 + $0x620] sm:$0xf0] }
  0xd8   :  { %v10374_v19 = vld [vmem:[#allocation8 + $0xdc4] sm:$0xf]  ;;  %3630 = vmatpush.bf16.msra.mxu2 %v7269_v10  ;;  %v7493_v32 = vor.u32 %v10126_v18, %v7490_v51 }
  0xd9   :  { %v8482_v20 = vld [vmem:[#allocation8 + $0xde0] sm:$0xf0]  ;;  %3643 = vmatpush.bf16.msra.mxu3 %v7525_v15  ;;  %3606 = vmatmul.bf16.vlgmr.msra.gmra.mxu0 %v11122_v1 }
  0xda   :  { %3650 = vmatpush.bf16.msrb.mxu0 %v7973_v5  ;;  %3663 = vmatpush.bf16.msrb.mxu1 %v8229_v7  ;;  %v10438_v23 = vld [vmem:[#allocation8 + $0xfc4] sm:$0xf]  ;;  %v8485_v33 = vor.u32 %v10374_v19, %v8482_v20 }
  0xdb   :  { %v8738_v24 = vld [vmem:[#allocation8 + $0xfe0] sm:$0xf0]  ;;  %3619 = vmatmul.bf16.vlgmr.msra.gmra.mxu1 %v11125_v6 }
  0xdc   :  { %v10230_v25 = vld [vmem:[#allocation8 + $0x944] sm:$0xf]  ;;  %v8741_v34 = vor.u32 %v10438_v23, %v8738_v24  ;;  %3631 = vmatpush.bf16.msra.mxu2 %v7237_v27 }
  0xdd   :  { %v7906_v28 = vld [vmem:[#allocation8 + $0x960] sm:$0xf0]  ;;  %3644 = vmatpush.bf16.msra.mxu3 %v7493_v32 }
  0xde   :  { %v10294_v29 = vld [vmem:[#allocation8 + $0xb44] sm:$0xf]  ;;  %3651 = vmatpush.bf16.msrb.mxu0 %v7941_v21  ;;  %3664 = vmatpush.bf16.msrb.mxu1 %v8197_v22  ;;  %v7909_v38 = vor.u32 %v10230_v25, %v7906_v28 }
  0xdf   :  { %v8162_v31 = vld [vmem:[#allocation8 + $0xb60] sm:$0xf0]  ;;  %3632 = vmatmul.bf16.vlgmr.msra.gmra.mxu2 %v11130_v30 }
  0xe0   :  { %v10366_v35 = vld [vmem:[#allocation8 + $0xd84] sm:$0xf]  ;;  %v8165_v39 = vor.u32 %v10294_v29, %v8162_v31  ;;  %3676 = vmatpush.bf16.msrb.mxu2 %v8485_v33  ;;  %3645 = vmatmul.bf16.vlgmr.msra.gmra.mxu3 %v11132_v36 }
  0xe1   :  { %v8450_v37 = vld [vmem:[#allocation8 + $0xda0] sm:$0xf0]  ;;  %3689 = vmatpush.bf16.msrb.mxu3 %v8741_v34 }
  0xe2   :  { %v10430_v40 = vld [vmem:[#allocation8 + $0xf84] sm:$0xf]  ;;  %v8453_v48 = vor.u32 %v10366_v35, %v8450_v37  ;;  %3652 = vmatpush.bf16.msrb.mxu0 %v7909_v38  ;;  %3665 = vmatpush.bf16.msrb.mxu1 %v8165_v39  ;;  %v6952_v38 = vld [vmem:[#allocation8 + $0x1c8] sm:$0xf] }
  0xe3   :  { %v8706_v42 = vld [vmem:[#allocation8 + $0xfa0] sm:$0xf0] }
  0xe4   :  { %v10222_v43 = vld [vmem:[#allocation8 + $0x904] sm:$0xf]  ;;  %v8709_v49 = vor.u32 %v10430_v40, %v8706_v42  ;;  %3677 = vmatpush.bf16.msrb.mxu2 %v8453_v48  ;;  %v9995_v40 = vld [vmem:[#allocation8 + $0x1e4] sm:$0xf0] }
  0xe5   :  { %v7874_v44 = vld [vmem:[#allocation8 + $0x920] sm:$0xf0]  ;;  %v7208_v42 = vld [vmem:[#allocation8 + $0x3c8] sm:$0xf] }
  0xe6   :  { %v10286_v45 = vld [vmem:[#allocation8 + $0xb04] sm:$0xf]  ;;  %v7877_v53 = vor.u32 %v10222_v43, %v7874_v44  ;;  %3690 = vmatpush.bf16.msrb.mxu3 %v8709_v49  ;;  %v10059_v43 = vld [vmem:[#allocation8 + $0x3e4] sm:$0xf0] }
  0xe7   :  { %v8130_v47 = vld [vmem:[#allocation8 + $0xb20] sm:$0xf0] }
  0xe8   :  { %v10358_v50 = vld [vmem:[#allocation8 + $0xd44] sm:$0xf]  ;;  %v8133_v54 = vor.u32 %v10286_v45, %v8130_v47  ;;  %3653 = vmatpush.bf16.msrb.mxu0 %v7877_v53  ;;  %v6953_v53 = vor.u32 %v9995_v40, %v6952_v38  ;;  %v6824_v38 = vld [vmem:[#allocation8 + $0xc8] sm:$0xf] }
  0xe9   :  { %v8418_v52 = vld [vmem:[#allocation8 + $0xd60] sm:$0xf0] }
  0xea   :  { %v10422_v55 = vld [vmem:[#allocation8 + $0xf44] sm:$0xf]  ;;  %v8421_v60 = vor.u32 %v10358_v50, %v8418_v52  ;;  %3666 = vmatpush.bf16.msrb.mxu1 %v8133_v54  ;;  %v7209_v54 = vor.u32 %v10059_v43, %v7208_v42  ;;  %v7080_v42 = vld [vmem:[#allocation8 + $0x2c8] sm:$0xf] }
  0xeb   :  { %v8674_v26 = vld [vmem:[#allocation8 + $0xf60] sm:$0xf0]  ;;  %v10027_v43 = vld [vmem:[#allocation8 + $0x2e4] sm:$0xf0] }
  0xec   :  { %v10214_v56 = vld [vmem:[#allocation8 + $0x8c4] sm:$0xf]  ;;  %v8677_v61 = vor.u32 %v10422_v55, %v8674_v26  ;;  %3678 = vmatpush.bf16.msrb.mxu2 %v8421_v60  ;;  %v6920_v55 = vld [vmem:[#allocation8 + $0x188] sm:$0xf] }
  0xed   :  { %v7842_v57 = vld [vmem:[#allocation8 + $0x8e0] sm:$0xf0] }
  0xee   :  { %v10278_v58 = vld [vmem:[#allocation8 + $0xac4] sm:$0xf]  ;;  %v7845_v0 = vor.u32 %v10214_v56, %v7842_v57  ;;  %3691 = vmatpush.bf16.msrb.mxu3 %v8677_v61  ;;  %v9987_v56 = vld [vmem:[#allocation8 + $0x1a4] sm:$0xf0] }
  0xef   :  { %v8098_v59 = vld [vmem:[#allocation8 + $0xae0] sm:$0xf0]  ;;  %v7176_v57 = vld [vmem:[#allocation8 + $0x388] sm:$0xf] }
  0xf0   :  { %v10350_v62 = vld [vmem:[#allocation8 + $0xd04] sm:$0xf]  ;;  %v8101_v2 = vor.u32 %v10278_v58, %v8098_v59  ;;  %3654 = vmatpush.bf16.msrb.mxu0 %v7845_v0  ;;  %v10051_v58 = vld [vmem:[#allocation8 + $0x3a4] sm:$0xf0] }
  0xf1   :  { %v8386_v63 = vld [vmem:[#allocation8 + $0xd20] sm:$0xf0]  ;;  %v7464_v0 = vld [vmem:[#allocation8 + $0x5c8] sm:$0xf] }
  0xf2   :  { %v10414_v3 = vld [vmem:[#allocation8 + $0xf04] sm:$0xf]  ;;  %v8389_v11 = vor.u32 %v10350_v62, %v8386_v63  ;;  %3667 = vmatpush.bf16.msrb.mxu1 %v8101_v2  ;;  %v10123_v2 = vld [vmem:[#allocation8 + $0x5e4] sm:$0xf0] }
  0xf3   :  { %v8642_v4 = vld [vmem:[#allocation8 + $0xf20] sm:$0xf0] }
  0xf4   :  { %v10206_v5 = vld [vmem:[#allocation8 + $0x884] sm:$0xf]  ;;  %v8645_v12 = vor.u32 %v10414_v3, %v8642_v4  ;;  %3679 = vmatpush.bf16.msrb.mxu2 %v8389_v11  ;;  %v6921_v3 = vor.u32 %v9987_v56, %v6920_v55  ;;  %v7177_v4 = vor.u32 %v10051_v58, %v7176_v57  ;;  %v9979_v11 = vld [vmem:[#allocation8 + $0x164] sm:$0xf0] }
  0xf5   :  { %v7810_v7 = vld [vmem:[#allocation8 + $0x8a0] sm:$0xf0]  ;;  %v10019_v56 = vld [vmem:[#allocation8 + $0x2a4] sm:$0xf0] }
  0xf6   :  { %v10270_v9 = vld [vmem:[#allocation8 + $0xa84] sm:$0xf]  ;;  %v7813_v16 = vor.u32 %v10206_v5, %v7810_v7  ;;  %3692 = vmatpush.bf16.msrb.mxu3 %v8645_v12  ;;  %v7720_v5 = vld [vmem:[#allocation8 + $0x7c8] sm:$0xf] }
  0xf7   :  { %v8066_v10 = vld [vmem:[#allocation8 + $0xaa0] sm:$0xf0]  ;;  %v10187_v7 = vld [vmem:[#allocation8 + $0x7e4] sm:$0xf0] }
  0xf8   :  { %v10342_v13 = vld [vmem:[#allocation8 + $0xcc4] sm:$0xf]  ;;  %v8069_v17 = vor.u32 %v10270_v9, %v8066_v10  ;;  %3655 = vmatpush.bf16.msrb.mxu0 %v7813_v16  ;;  %v6888_v10 = vld [vmem:[#allocation8 + $0x148] sm:$0xf] }
  0xf9   :  { %v8354_v15 = vld [vmem:[#allocation8 + $0xce0] sm:$0xf0]  ;;  %v10043_v16 = vld [vmem:[#allocation8 + $0x364] sm:$0xf0] }
  0xfa   :  { %v10406_v18 = vld [vmem:[#allocation8 + $0xec4] sm:$0xf]  ;;  %v8357_v23 = vor.u32 %v10342_v13, %v8354_v15  ;;  %3668 = vmatpush.bf16.msrb.mxu1 %v8069_v17  ;;  %v7465_v13 = vor.u32 %v10123_v2, %v7464_v0  ;;  %v7144_v15 = vld [vmem:[#allocation8 + $0x348] sm:$0xf]  ;;  %v7721_v17 = vor.u32 %v10187_v7, %v7720_v5 }
  0xfb   :  { %v8610_v51 = vld [vmem:[#allocation8 + $0xee0] sm:$0xf0]  ;;  %v7336_v58 = vld [vmem:[#allocation8 + $0x4c8] sm:$0xf] }
  0xfc   :  { %v10198_v19 = vld [vmem:[#allocation8 + $0x844] sm:$0xf]  ;;  %v8613_v24 = vor.u32 %v10406_v18, %v8610_v51  ;;  %3680 = vmatpush.bf16.msrb.mxu2 %v8357_v23  ;;  %v7432_v18 = vld [vmem:[#allocation8 + $0x588] sm:$0xf] }
  0xfd   :  { %v7778_v20 = vld [vmem:[#allocation8 + $0x860] sm:$0xf0]  ;;  %v10115_v51 = vld [vmem:[#allocation8 + $0x5a4] sm:$0xf0] }
  0xfe   :  { %v10262_v21 = vld [vmem:[#allocation8 + $0xa44] sm:$0xf]  ;;  %v7781_v29 = vor.u32 %v10198_v19, %v7778_v20  ;;  %3693 = vmatpush.bf16.msrb.mxu3 %v8613_v24  ;;  %v6889_v19 = vor.u32 %v9979_v11, %v6888_v10  ;;  %v7688_v20 = vld [vmem:[#allocation8 + $0x788] sm:$0xf] }
  0xff   :  { %v8034_v22 = vld [vmem:[#allocation8 + $0xa60] sm:$0xf0]  ;;  %v6856_v23 = vld [vmem:[#allocation8 + $0x108] sm:$0xf] }
 0x100   :  { %v10334_v25 = vld [vmem:[#allocation8 + $0xc84] sm:$0xf]  ;;  %v8037_v31 = vor.u32 %v10262_v21, %v8034_v22  ;;  %3656 = vmatpush.bf16.msrb.mxu0 %v7781_v29  ;;  %v10179_v21 = vld [vmem:[#allocation8 + $0x7a4] sm:$0xf0]  ;;  %v7145_v22 = vor.u32 %v10043_v16, %v7144_v15 }
 0x101   :  { %v8322_v27 = vld [vmem:[#allocation8 + $0xca0] sm:$0xf0]  ;;  %v9971_v24 = vld [vmem:[#allocation8 + $0x124] sm:$0xf0]  ;;  %v7689_v29 = vor.u32 %v10179_v21, %v7688_v20 }
 0x102   :  { %v10398_v28 = vld [vmem:[#allocation8 + $0xe84] sm:$0xf]  ;;  %v8325_v39 = vor.u32 %v10334_v25, %v8322_v27  ;;  %3669 = vmatpush.bf16.msrb.mxu1 %v8037_v31  ;;  %v7433_v25 = vor.u32 %v10115_v51, %v7432_v18  ;;  %v7112_v27 = vld [vmem:[#allocation8 + $0x308] sm:$0xf] }
 0x103   :  { %v8578_v32 = vld [vmem:[#allocation8 + $0xea0] sm:$0xf0]  ;;  %v7400_v31 = vld [vmem:[#allocation8 + $0x548] sm:$0xf] }
 0x104   :  { %v10190_v33 = vld [vmem:[#allocation8 + $0x804] sm:$0xf]  ;;  %v8581_v44 = vor.u32 %v10398_v28, %v8578_v32  ;;  %3681 = vmatpush.bf16.msrb.mxu2 %v8325_v39  ;;  %v10035_v28 = vld [vmem:[#allocation8 + $0x324] sm:$0xf0] }
 0x105   :  { %v7746_v34 = vld [vmem:[#allocation8 + $0x820] sm:$0xf0]  ;;  %v10107_v32 = vld [vmem:[#allocation8 + $0x564] sm:$0xf0] }
 0x106   :  { %v10254_v35 = vld [vmem:[#allocation8 + $0xa04] sm:$0xf]  ;;  %v7749_v48 = vor.u32 %v10190_v33, %v7746_v34  ;;  %3694 = vmatpush.bf16.msrb.mxu3 %v8581_v44  ;;  %v6857_v33 = vor.u32 %v9971_v24, %v6856_v23  ;;  %v7656_v34 = vld [vmem:[#allocation8 + $0x748] sm:$0xf]  ;;  %v7401_v40 = vor.u32 %v10107_v32, %v7400_v31 }
 0x107   :  { %v8002_v37 = vld [vmem:[#allocation8 + $0xa20] sm:$0xf0]  ;;  %v9963_v39 = vld [vmem:[#allocation8 + $0xe4] sm:$0xf0] }
 0x108   :  { %v10326_v45 = vld [vmem:[#allocation8 + $0xc44] sm:$0xf]  ;;  %v8005_v49 = vor.u32 %v10254_v35, %v8002_v37  ;;  %3657 = vmatpush.bf16.msrb.mxu0 %v7749_v48  ;;  %v10171_v35 = vld [vmem:[#allocation8 + $0x764] sm:$0xf0]  ;;  %v7113_v37 = vor.u32 %v10035_v28, %v7112_v27  ;;  %v6825_v48 = vor.u32 %v9963_v39, %v6824_v38 }
 0x109   :  { %v8290_v47 = vld [vmem:[#allocation8 + $0xc60] sm:$0xf0]  ;;  %v7657_v44 = vor.u32 %v10171_v35, %v7656_v34  ;;  %v6760_v0 = vld [vmem:[#allocation8 + $0x48] sm:$0xf] }
 0x10a   :  { %v10390_v50 = vld [vmem:[#allocation8 + $0xe44] sm:$0xf]  ;;  %v8293_v26 = vor.u32 %v10326_v45, %v8290_v47  ;;  %3670 = vmatpush.bf16.msrb.mxu1 %v8005_v49  ;;  %v7368_v45 = vld [vmem:[#allocation8 + $0x508] sm:$0xf] }
 0x10b   :  { %v8546_v52 = vld [vmem:[#allocation8 + $0xe60] sm:$0xf0]  ;;  %3658 = vmatmul.bf16.vlgmr.msrb.gmra.mxu0 %v11139_v8  ;;  %v10099_v47 = vld [vmem:[#allocation8 + $0x524] sm:$0xf0] }
 0x10c   :  { %v8549_v59 = vor.u32 %v10390_v50, %v8546_v52  ;;  %v10318_v60 = vld [vmem:[#allocation8 + $0xc04] sm:$0xf]  ;;  %3702 = vmatpush.bf16.msra.mxu0 %v6953_v53  ;;  %3682 = vmatpush.bf16.msrb.mxu2 %v8293_v26  ;;  %v7624_v49 = vld [vmem:[#allocation8 + $0x708] sm:$0xf]  ;;  %v7081_v52 = vor.u32 %v10027_v43, %v7080_v42  ;;  %v7369_v55 = vor.u32 %v10099_v47, %v7368_v45 }
 0x10d   :  { %v8258_v61 = vld [vmem:[#allocation8 + $0xc20] sm:$0xf0]  ;;  %3671 = vmatmul.bf16.vlgmr.msrb.gmra.mxu1 %v11141_v14  ;;  %v10163_v50 = vld [vmem:[#allocation8 + $0x724] sm:$0xf0] }
 0x10e   :  { %v10382_v62 = vld [vmem:[#allocation8 + $0xe04] sm:$0xf]  ;;  %3715 = vmatpush.bf16.msra.mxu1 %v7209_v54  ;;  %v8261_v9 = vor.u32 %v10318_v60, %v8258_v61  ;;  %3695 = vmatpush.bf16.msrb.mxu3 %v8549_v59  ;;  %v6792_v53 = vld [vmem:[#allocation8 + $0x88] sm:$0xf]  ;;  %v7625_v57 = vor.u32 %v10163_v50, %v7624_v49 }
 0x10f   :  { %v8514_v63 = vld [vmem:[#allocation8 + $0xe20] sm:$0xf0]  ;;  %v9955_v54 = vld [vmem:[#allocation8 + $0xa4] sm:$0xf0] }
 0x110   :  { %v8517_v12 = vor.u32 %v10382_v62, %v8514_v63  ;;  %3703 = vmatpush.bf16.msra.mxu0 %v6921_v3  ;;  %3683 = vmatpush.bf16.msrb.mxu2 %v8261_v9  ;;  %v7048_v26 = vld [vmem:[#allocation8 + $0x288] sm:$0xf]  ;;  %v6793_v60 = vor.u32 %v9955_v54, %v6792_v53 }
 0x111   :  { %v10091_v59 = vld [vmem:[#allocation8 + $0x4e4] sm:$0xf0]  ;;  %v7049_v63 = vor.u32 %v10019_v56, %v7048_v26 }
 0x112   :  { %3716 = vmatpush.bf16.msra.mxu1 %v7177_v4  ;;  %3696 = vmatpush.bf16.msrb.mxu3 %v8517_v12  ;;  %v7592_v61 = vld [vmem:[#allocation8 + $0x6c8] sm:$0xf]  ;;  %v7337_v3 = vor.u32 %v10091_v59, %v7336_v58 }
 0x113   :  { %3684 = vmatmul.bf16.vlgmr.msrb.gmra.mxu2 %v11145_v41  ;;  %v10155_v62 = vld [vmem:[#allocation8 + $0x6e4] sm:$0xf0] }
 0x114   :  { %3728 = vmatpush.bf16.msra.mxu2 %v7465_v13  ;;  %3704 = vmatpush.bf16.msra.mxu0 %v6889_v19  ;;  %v9947_v2 = vld [vmem:[#allocation8 + $0x64] sm:$0xf0]  ;;  %v7593_v7 = vor.u32 %v10155_v62, %v7592_v61 }
 0x115   :  { %3697 = vmatmul.bf16.vlgmr.msrb.gmra.mxu3 %v11147_v46  ;;  %v7016_v4 = vld [vmem:[#allocation8 + $0x248] sm:$0xf]  ;;  %v6761_v11 = vor.u32 %v9947_v2, %v6760_v0 }
 0x116   :  { %3741 = vmatpush.bf16.msra.mxu3 %v7721_v17  ;;  %3717 = vmatpush.bf16.msra.mxu1 %v7145_v22  ;;  %v10011_v5 = vld [vmem:[#allocation8 + $0x264] sm:$0xf0] }
 0x117   :  { %v7304_v9 = vld [vmem:[#allocation8 + $0x488] sm:$0xf]  ;;  %v7017_v16 = vor.u32 %v10011_v5, %v7016_v4 }
 0x118   :  { %3729 = vmatpush.bf16.msra.mxu2 %v7433_v25  ;;  %3705 = vmatpush.bf16.msra.mxu0 %v6857_v33  ;;  %v10083_v10 = vld [vmem:[#allocation8 + $0x4a4] sm:$0xf0] }
 0x119   :  { %v7560_v12 = vld [vmem:[#allocation8 + $0x688] sm:$0xf]  ;;  %v7305_v19 = vor.u32 %v10083_v10, %v7304_v9 }
 0x11a   :  { %3742 = vmatpush.bf16.msra.mxu3 %v7689_v29  ;;  %3718 = vmatpush.bf16.msra.mxu1 %v7113_v37  ;;  %v10147_v13 = vld [vmem:[#allocation8 + $0x6a4] sm:$0xf0] }
 0x11b   :  { %v6728_v15 = vld [vmem:[#allocation8 + $0x8] sm:$0xf]  ;;  %v7561_v23 = vor.u32 %v10147_v13, %v7560_v12 }
 0x11c   :  { %3730 = vmatpush.bf16.msra.mxu2 %v7401_v40  ;;  %3706 = vmatpush.bf16.msra.mxu0 %v6825_v48  ;;  %v9939_v17 = vld [vmem:[#allocation8 + $0x24] sm:$0xf0] }
 0x11d   :  { %v6984_v18 = vld [vmem:[#allocation8 + $0x208] sm:$0xf]  ;;  %v6729_v28 = vor.u32 %v9939_v17, %v6728_v15 }
 0x11e   :  { %3743 = vmatpush.bf16.msra.mxu3 %v7657_v44  ;;  %3719 = vmatpush.bf16.msra.mxu1 %v7081_v52  ;;  %v10003_v51 = vld [vmem:[#allocation8 + $0x224] sm:$0xf0] }
 0x11f   :  { %v7976_v20 = vld [vmem:[#allocation8 + $0x9c8] sm:$0xf]  ;;  %v6985_v32 = vor.u32 %v10003_v51, %v6984_v18 }
 0x120   :  { %3731 = vmatpush.bf16.msra.mxu2 %v7369_v55  ;;  %3707 = vmatpush.bf16.msra.mxu0 %v6793_v60  ;;  %v10251_v21 = vld [vmem:[#allocation8 + $0x9e4] sm:$0xf0] }
 0x121   :  { %v8232_v22 = vld [vmem:[#allocation8 + $0xbc8] sm:$0xf]  ;;  %v7977_v33 = vor.u32 %v10251_v21, %v7976_v20 }
 0x122   :  { %3744 = vmatpush.bf16.msra.mxu3 %v7625_v57  ;;  %3720 = vmatpush.bf16.msra.mxu1 %v7049_v63  ;;  %v10315_v24 = vld [vmem:[#allocation8 + $0xbe4] sm:$0xf0] }
 0x123   :  { %v7272_v25 = vld [vmem:[#allocation8 + $0x448] sm:$0xf]  ;;  %v8233_v35 = vor.u32 %v10315_v24, %v8232_v22 }
 0x124   :  { %3732 = vmatpush.bf16.msra.mxu2 %v7337_v3  ;;  %v10075_v27 = vld [vmem:[#allocation8 + $0x464] sm:$0xf0]  ;;  %3708 = vmatpush.bf16.msra.mxu0 %v6761_v11 }
 0x125   :  { %v7528_v29 = vld [vmem:[#allocation8 + $0x648] sm:$0xf]  ;;  %v7273_v37 = vor.u32 %v10075_v27, %v7272_v25 }
 0x126   :  { %3745 = vmatpush.bf16.msra.mxu3 %v7593_v7  ;;  %v10139_v31 = vld [vmem:[#allocation8 + $0x664] sm:$0xf0]  ;;  %3721 = vmatpush.bf16.msra.mxu1 %v7017_v16 }
 0x127   :  { %v7944_v34 = vld [vmem:[#allocation8 + $0x988] sm:$0xf]  ;;  %v7529_v42 = vor.u32 %v10139_v31, %v7528_v29 }
 0x128   :  { %3733 = vmatpush.bf16.msra.mxu2 %v7305_v19  ;;  %v10243_v38 = vld [vmem:[#allocation8 + $0x9a4] sm:$0xf0]  ;;  %3709 = vmatpush.bf16.msra.mxu0 %v6729_v28 }
 0x129   :  { %v8200_v39 = vld [vmem:[#allocation8 + $0xb88] sm:$0xf]  ;;  %v7945_v50 = vor.u32 %v10243_v38, %v7944_v34 }
 0x12a   :  { %v10307_v40 = vld [vmem:[#allocation8 + $0xba4] sm:$0xf0]  ;;  %3746 = vmatpush.bf16.msra.mxu3 %v7561_v23  ;;  %3722 = vmatpush.bf16.msra.mxu1 %v6985_v32 }
 0x12b   :  { %v7240_v43 = vld [vmem:[#allocation8 + $0x408] sm:$0xf]  ;;  %v8201_v54 = vor.u32 %v10307_v40, %v8200_v39  ;;  %3710 = vmatmul.bf16.vlgmr.msra.gmra.mxu0 %v11122_v1 }
 0x12c   :  { %v10067_v44 = vld [vmem:[#allocation8 + $0x424] sm:$0xf0]  ;;  %3754 = vmatpush.bf16.msrb.mxu0 %v7977_v33  ;;  %3734 = vmatpush.bf16.msra.mxu2 %v7273_v37 }
 0x12d   :  { %v7496_v45 = vld [vmem:[#allocation8 + $0x608] sm:$0xf]  ;;  %v7241_v55 = vor.u32 %v10067_v44, %v7240_v43  ;;  %3723 = vmatmul.bf16.vlgmr.msra.gmra.mxu1 %v11125_v6 }
 0x12e   :  { %v10131_v47 = vld [vmem:[#allocation8 + $0x624] sm:$0xf0]  ;;  %3767 = vmatpush.bf16.msrb.mxu1 %v8233_v35  ;;  %3747 = vmatpush.bf16.msra.mxu3 %v7529_v42 }
 0x12f   :  { %v8488_v48 = vld [vmem:[#allocation8 + $0xdc8] sm:$0xf]  ;;  %v7497_v57 = vor.u32 %v10131_v47, %v7496_v45 }
 0x130   :  { %v10379_v49 = vld [vmem:[#allocation8 + $0xde4] sm:$0xf0]  ;;  %3755 = vmatpush.bf16.msrb.mxu0 %v7945_v50  ;;  %3735 = vmatpush.bf16.msra.mxu2 %v7241_v55 }
 0x131   :  { %v8744_v52 = vld [vmem:[#allocation8 + $0xfc8] sm:$0xf]  ;;  %v8489_v58 = vor.u32 %v10379_v49, %v8488_v48 }
 0x132   :  { %v10443_v53 = vld [vmem:[#allocation8 + $0xfe4] sm:$0xf0]  ;;  %3768 = vmatpush.bf16.msrb.mxu1 %v8201_v54  ;;  %3748 = vmatpush.bf16.msra.mxu3 %v7497_v57 }
 0x133   :  { %v7912_v26 = vld [vmem:[#allocation8 + $0x948] sm:$0xf]  ;;  %v8745_v61 = vor.u32 %v10443_v53, %v8744_v52  ;;  %3736 = vmatmul.bf16.vlgmr.msra.gmra.mxu2 %v11130_v30 }
 0x134   :  { %v10235_v56 = vld [vmem:[#allocation8 + $0x964] sm:$0xf0]  ;;  %3780 = vmatpush.bf16.msrb.mxu2 %v8489_v58 }
 0x135   :  { %v8168_v59 = vld [vmem:[#allocation8 + $0xb48] sm:$0xf]  ;;  %v7913_v0 = vor.u32 %v10235_v56, %v7912_v26  ;;  %3749 = vmatmul.bf16.vlgmr.msra.gmra.mxu3 %v11132_v36 }
 0x136   :  { %v10299_v60 = vld [vmem:[#allocation8 + $0xb64] sm:$0xf0]  ;;  %3793 = vmatpush.bf16.msrb.mxu3 %v8745_v61 }
 0x137   :  { %v8456_v62 = vld [vmem:[#allocation8 + $0xd88] sm:$0xf]  ;;  %v8169_v4 = vor.u32 %v10299_v60, %v8168_v59  ;;  %3756 = vmatpush.bf16.msrb.mxu0 %v7913_v0 }
 0x138   :  { %v10371_v63 = vld [vmem:[#allocation8 + $0xda4] sm:$0xf0] }
 0x139   :  { %v8712_v2 = vld [vmem:[#allocation8 + $0xf88] sm:$0xf]  ;;  %v8457_v9 = vor.u32 %v10371_v63, %v8456_v62  ;;  %3769 = vmatpush.bf16.msrb.mxu1 %v8169_v4  ;;  %v10055_v4 = vld [vmem:[#allocation8 + $0x3cc] sm:$0xf] }
 0x13a   :  { %v10435_v3 = vld [vmem:[#allocation8 + $0xfa4] sm:$0xf0] }
 0x13b   :  { %v7880_v5 = vld [vmem:[#allocation8 + $0x908] sm:$0xf]  ;;  %v8713_v12 = vor.u32 %v10435_v3, %v8712_v2  ;;  %3781 = vmatpush.bf16.msrb.mxu2 %v8457_v9  ;;  %v9991_v2 = vld [vmem:[#allocation8 + $0x1cc] sm:$0xf] }
 0x13c   :  { %v10227_v7 = vld [vmem:[#allocation8 + $0x924] sm:$0xf0]  ;;  %v6954_v3 = vld [vmem:[#allocation8 + $0x1e8] sm:$0xf0] }
 0x13d   :  { %v8136_v10 = vld [vmem:[#allocation8 + $0xb08] sm:$0xf]  ;;  %v7881_v16 = vor.u32 %v10227_v7, %v7880_v5  ;;  %3794 = vmatpush.bf16.msrb.mxu3 %v8713_v12  ;;  %v7210_v7 = vld [vmem:[#allocation8 + $0x3e8] sm:$0xf0] }
 0x13e   :  { %v10291_v11 = vld [vmem:[#allocation8 + $0xb24] sm:$0xf0] }
 0x13f   :  { %v8424_v13 = vld [vmem:[#allocation8 + $0xd48] sm:$0xf]  ;;  %v8137_v51 = vor.u32 %v10291_v11, %v8136_v10  ;;  %3757 = vmatpush.bf16.msrb.mxu0 %v7881_v16  ;;  %v6957_v16 = vor.u32 %v9991_v2, %v6954_v3  ;;  %v10167_v3 = vld [vmem:[#allocation8 + $0x74c] sm:$0xf] }
 0x140   :  { %v10363_v15 = vld [vmem:[#allocation8 + $0xd64] sm:$0xf0] }
 0x141   :  { %v8680_v17 = vld [vmem:[#allocation8 + $0xf48] sm:$0xf]  ;;  %v8425_v21 = vor.u32 %v10363_v15, %v8424_v13  ;;  %3770 = vmatpush.bf16.msrb.mxu1 %v8137_v51 }
 0x142   :  { %v10427_v18 = vld [vmem:[#allocation8 + $0xf64] sm:$0xf0] }
 0x143   :  { %v7848_v19 = vld [vmem:[#allocation8 + $0x8c8] sm:$0xf]  ;;  %v8681_v24 = vor.u32 %v10427_v18, %v8680_v17  ;;  %3782 = vmatpush.bf16.msrb.mxu2 %v8425_v21  ;;  %v9983_v17 = vld [vmem:[#allocation8 + $0x18c] sm:$0xf]  ;;  %v7213_v18 = vor.u32 %v10055_v4, %v7210_v7 }
 0x144   :  { %v10219_v20 = vld [vmem:[#allocation8 + $0x8e4] sm:$0xf0]  ;;  %v7178_v21 = vld [vmem:[#allocation8 + $0x3a8] sm:$0xf0] }
 0x145   :  { %v8104_v22 = vld [vmem:[#allocation8 + $0xac8] sm:$0xf]  ;;  %v7849_v28 = vor.u32 %v10219_v20, %v7848_v19  ;;  %3795 = vmatpush.bf16.msrb.mxu3 %v8681_v24  ;;  %v6922_v19 = vld [vmem:[#allocation8 + $0x1a8] sm:$0xf0] }
 0x146   :  { %v10283_v23 = vld [vmem:[#allocation8 + $0xae4] sm:$0xf0]  ;;  %v10047_v20 = vld [vmem:[#allocation8 + $0x38c] sm:$0xf] }
 0x147   :  { %v8392_v25 = vld [vmem:[#allocation8 + $0xd08] sm:$0xf]  ;;  %v8105_v32 = vor.u32 %v10283_v23, %v8104_v22  ;;  %3758 = vmatpush.bf16.msrb.mxu0 %v7849_v28  ;;  %v10119_v28 = vld [vmem:[#allocation8 + $0x5cc] sm:$0xf] }
 0x148   :  { %v10355_v27 = vld [vmem:[#allocation8 + $0xd24] sm:$0xf0]  ;;  %v7658_v4 = vld [vmem:[#allocation8 + $0x768] sm:$0xf0] }
 0x149   :  { %v8648_v29 = vld [vmem:[#allocation8 + $0xf08] sm:$0xf]  ;;  %v8393_v35 = vor.u32 %v10355_v27, %v8392_v25  ;;  %3771 = vmatpush.bf16.msrb.mxu1 %v8105_v32  ;;  %v10183_v32 = vld [vmem:[#allocation8 + $0x7cc] sm:$0xf] }
 0x14a   :  { %v10419_v31 = vld [vmem:[#allocation8 + $0xf24] sm:$0xf0]  ;;  %v9959_v7 = vld [vmem:[#allocation8 + $0xcc] sm:$0xf] }
 0x14b   :  { %v7816_v33 = vld [vmem:[#allocation8 + $0x888] sm:$0xf]  ;;  %v8649_v39 = vor.u32 %v10419_v31, %v8648_v29  ;;  %3783 = vmatpush.bf16.msrb.mxu2 %v8393_v35  ;;  %v7466_v29 = vld [vmem:[#allocation8 + $0x5e8] sm:$0xf0]  ;;  %v6925_v31 = vor.u32 %v9983_v17, %v6922_v19 }
 0x14c   :  { %v10211_v34 = vld [vmem:[#allocation8 + $0x8a4] sm:$0xf0]  ;;  %v7370_v17 = vld [vmem:[#allocation8 + $0x528] sm:$0xf0] }
 0x14d   :  { %v8072_v37 = vld [vmem:[#allocation8 + $0xa88] sm:$0xf]  ;;  %v7817_v43 = vor.u32 %v10211_v34, %v7816_v33  ;;  %3796 = vmatpush.bf16.msrb.mxu3 %v8649_v39  ;;  %v7722_v33 = vld [vmem:[#allocation8 + $0x7e8] sm:$0xf0]  ;;  %v7181_v34 = vor.u32 %v10047_v20, %v7178_v21  ;;  %v11163_v39 = vld [vmem:[#allocation10] sm:$0xff] }
 0x14e   :  { %v10275_v38 = vld [vmem:[#allocation8 + $0xaa4] sm:$0xf0]  ;;  %v7626_v19 = vld [vmem:[#allocation8 + $0x728] sm:$0xf0] }
 0x14f   :  { %v8360_v40 = vld [vmem:[#allocation8 + $0xcc8] sm:$0xf]  ;;  %v8073_v47 = vor.u32 %v10275_v38, %v8072_v37  ;;  %3759 = vmatpush.bf16.msrb.mxu0 %v7817_v43  ;;  %v9975_v37 = vld [vmem:[#allocation8 + $0x14c] sm:$0xf] }
 0x150   :  { %v10347_v42 = vld [vmem:[#allocation8 + $0xce4] sm:$0xf0]  ;;  %v6890_v38 = vld [vmem:[#allocation8 + $0x168] sm:$0xf0] }
 0x151   :  { %v8616_v44 = vld [vmem:[#allocation8 + $0xec8] sm:$0xf]  ;;  %v8361_v50 = vor.u32 %v10347_v42, %v8360_v40  ;;  %3772 = vmatpush.bf16.msrb.mxu1 %v8073_v47  ;;  %v7469_v42 = vor.u32 %v10119_v28, %v7466_v29  ;;  %v10039_v43 = vld [vmem:[#allocation8 + $0x34c] sm:$0xf] }
 0x152   :  { %v10411_v45 = vld [vmem:[#allocation8 + $0xee4] sm:$0xf0]  ;;  %v10111_v47 = vld [vmem:[#allocation8 + $0x58c] sm:$0xf] }
 0x153   :  { %v7784_v48 = vld [vmem:[#allocation8 + $0x848] sm:$0xf]  ;;  %v8617_v54 = vor.u32 %v10411_v45, %v8616_v44  ;;  %3784 = vmatpush.bf16.msrb.mxu2 %v8361_v50  ;;  %v7146_v44 = vld [vmem:[#allocation8 + $0x368] sm:$0xf0]  ;;  %v7725_v45 = vor.u32 %v10183_v32, %v7722_v33  ;;  %v918_v50 = vperm.slane %v11163_v39, 0 }
 0x154   :  { %v10203_v49 = vld [vmem:[#allocation8 + $0x864] sm:$0xf0]  ;;  %v9951_v21 = vld [vmem:[#allocation8 + $0x8c] sm:$0xf] }
 0x155   :  { %v8040_v52 = vld [vmem:[#allocation8 + $0xa48] sm:$0xf]  ;;  %v7785_v56 = vor.u32 %v10203_v49, %v7784_v48  ;;  %3797 = vmatpush.bf16.msrb.mxu3 %v8617_v54  ;;  %v7434_v48 = vld [vmem:[#allocation8 + $0x5a8] sm:$0xf0]  ;;  %v6893_v49 = vor.u32 %v9975_v37, %v6890_v38  ;;  %v7149_v54 = vor.u32 %v10039_v43, %v7146_v44 }
 0x156   :  { %v10267_v53 = vld [vmem:[#allocation8 + $0xa64] sm:$0xf0]  ;;  %v10087_v29 = vld [vmem:[#allocation8 + $0x4cc] sm:$0xf] }
 0x157   :  { %v8328_v55 = vld [vmem:[#allocation8 + $0xc88] sm:$0xf]  ;;  %v8041_v60 = vor.u32 %v10267_v53, %v8040_v52  ;;  %3760 = vmatpush.bf16.msrb.mxu0 %v7785_v56  ;;  %v10175_v52 = vld [vmem:[#allocation8 + $0x78c] sm:$0xf]  ;;  %v7437_v56 = vor.u32 %v10111_v47, %v7434_v48 }
 0x158   :  { %v10339_v26 = vld [vmem:[#allocation8 + $0xca4] sm:$0xf0]  ;;  %v7690_v53 = vld [vmem:[#allocation8 + $0x7a8] sm:$0xf0] }
 0x159   :  { %v8584_v57 = vld [vmem:[#allocation8 + $0xe88] sm:$0xf]  ;;  %v8329_v0 = vor.u32 %v10339_v26, %v8328_v55  ;;  %3773 = vmatpush.bf16.msrb.mxu1 %v8041_v60  ;;  %v9967_v55 = vld [vmem:[#allocation8 + $0x10c] sm:$0xf]  ;;  %v7693_v60 = vor.u32 %v10175_v52, %v7690_v53 }
 0x15a   :  { %v10403_v58 = vld [vmem:[#allocation8 + $0xea4] sm:$0xf0]  ;;  %v6858_v26 = vld [vmem:[#allocation8 + $0x128] sm:$0xf0] }
 0x15b   :  { %v7752_v59 = vld [vmem:[#allocation8 + $0x808] sm:$0xf]  ;;  %v8585_v5 = vor.u32 %v10403_v58, %v8584_v57  ;;  %3785 = vmatpush.bf16.msrb.mxu2 %v8329_v0  ;;  %v10031_v57 = vld [vmem:[#allocation8 + $0x30c] sm:$0xf]  ;;  %v3516_v0 = vpop.f32.mrf.mxu1  ;;  %v6861_v2 = vor.u32 %v9967_v55, %v6858_v26  ;;  %v3542_v26 = vpop.f32.mrf.mxu3 }
 0x15c   :  { %v10195_v61 = vld [vmem:[#allocation8 + $0x824] sm:$0xf0]  ;;  %v7114_v58 = vld [vmem:[#allocation8 + $0x328] sm:$0xf0] }
 0x15d   :  { %v8008_v62 = vld [vmem:[#allocation8 + $0xa08] sm:$0xf]  ;;  %v7753_v11 = vor.u32 %v10195_v61, %v7752_v59  ;;  %3798 = vmatpush.bf16.msrb.mxu3 %v8585_v5  ;;  %v3503_v59 = vpop.f32.mrf.mxu0  ;;  %v10103_v61 = vld [vmem:[#allocation8 + $0x54c] sm:$0xf]  ;;  %v7117_v5 = vor.u32 %v10031_v57, %v7114_v58 }
 0x15e   :  { %v10259_v63 = vld [vmem:[#allocation8 + $0xa24] sm:$0xf0]  ;;  %v9943_v38 = vld [vmem:[#allocation8 + $0x4c] sm:$0xf] }
 0x15f   :  { %v8296_v9 = vld [vmem:[#allocation8 + $0xc48] sm:$0xf]  ;;  %v8009_v15 = vor.u32 %v10259_v63, %v8008_v62  ;;  %3761 = vmatpush.bf16.msrb.mxu0 %v7753_v11  ;;  %v7402_v62 = vld [vmem:[#allocation8 + $0x568] sm:$0xf0]  ;;  %v3504_v63 = vadd.f32 %v3503_v59, %v918_v50 }
 0x160   :  { %v10331_v10 = vld [vmem:[#allocation8 + $0xc64] sm:$0xf0]  ;;  %v7405_v11 = vor.u32 %v10103_v61, %v7402_v62  ;;  %v10007_v43 = vld [vmem:[#allocation8 + $0x24c] sm:$0xf] }
 0x161   :  { %v8552_v12 = vld [vmem:[#allocation8 + $0xe48] sm:$0xf]  ;;  %v8297_v51 = vor.u32 %v10331_v10, %v8296_v9  ;;  %3774 = vmatpush.bf16.msrb.mxu1 %v8009_v15  ;;  %v6826_v9 = vld [vmem:[#allocation8 + $0xe8] sm:$0xf0]  ;;  %v3517_v10 = vadd.f32 %v3516_v0, %v3504_v63  ;;  %v7661_v15 = vor.u32 %v10167_v3, %v7658_v4 }
 0x162   :  { %v10395_v13 = vld [vmem:[#allocation8 + $0xe64] sm:$0xf0]  ;;  %3762 = vmatmul.bf16.vlgmr.msrb.gmra.mxu0 %v11139_v8  ;;  %v7018_v44 = vld [vmem:[#allocation8 + $0x268] sm:$0xf0] }
 0x163   :  { %v8553_v22 = vor.u32 %v10395_v13, %v8552_v12  ;;  %v8264_v23 = vld [vmem:[#allocation8 + $0xc08] sm:$0xf]  ;;  %3806 = vmatpush.bf16.msra.mxu0 %v6957_v16  ;;  %3786 = vmatpush.bf16.msrb.mxu2 %v8297_v51  ;;  %v10023_v12 = vld [vmem:[#allocation8 + $0x2cc] sm:$0xf]  ;;  %v3518_v32 = vpop.f32.mrf.mxu1 }
 0x164   :  { %v10323_v24 = vld [vmem:[#allocation8 + $0xc24] sm:$0xf0]  ;;  %3775 = vmatmul.bf16.vlgmr.msrb.gmra.mxu1 %v11141_v14  ;;  %v7082_v13 = vld [vmem:[#allocation8 + $0x2e8] sm:$0xf0] }
 0x165   :  { %v8520_v25 = vld [vmem:[#allocation8 + $0xe08] sm:$0xf]  ;;  %3819 = vmatpush.bf16.msra.mxu1 %v7213_v18  ;;  %v8265_v35 = vor.u32 %v10323_v24, %v8264_v23  ;;  %3799 = vmatpush.bf16.msrb.mxu3 %v8553_v22  ;;  %v10095_v16 = vld [vmem:[#allocation8 + $0x50c] sm:$0xf]  ;;  %v6829_v18 = vor.u32 %v9959_v7, %v6826_v9  ;;  %v7085_v20 = vor.u32 %v10023_v12, %v7082_v13 }
 0x166   :  { %v10387_v27 = vld [vmem:[#allocation8 + $0xe24] sm:$0xf0]  ;;  %v10159_v51 = vld [vmem:[#allocation8 + $0x70c] sm:$0xf]  ;;  %v7373_v23 = vor.u32 %v10095_v16, %v7370_v17 }
 0x167   :  { %v8521_v40 = vor.u32 %v10387_v27, %v8520_v25  ;;  %3807 = vmatpush.bf16.msra.mxu0 %v6925_v31  ;;  %3787 = vmatpush.bf16.msrb.mxu2 %v8265_v35  ;;  %v6794_v22 = vld [vmem:[#allocation8 + $0xa8] sm:$0xf0]  ;;  %v3505_v27 = vpop.f32.mrf.mxu0  ;;  %v7629_v28 = vor.u32 %v10159_v51, %v7626_v19 }
 0x168   :  { %v10015_v24 = vld [vmem:[#allocation8 + $0x28c] sm:$0xf]  ;;  %v6797_v33 = vor.u32 %v9951_v21, %v6794_v22 }
 0x169   :  { %3820 = vmatpush.bf16.msra.mxu1 %v7181_v34  ;;  %3800 = vmatpush.bf16.msrb.mxu3 %v8521_v40  ;;  %v7050_v25 = vld [vmem:[#allocation8 + $0x2a8] sm:$0xf0] }
 0x16a   :  { %3788 = vmatmul.bf16.vlgmr.msrb.gmra.mxu2 %v11145_v41  ;;  %v7338_v31 = vld [vmem:[#allocation8 + $0x4e8] sm:$0xf0]  ;;  %v7053_v37 = vor.u32 %v10015_v24, %v7050_v25 }
 0x16b   :  { %3832 = vmatpush.bf16.msra.mxu2 %v7469_v42  ;;  %3808 = vmatpush.bf16.msra.mxu0 %v6893_v49  ;;  %v10151_v34 = vld [vmem:[#allocation8 + $0x6cc] sm:$0xf]  ;;  %v7341_v42 = vor.u32 %v10087_v29, %v7338_v31  ;;  %v3529_v49 = vpop.f32.mrf.mxu2  ;;  %v3568_v9 = vpop.f32.mrf.mxu1 }
 0x16c   :  { %3801 = vmatmul.bf16.vlgmr.msrb.gmra.mxu3 %v11147_v46  ;;  %v7594_v35 = vld [vmem:[#allocation8 + $0x6e8] sm:$0xf0]  ;;  %v3530_v55 = vadd.f32 %v3529_v49, %v3517_v10 }
 0x16d   :  { %3845 = vmatpush.bf16.msra.mxu3 %v7725_v45  ;;  %3821 = vmatpush.bf16.msra.mxu1 %v7149_v54  ;;  %v6762_v40 = vld [vmem:[#allocation8 + $0x68] sm:$0xf0]  ;;  %v7597_v45 = vor.u32 %v10151_v34, %v7594_v35 }
 0x16e   :  { %v10079_v47 = vld [vmem:[#allocation8 + $0x48c] sm:$0xf]  ;;  %v6765_v50 = vor.u32 %v9943_v38, %v6762_v40  ;;  %v3543_v0 = vadd.f32 %v3542_v26, %v3530_v55 }
 0x16f   :  { %3833 = vmatpush.bf16.msra.mxu2 %v7437_v56  ;;  %3809 = vmatpush.bf16.msra.mxu0 %v6861_v2  ;;  %v7306_v48 = vld [vmem:[#allocation8 + $0x4a8] sm:$0xf0]  ;;  %v7021_v56 = vor.u32 %v10007_v43, %v7018_v44  ;;  %v3555_v2 = vpop.f32.mrf.mxu0 }
 0x170   :  { %v10143_v52 = vld [vmem:[#allocation8 + $0x68c] sm:$0xf]  ;;  %v3556_v13 = vadd.f32 %v3555_v2, %v3543_v0 }
 0x171   :  { %3846 = vmatpush.bf16.msra.mxu3 %v7693_v60  ;;  %3822 = vmatpush.bf16.msra.mxu1 %v7117_v5  ;;  %v7562_v53 = vld [vmem:[#allocation8 + $0x6a8] sm:$0xf0]  ;;  %v7309_v60 = vor.u32 %v10079_v47, %v7306_v48 }
 0x172   :  { %v9935_v54 = vld [vmem:[#allocation8 + $0xc] sm:$0xf]  ;;  %v7565_v3 = vor.u32 %v10143_v52, %v7562_v53  ;;  %v3569_v22 = vadd.f32 %v3568_v9, %v3556_v13 }
 0x173   :  { %3834 = vmatpush.bf16.msra.mxu2 %v7405_v11  ;;  %3810 = vmatpush.bf16.msra.mxu0 %v6829_v18  ;;  %v6730_v57 = vld [vmem:[#allocation8 + $0x28] sm:$0xf0] }
 0x174   :  { %v9999_v58 = vld [vmem:[#allocation8 + $0x20c] sm:$0xf]  ;;  %v6733_v10 = vor.u32 %v9935_v54, %v6730_v57 }
 0x175   :  { %3847 = vmatpush.bf16.msra.mxu3 %v7661_v15  ;;  %3823 = vmatpush.bf16.msra.mxu1 %v7085_v20  ;;  %v6986_v59 = vld [vmem:[#allocation8 + $0x228] sm:$0xf0] }
 0x176   :  { %v10247_v61 = vld [vmem:[#allocation8 + $0x9cc] sm:$0xf]  ;;  %v6989_v15 = vor.u32 %v9999_v58, %v6986_v59 }
 0x177   :  { %3835 = vmatpush.bf16.msra.mxu2 %v7373_v23  ;;  %3811 = vmatpush.bf16.msra.mxu0 %v6797_v33  ;;  %v7978_v62 = vld [vmem:[#allocation8 + $0x9e8] sm:$0xf0]  ;;  %v3544_v33 = vpop.f32.mrf.mxu3  ;;  %v3557_v44 = vpop.f32.mrf.mxu0 }
 0x178   :  { %v10311_v63 = vld [vmem:[#allocation8 + $0xbcc] sm:$0xf]  ;;  %v7981_v16 = vor.u32 %v10247_v61, %v7978_v62 }
 0x179   :  { %3848 = vmatpush.bf16.msra.mxu3 %v7629_v28  ;;  %3824 = vmatpush.bf16.msra.mxu1 %v7053_v37  ;;  %v8234_v4 = vld [vmem:[#allocation8 + $0xbe8] sm:$0xf0]  ;;  %v3531_v28 = vpop.f32.mrf.mxu2 }
 0x17a   :  { %v10071_v5 = vld [vmem:[#allocation8 + $0x44c] sm:$0xf]  ;;  %v8237_v18 = vor.u32 %v10311_v63, %v8234_v4 }
 0x17b   :  { %3836 = vmatpush.bf16.msra.mxu2 %v7341_v42  ;;  %v7274_v7 = vld [vmem:[#allocation8 + $0x468] sm:$0xf0]  ;;  %3812 = vmatpush.bf16.msra.mxu0 %v6765_v50  ;;  %v3570_v50 = vpop.f32.mrf.mxu1 }
 0x17c   :  { %v10135_v11 = vld [vmem:[#allocation8 + $0x64c] sm:$0xf]  ;;  %v7277_v51 = vor.u32 %v10071_v5, %v7274_v7  ;;  %v919_v7 = vperm.slane %v11163_v39, 1 }
 0x17d   :  { %3849 = vmatpush.bf16.msra.mxu3 %v7597_v45  ;;  %v7530_v12 = vld [vmem:[#allocation8 + $0x668] sm:$0xf0]  ;;  %3825 = vmatpush.bf16.msra.mxu1 %v7021_v56 }
 0x17e   :  { %v10239_v17 = vld [vmem:[#allocation8 + $0x98c] sm:$0xf]  ;;  %v7533_v23 = vor.u32 %v10135_v11, %v7530_v12 }
 0x17f   :  { %3837 = vmatpush.bf16.msra.mxu2 %v7309_v60  ;;  %v7946_v19 = vld [vmem:[#allocation8 + $0x9a8] sm:$0xf0]  ;;  %3813 = vmatpush.bf16.msra.mxu0 %v6733_v10  ;;  %v3594_v5 = vpop.f32.mrf.mxu3 }
 0x180   :  { %v10303_v20 = vld [vmem:[#allocation8 + $0xb8c] sm:$0xf]  ;;  %v7949_v34 = vor.u32 %v10239_v17, %v7946_v19  ;;  %v3607_v19 = vpop.f32.mrf.mxu0 }
 0x181   :  { %v8202_v21 = vld [vmem:[#allocation8 + $0xba8] sm:$0xf0]  ;;  %3850 = vmatpush.bf16.msra.mxu3 %v7565_v3  ;;  %3826 = vmatpush.bf16.msra.mxu1 %v6989_v15  ;;  %v3581_v63 = vpop.f32.mrf.mxu2 }
 0x182   :  { %v10063_v24 = vld [vmem:[#allocation8 + $0x40c] sm:$0xf]  ;;  %v8205_v38 = vor.u32 %v10303_v20, %v8202_v21  ;;  %3814 = vmatmul.bf16.vlgmr.msra.gmra.mxu0 %v11122_v1  ;;  %v3582_v4 = vadd.f32 %v3581_v63, %v3569_v22 }
 0x183   :  { %v7242_v25 = vld [vmem:[#allocation8 + $0x428] sm:$0xf0]  ;;  %3858 = vmatpush.bf16.msrb.mxu0 %v7981_v16  ;;  %3838 = vmatpush.bf16.msra.mxu2 %v7277_v51 }
 0x184   :  { %v10127_v27 = vld [vmem:[#allocation8 + $0x60c] sm:$0xf]  ;;  %v7245_v40 = vor.u32 %v10063_v24, %v7242_v25  ;;  %3827 = vmatmul.bf16.vlgmr.msra.gmra.mxu1 %v11125_v6  ;;  %v11175_v16 = vadd.f32 %v3594_v5, %v3582_v4  ;;  %v3620_v24 = vpop.f32.mrf.mxu1 }
 0x185   :  { %v7498_v29 = vld [vmem:[#allocation8 + $0x628] sm:$0xf0]  ;;  %3871 = vmatpush.bf16.msrb.mxu1 %v8237_v18  ;;  %3851 = vmatpush.bf16.msra.mxu3 %v7533_v23  ;;  %v3608_v23 = vadd.f32 %v3607_v19, %v919_v7  ;;  %v6960_v7 = vld [vmem:[#allocation8 + $0x1d0] sm:$0xf] }
 0x186   :  { %v10375_v31 = vld [vmem:[#allocation8 + $0xdcc] sm:$0xf]  ;;  %v7501_v45 = vor.u32 %v10127_v27, %v7498_v29 }
 0x187   :  { %v8490_v32 = vld [vmem:[#allocation8 + $0xde8] sm:$0xf0]  ;;  %3859 = vmatpush.bf16.msrb.mxu0 %v7949_v34  ;;  %3839 = vmatpush.bf16.msra.mxu2 %v7245_v40  ;;  %v3621_v33 = vadd.f32 %v3620_v24, %v3608_v23  ;;  %v3596_v44 = vpop.f32.mrf.mxu3  ;;  %v6928_v24 = vld [vmem:[#allocation8 + $0x190] sm:$0xf] }
 0x188   :  { %v10439_v35 = vld [vmem:[#allocation8 + $0xfcc] sm:$0xf]  ;;  %v8493_v47 = vor.u32 %v10375_v31, %v8490_v32  ;;  %v7728_v44 = vld [vmem:[#allocation8 + $0x7d0] sm:$0xf] }
 0x189   :  { %v8746_v37 = vld [vmem:[#allocation8 + $0xfe8] sm:$0xf0]  ;;  %3872 = vmatpush.bf16.msrb.mxu1 %v8205_v38  ;;  %3852 = vmatpush.bf16.msra.mxu3 %v7501_v45  ;;  %v3583_v38 = vpop.f32.mrf.mxu2 }
 0x18a   :  { %v10231_v42 = vld [vmem:[#allocation8 + $0x94c] sm:$0xf]  ;;  %v8749_v52 = vor.u32 %v10439_v35, %v8746_v37  ;;  %3840 = vmatmul.bf16.vlgmr.msra.gmra.mxu2 %v11130_v30 }
 0x18b   :  { %v7914_v43 = vld [vmem:[#allocation8 + $0x968] sm:$0xf0]  ;;  %3884 = vmatpush.bf16.msrb.mxu2 %v8493_v47 }
 0x18c   :  { %v10295_v48 = vld [vmem:[#allocation8 + $0xb4c] sm:$0xf]  ;;  %v7917_v55 = vor.u32 %v10231_v42, %v7914_v43  ;;  %3853 = vmatmul.bf16.vlgmr.msra.gmra.mxu3 %v11132_v36 }
 0x18d   :  { %v8170_v49 = vld [vmem:[#allocation8 + $0xb68] sm:$0xf0]  ;;  %3897 = vmatpush.bf16.msrb.mxu3 %v8749_v52 }
 0x18e   :  { %v10367_v53 = vld [vmem:[#allocation8 + $0xd8c] sm:$0xf]  ;;  %v8173_v57 = vor.u32 %v10295_v48, %v8170_v49  ;;  %3860 = vmatpush.bf16.msrb.mxu0 %v7917_v55 }
 0x18f   :  { %v8458_v54 = vld [vmem:[#allocation8 + $0xda8] sm:$0xf0] }
 0x190   :  { %v10431_v26 = vld [vmem:[#allocation8 + $0xf8c] sm:$0xf]  ;;  %v8461_v60 = vor.u32 %v10367_v53, %v8458_v54  ;;  %3873 = vmatpush.bf16.msrb.mxu1 %v8173_v57 }
 0x191   :  { %v8714_v56 = vld [vmem:[#allocation8 + $0xfa8] sm:$0xf0] }
 0x192   :  { %v10223_v58 = vld [vmem:[#allocation8 + $0x90c] sm:$0xf]  ;;  %v8717_v0 = vor.u32 %v10431_v26, %v8714_v56  ;;  %3885 = vmatpush.bf16.msrb.mxu2 %v8461_v60  ;;  %v3609_v26 = vpop.f32.mrf.mxu0 }
 0x193   :  { %v7882_v59 = vld [vmem:[#allocation8 + $0x928] sm:$0xf0] }
 0x194   :  { %v10287_v61 = vld [vmem:[#allocation8 + $0xb0c] sm:$0xf]  ;;  %v7885_v9 = vor.u32 %v10223_v58, %v7882_v59  ;;  %3898 = vmatpush.bf16.msrb.mxu3 %v8717_v0  ;;  %v3622_v59 = vpop.f32.mrf.mxu1 }
 0x195   :  { %v8138_v62 = vld [vmem:[#allocation8 + $0xb28] sm:$0xf0]  ;;  %v10116_v59 = vld [vmem:[#allocation8 + $0x5ac] sm:$0xf0] }
 0x196   :  { %v10359_v2 = vld [vmem:[#allocation8 + $0xd4c] sm:$0xf]  ;;  %v8141_v12 = vor.u32 %v10287_v61, %v8138_v62  ;;  %3861 = vmatpush.bf16.msrb.mxu0 %v7885_v9  ;;  %v9996_v9 = vld [vmem:[#allocation8 + $0x1ec] sm:$0xf0] }
 0x197   :  { %v8426_v3 = vld [vmem:[#allocation8 + $0xd68] sm:$0xf0]  ;;  %v6961_v23 = vor.u32 %v9996_v9, %v6960_v7  ;;  %v7408_v9 = vld [vmem:[#allocation8 + $0x550] sm:$0xf] }
 0x198   :  { %v10423_v10 = vld [vmem:[#allocation8 + $0xf4c] sm:$0xf]  ;;  %v8429_v17 = vor.u32 %v10359_v2, %v8426_v3  ;;  %3874 = vmatpush.bf16.msrb.mxu1 %v8141_v12  ;;  %v10060_v12 = vld [vmem:[#allocation8 + $0x3ec] sm:$0xf0] }
 0x199   :  { %v8682_v11 = vld [vmem:[#allocation8 + $0xf68] sm:$0xf0] }
 0x19a   :  { %v10215_v13 = vld [vmem:[#allocation8 + $0x8cc] sm:$0xf]  ;;  %v8685_v20 = vor.u32 %v10423_v10, %v8682_v11  ;;  %3886 = vmatpush.bf16.msrb.mxu2 %v8429_v17  ;;  %v7216_v10 = vld [vmem:[#allocation8 + $0x3d0] sm:$0xf]  ;;  %v3633_v17 = vpop.f32.mrf.mxu2 }
 0x19b   :  { %v7850_v15 = vld [vmem:[#allocation8 + $0x8e8] sm:$0xf0] }
 0x19c   :  { %v10279_v18 = vld [vmem:[#allocation8 + $0xacc] sm:$0xf]  ;;  %v7853_v25 = vor.u32 %v10215_v13, %v7850_v15  ;;  %3899 = vmatpush.bf16.msrb.mxu3 %v8685_v20 }
 0x19d   :  { %v8106_v51 = vld [vmem:[#allocation8 + $0xae8] sm:$0xf0] }
 0x19e   :  { %v10351_v21 = vld [vmem:[#allocation8 + $0xd0c] sm:$0xf]  ;;  %v8109_v29 = vor.u32 %v10279_v18, %v8106_v51  ;;  %3862 = vmatpush.bf16.msrb.mxu0 %v7853_v25  ;;  %v3646_v18 = vpop.f32.mrf.mxu3  ;;  %v7217_v25 = vor.u32 %v10060_v12, %v7216_v10  ;;  %v10108_v10 = vld [vmem:[#allocation8 + $0x56c] sm:$0xf0] }
 0x19f   :  { %v8394_v22 = vld [vmem:[#allocation8 + $0xd28] sm:$0xf0]  ;;  %v7664_v12 = vld [vmem:[#allocation8 + $0x750] sm:$0xf] }
 0x1a0   :  { %v10415_v27 = vld [vmem:[#allocation8 + $0xf0c] sm:$0xf]  ;;  %v8397_v34 = vor.u32 %v10351_v21, %v8394_v22  ;;  %3875 = vmatpush.bf16.msrb.mxu1 %v8109_v29  ;;  %v3634_v21 = vadd.f32 %v3633_v17, %v3621_v33  ;;  %v7184_v29 = vld [vmem:[#allocation8 + $0x390] sm:$0xf] }
 0x1a1   :  { %v8650_v28 = vld [vmem:[#allocation8 + $0xf28] sm:$0xf0]  ;;  %v7472_v33 = vld [vmem:[#allocation8 + $0x5d0] sm:$0xf] }
 0x1a2   :  { %v10207_v31 = vld [vmem:[#allocation8 + $0x88c] sm:$0xf]  ;;  %v8653_v40 = vor.u32 %v10415_v27, %v8650_v28  ;;  %3887 = vmatpush.bf16.msrb.mxu2 %v8397_v34  ;;  %v9988_v28 = vld [vmem:[#allocation8 + $0x1ac] sm:$0xf0]  ;;  %v3635_v26 = vpop.f32.mrf.mxu2 }
 0x1a3   :  { %v7818_v32 = vld [vmem:[#allocation8 + $0x8a8] sm:$0xf0]  ;;  %v6832_v17 = vld [vmem:[#allocation8 + $0xd0] sm:$0xf] }
 0x1a4   :  { %v10271_v35 = vld [vmem:[#allocation8 + $0xa8c] sm:$0xf]  ;;  %v7821_v45 = vor.u32 %v10207_v31, %v7818_v32  ;;  %3900 = vmatpush.bf16.msrb.mxu3 %v8653_v40  ;;  %v10052_v31 = vld [vmem:[#allocation8 + $0x3ac] sm:$0xf0]  ;;  %v11177_v32 = vadd.f32 %v3646_v18, %v3634_v21  ;;  %v3659_v21 = vpop.f32.mrf.mxu0 }
 0x1a5   :  { %v8074_v37 = vld [vmem:[#allocation8 + $0xaa8] sm:$0xf0]  ;;  %v9964_v18 = vld [vmem:[#allocation8 + $0xec] sm:$0xf0] }
 0x1a6   :  { %v10343_v42 = vld [vmem:[#allocation8 + $0xccc] sm:$0xf]  ;;  %v8077_v49 = vor.u32 %v10271_v35, %v8074_v37  ;;  %3863 = vmatpush.bf16.msrb.mxu0 %v7821_v45  ;;  %v10188_v45 = vld [vmem:[#allocation8 + $0x7ec] sm:$0xf0] }
 0x1a7   :  { %v8362_v43 = vld [vmem:[#allocation8 + $0xce8] sm:$0xf0] }
 0x1a8   :  { %v10407_v47 = vld [vmem:[#allocation8 + $0xecc] sm:$0xf]  ;;  %v8365_v53 = vor.u32 %v10343_v42, %v8362_v43  ;;  %3876 = vmatpush.bf16.msrb.mxu1 %v8077_v49  ;;  %v10124_v42 = vld [vmem:[#allocation8 + $0x5ec] sm:$0xf0]  ;;  %v6929_v43 = vor.u32 %v9988_v28, %v6928_v24  ;;  %v6833_v28 = vor.u32 %v9964_v18, %v6832_v17 }
 0x1a9   :  { %v8618_v48 = vld [vmem:[#allocation8 + $0xee8] sm:$0xf0]  ;;  %v6896_v49 = vld [vmem:[#allocation8 + $0x150] sm:$0xf] }
 0x1aa   :  { %v10199_v50 = vld [vmem:[#allocation8 + $0x84c] sm:$0xf]  ;;  %v8621_v56 = vor.u32 %v10407_v47, %v8618_v48  ;;  %3888 = vmatpush.bf16.msrb.mxu2 %v8365_v53  ;;  %v7185_v47 = vor.u32 %v10052_v31, %v7184_v29  ;;  %v7473_v53 = vor.u32 %v10124_v42, %v7472_v33  ;;  %v10100_v24 = vld [vmem:[#allocation8 + $0x52c] sm:$0xf0] }
 0x1ab   :  { %v7786_v52 = vld [vmem:[#allocation8 + $0x868] sm:$0xf0]  ;;  %v7632_v29 = vld [vmem:[#allocation8 + $0x710] sm:$0xf] }
 0x1ac   :  { %v10263_v54 = vld [vmem:[#allocation8 + $0xa4c] sm:$0xf]  ;;  %v7789_v60 = vor.u32 %v10199_v50, %v7786_v52  ;;  %3901 = vmatpush.bf16.msrb.mxu3 %v8621_v56  ;;  %v9980_v50 = vld [vmem:[#allocation8 + $0x16c] sm:$0xf0]  ;;  %v3648_v56 = vpop.f32.mrf.mxu3  ;;  %v3661_v26 = vpop.f32.mrf.mxu0 }
 0x1ad   :  { %v8042_v55 = vld [vmem:[#allocation8 + $0xa68] sm:$0xf0]  ;;  %v10164_v31 = vld [vmem:[#allocation8 + $0x72c] sm:$0xf0] }
 0x1ae   :  { %v10335_v57 = vld [vmem:[#allocation8 + $0xc8c] sm:$0xf]  ;;  %v8045_v0 = vor.u32 %v10263_v54, %v8042_v55  ;;  %3864 = vmatpush.bf16.msrb.mxu0 %v7789_v60  ;;  %v7152_v54 = vld [vmem:[#allocation8 + $0x350] sm:$0xf]  ;;  %v6897_v60 = vor.u32 %v9980_v50, %v6896_v49 }
 0x1af   :  { %v8330_v58 = vld [vmem:[#allocation8 + $0xca8] sm:$0xf0]  ;;  %v10044_v55 = vld [vmem:[#allocation8 + $0x36c] sm:$0xf0] }
 0x1b0   :  { %v10399_v61 = vld [vmem:[#allocation8 + $0xe8c] sm:$0xf]  ;;  %v8333_v5 = vor.u32 %v10335_v57, %v8330_v58  ;;  %3877 = vmatpush.bf16.msrb.mxu1 %v8045_v0  ;;  %v7729_v57 = vor.u32 %v10188_v45, %v7728_v44  ;;  %v7440_v58 = vld [vmem:[#allocation8 + $0x590] sm:$0xf] }
 0x1b1   :  { %v8586_v62 = vld [vmem:[#allocation8 + $0xea8] sm:$0xf0]  ;;  %v6864_v0 = vld [vmem:[#allocation8 + $0x110] sm:$0xf] }
 0x1b2   :  { %v10191_v63 = vld [vmem:[#allocation8 + $0x80c] sm:$0xf]  ;;  %v8589_v11 = vor.u32 %v10399_v61, %v8586_v62  ;;  %3889 = vmatpush.bf16.msrb.mxu2 %v8333_v5  ;;  %v7696_v61 = vld [vmem:[#allocation8 + $0x790] sm:$0xf] }
 0x1b3   :  { %v7754_v2 = vld [vmem:[#allocation8 + $0x828] sm:$0xf0]  ;;  %v10180_v62 = vld [vmem:[#allocation8 + $0x7ac] sm:$0xf0] }
 0x1b4   :  { %v10255_v3 = vld [vmem:[#allocation8 + $0xa0c] sm:$0xf]  ;;  %v7757_v51 = vor.u32 %v10191_v63, %v7754_v2  ;;  %3902 = vmatpush.bf16.msrb.mxu3 %v8589_v11  ;;  %v7153_v63 = vor.u32 %v10044_v55, %v7152_v54  ;;  %v9972_v2 = vld [vmem:[#allocation8 + $0x12c] sm:$0xf0]  ;;  %v7697_v7 = vor.u32 %v10180_v62, %v7696_v61 }
 0x1b5   :  { %v8010_v4 = vld [vmem:[#allocation8 + $0xa28] sm:$0xf0]  ;;  %v10036_v5 = vld [vmem:[#allocation8 + $0x32c] sm:$0xf0]  ;;  %v6865_v11 = vor.u32 %v9972_v2, %v6864_v0 }
 0x1b6   :  { %v10327_v13 = vld [vmem:[#allocation8 + $0xc4c] sm:$0xf]  ;;  %v8013_v22 = vor.u32 %v10255_v3, %v8010_v4  ;;  %3865 = vmatpush.bf16.msrb.mxu0 %v7757_v51  ;;  %v7441_v3 = vor.u32 %v10116_v59, %v7440_v58  ;;  %v7120_v4 = vld [vmem:[#allocation8 + $0x310] sm:$0xf]  ;;  %v7409_v51 = vor.u32 %v10108_v10, %v7408_v9 }
 0x1b7   :  { %v8298_v15 = vld [vmem:[#allocation8 + $0xc68] sm:$0xf0]  ;;  %v7056_v33 = vld [vmem:[#allocation8 + $0x290] sm:$0xf] }
 0x1b8   :  { %v10391_v19 = vld [vmem:[#allocation8 + $0xe4c] sm:$0xf]  ;;  %v8301_v27 = vor.u32 %v10327_v13, %v8298_v15  ;;  %3878 = vmatpush.bf16.msrb.mxu1 %v8013_v22  ;;  %v10172_v13 = vld [vmem:[#allocation8 + $0x76c] sm:$0xf0]  ;;  %v7121_v15 = vor.u32 %v10036_v5, %v7120_v4 }
 0x1b9   :  { %v8554_v20 = vld [vmem:[#allocation8 + $0xe68] sm:$0xf0]  ;;  %3866 = vmatmul.bf16.vlgmr.msrb.gmra.mxu0 %v11139_v8  ;;  %v7665_v22 = vor.u32 %v10172_v13, %v7664_v12  ;;  %v10020_v42 = vld [vmem:[#allocation8 + $0x2ac] sm:$0xf0] }
 0x1ba   :  { %v8557_v34 = vor.u32 %v10391_v19, %v8554_v20  ;;  %v10319_v35 = vld [vmem:[#allocation8 + $0xc0c] sm:$0xf]  ;;  %3910 = vmatpush.bf16.msra.mxu0 %v6961_v23  ;;  %3890 = vmatpush.bf16.msrb.mxu2 %v8301_v27  ;;  %v7088_v19 = vld [vmem:[#allocation8 + $0x2d0] sm:$0xf]  ;;  %v3672_v27 = vpop.f32.mrf.mxu1  ;;  %v7057_v49 = vor.u32 %v10020_v42, %v7056_v33 }
 0x1bb   :  { %v8266_v37 = vld [vmem:[#allocation8 + $0xc28] sm:$0xf0]  ;;  %3879 = vmatmul.bf16.vlgmr.msrb.gmra.mxu1 %v11141_v14  ;;  %v10028_v20 = vld [vmem:[#allocation8 + $0x2ec] sm:$0xf0] }
 0x1bc   :  { %v10383_v38 = vld [vmem:[#allocation8 + $0xe0c] sm:$0xf]  ;;  %3923 = vmatpush.bf16.msra.mxu1 %v7217_v25  ;;  %v8269_v48 = vor.u32 %v10319_v35, %v8266_v37  ;;  %3903 = vmatpush.bf16.msrb.mxu3 %v8557_v34  ;;  %v7376_v23 = vld [vmem:[#allocation8 + $0x510] sm:$0xf]  ;;  %v3660_v25 = vadd.f32 %v3659_v21, %v11177_v32  ;;  %v7089_v34 = vor.u32 %v10028_v20, %v7088_v19 }
 0x1bd   :  { %v8522_v40 = vld [vmem:[#allocation8 + $0xe28] sm:$0xf0]  ;;  %v6800_v35 = vld [vmem:[#allocation8 + $0x90] sm:$0xf] }
 0x1be   :  { %v8525_v52 = vor.u32 %v10383_v38, %v8522_v40  ;;  %3911 = vmatpush.bf16.msra.mxu0 %v6929_v43  ;;  %3891 = vmatpush.bf16.msrb.mxu2 %v8269_v48  ;;  %v9956_v37 = vld [vmem:[#allocation8 + $0xac] sm:$0xf0]  ;;  %v3673_v38 = vadd.f32 %v3672_v27, %v3660_v25  ;;  %v7377_v40 = vor.u32 %v10100_v24, %v7376_v23 }
 0x1bf   :  { %v7633_v43 = vor.u32 %v10164_v31, %v7632_v29  ;;  %v7344_v44 = vld [vmem:[#allocation8 + $0x4d0] sm:$0xf]  ;;  %v6801_v32 = vor.u32 %v9956_v37, %v6800_v35 }
 0x1c0   :  { %3924 = vmatpush.bf16.msra.mxu1 %v7185_v47  ;;  %3904 = vmatpush.bf16.msrb.mxu3 %v8525_v52  ;;  %v10092_v45 = vld [vmem:[#allocation8 + $0x4ec] sm:$0xf0] }
 0x1c1   :  { %3892 = vmatmul.bf16.vlgmr.msrb.gmra.mxu2 %v11145_v41  ;;  %v7600_v47 = vld [vmem:[#allocation8 + $0x6d0] sm:$0xf] }
 0x1c2   :  { %3936 = vmatpush.bf16.msra.mxu2 %v7473_v53  ;;  %3912 = vmatpush.bf16.msra.mxu0 %v6897_v60  ;;  %v10156_v48 = vld [vmem:[#allocation8 + $0x6ec] sm:$0xf0]  ;;  %v7345_v53 = vor.u32 %v10092_v45, %v7344_v44  ;;  %v3674_v59 = vpop.f32.mrf.mxu1 }
 0x1c3   :  { %3905 = vmatmul.bf16.vlgmr.msrb.gmra.mxu3 %v11147_v46  ;;  %v6768_v50 = vld [vmem:[#allocation8 + $0x50] sm:$0xf]  ;;  %v7601_v56 = vor.u32 %v10156_v48, %v7600_v47 }
 0x1c4   :  { %3949 = vmatpush.bf16.msra.mxu3 %v7729_v57  ;;  %3925 = vmatpush.bf16.msra.mxu1 %v7153_v63  ;;  %v9948_v52 = vld [vmem:[#allocation8 + $0x6c] sm:$0xf0] }
 0x1c5   :  { %v7024_v54 = vld [vmem:[#allocation8 + $0x250] sm:$0xf]  ;;  %v6769_v60 = vor.u32 %v9948_v52, %v6768_v50 }
 0x1c6   :  { %3937 = vmatpush.bf16.msra.mxu2 %v7441_v3  ;;  %3913 = vmatpush.bf16.msra.mxu0 %v6865_v11  ;;  %v10012_v55 = vld [vmem:[#allocation8 + $0x26c] sm:$0xf0]  ;;  %v3685_v11 = vpop.f32.mrf.mxu2 }
 0x1c7   :  { %v7312_v57 = vld [vmem:[#allocation8 + $0x490] sm:$0xf]  ;;  %v7025_v0 = vor.u32 %v10012_v55, %v7024_v54  ;;  %v3686_v18 = vadd.f32 %v3685_v11, %v3673_v38  ;;  %v920_v11 = vperm.slane %v11163_v39, 2 }
 0x1c8   :  { %3950 = vmatpush.bf16.msra.mxu3 %v7697_v7  ;;  %3926 = vmatpush.bf16.msra.mxu1 %v7121_v15  ;;  %v10084_v58 = vld [vmem:[#allocation8 + $0x4ac] sm:$0xf0] }
 0x1c9   :  { %v7568_v61 = vld [vmem:[#allocation8 + $0x690] sm:$0xf]  ;;  %v7313_v5 = vor.u32 %v10084_v58, %v7312_v57 }
 0x1ca   :  { %3938 = vmatpush.bf16.msra.mxu2 %v7409_v51  ;;  %3914 = vmatpush.bf16.msra.mxu0 %v6833_v28  ;;  %v10148_v62 = vld [vmem:[#allocation8 + $0x6ac] sm:$0xf0]  ;;  %v3698_v51 = vpop.f32.mrf.mxu3  ;;  %v3724_v39 = vpop.f32.mrf.mxu1 }
 0x1cb   :  { %v6736_v63 = vld [vmem:[#allocation8 + $0x10] sm:$0xf]  ;;  %v7569_v12 = vor.u32 %v10148_v62, %v7568_v61  ;;  %v11184_v25 = vadd.f32 %v3698_v51, %v3686_v18 }
 0x1cc   :  { %3951 = vmatpush.bf16.msra.mxu3 %v7665_v22  ;;  %3927 = vmatpush.bf16.msra.mxu1 %v7089_v34  ;;  %v9940_v2 = vld [vmem:[#allocation8 + $0x2c] sm:$0xf0] }
 0x1cd   :  { %v6992_v3 = vld [vmem:[#allocation8 + $0x210] sm:$0xf]  ;;  %v6737_v19 = vor.u32 %v9940_v2, %v6736_v63 }
 0x1ce   :  { %3939 = vmatpush.bf16.msra.mxu2 %v7377_v40  ;;  %3915 = vmatpush.bf16.msra.mxu0 %v6801_v32  ;;  %v10004_v4 = vld [vmem:[#allocation8 + $0x22c] sm:$0xf0]  ;;  %v3687_v52 = vpop.f32.mrf.mxu2 }
 0x1cf   :  { %v7984_v7 = vld [vmem:[#allocation8 + $0x9d0] sm:$0xf]  ;;  %v6993_v22 = vor.u32 %v10004_v4, %v6992_v3 }
 0x1d0   :  { %3952 = vmatpush.bf16.msra.mxu3 %v7633_v43  ;;  %3928 = vmatpush.bf16.msra.mxu1 %v7057_v49  ;;  %v10252_v9 = vld [vmem:[#allocation8 + $0x9ec] sm:$0xf0] }
 0x1d1   :  { %v8240_v10 = vld [vmem:[#allocation8 + $0xbd0] sm:$0xf]  ;;  %v7985_v23 = vor.u32 %v10252_v9, %v7984_v7 }
 0x1d2   :  { %3940 = vmatpush.bf16.msra.mxu2 %v7345_v53  ;;  %v10316_v13 = vld [vmem:[#allocation8 + $0xbec] sm:$0xf0]  ;;  %3916 = vmatpush.bf16.msra.mxu0 %v6769_v60 }
 0x1d3   :  { %v7280_v15 = vld [vmem:[#allocation8 + $0x450] sm:$0xf]  ;;  %v8241_v27 = vor.u32 %v10316_v13, %v8240_v10 }
 0x1d4   :  { %3953 = vmatpush.bf16.msra.mxu3 %v7601_v56  ;;  %v10076_v17 = vld [vmem:[#allocation8 + $0x46c] sm:$0xf0]  ;;  %3929 = vmatpush.bf16.msra.mxu1 %v7025_v0  ;;  %v3700_v56 = vpop.f32.mrf.mxu3 }
 0x1d5   :  { %v7536_v20 = vld [vmem:[#allocation8 + $0x650] sm:$0xf]  ;;  %v7281_v28 = vor.u32 %v10076_v17, %v7280_v15 }
 0x1d6   :  { %v10140_v21 = vld [vmem:[#allocation8 + $0x66c] sm:$0xf0]  ;;  %3941 = vmatpush.bf16.msra.mxu2 %v7313_v5  ;;  %3917 = vmatpush.bf16.msra.mxu0 %v6737_v19 }
 0x1d7   :  { %v7952_v24 = vld [vmem:[#allocation8 + $0x990] sm:$0xf]  ;;  %v7537_v35 = vor.u32 %v10140_v21, %v7536_v20 }
 0x1d8   :  { %v10244_v29 = vld [vmem:[#allocation8 + $0x9ac] sm:$0xf0]  ;;  %3954 = vmatpush.bf16.msra.mxu3 %v7569_v12  ;;  %3930 = vmatpush.bf16.msra.mxu1 %v6993_v22  ;;  %v3711_v22 = vpop.f32.mrf.mxu0 }
 0x1d9   :  { %v8208_v31 = vld [vmem:[#allocation8 + $0xb90] sm:$0xf]  ;;  %v7953_v44 = vor.u32 %v10244_v29, %v7952_v24  ;;  %3918 = vmatmul.bf16.vlgmr.msra.gmra.mxu0 %v11122_v1 }
 0x1da   :  { %v10308_v34 = vld [vmem:[#allocation8 + $0xbac] sm:$0xf0]  ;;  %3962 = vmatpush.bf16.msrb.mxu0 %v7985_v23  ;;  %3942 = vmatpush.bf16.msra.mxu2 %v7281_v28  ;;  %v3712_v28 = vadd.f32 %v3711_v22, %v920_v11  ;;  %v10056_v11 = vld [vmem:[#allocation8 + $0x3d4] sm:$0xf] }
 0x1db   :  { %v7248_v37 = vld [vmem:[#allocation8 + $0x410] sm:$0xf]  ;;  %v8209_v47 = vor.u32 %v10308_v34, %v8208_v31  ;;  %3931 = vmatmul.bf16.vlgmr.msra.gmra.mxu1 %v11125_v6 }
 0x1dc   :  { %v10068_v38 = vld [vmem:[#allocation8 + $0x42c] sm:$0xf0]  ;;  %3975 = vmatpush.bf16.msrb.mxu1 %v8241_v27  ;;  %3955 = vmatpush.bf16.msra.mxu3 %v7537_v35 }
 0x1dd   :  { %v7504_v40 = vld [vmem:[#allocation8 + $0x610] sm:$0xf]  ;;  %v7249_v48 = vor.u32 %v10068_v38, %v7248_v37 }
 0x1de   :  { %v10132_v33 = vld [vmem:[#allocation8 + $0x62c] sm:$0xf0]  ;;  %3963 = vmatpush.bf16.msrb.mxu0 %v7953_v44 }
 0x1df   :  { %v8496_v42 = vld [vmem:[#allocation8 + $0xdd0] sm:$0xf]  ;;  %v7505_v53 = vor.u32 %v10132_v33, %v7504_v40  ;;  %3943 = vmatpush.bf16.msra.mxu2 %v7249_v48  ;;  %v3725_v40 = vadd.f32 %v3724_v39, %v3712_v28 }
 0x1e0   :  { %v10380_v43 = vld [vmem:[#allocation8 + $0xdec] sm:$0xf0]  ;;  %3976 = vmatpush.bf16.msrb.mxu1 %v8209_v47  ;;  %v3713_v56 = vpop.f32.mrf.mxu0 }
 0x1e1   :  { %v8752_v45 = vld [vmem:[#allocation8 + $0xfd0] sm:$0xf]  ;;  %v8497_v54 = vor.u32 %v10380_v43, %v8496_v42  ;;  %3956 = vmatpush.bf16.msra.mxu3 %v7505_v53  ;;  %v7154_v56 = vld [vmem:[#allocation8 + $0x370] sm:$0xf0] }
 0x1e2   :  { %v10444_v32 = vld [vmem:[#allocation8 + $0xfec] sm:$0xf0]  ;;  %3944 = vmatmul.bf16.vlgmr.msra.gmra.mxu2 %v11130_v30 }
 0x1e3   :  { %v7920_v49 = vld [vmem:[#allocation8 + $0x950] sm:$0xf]  ;;  %v8753_v57 = vor.u32 %v10444_v32, %v8752_v45  ;;  %3988 = vmatpush.bf16.msrb.mxu2 %v8497_v54 }
 0x1e4   :  { %v10236_v50 = vld [vmem:[#allocation8 + $0x96c] sm:$0xf0]  ;;  %3957 = vmatmul.bf16.vlgmr.msra.gmra.mxu3 %v11132_v36 }
 0x1e5   :  { %v8176_v55 = vld [vmem:[#allocation8 + $0xb50] sm:$0xf]  ;;  %v7921_v60 = vor.u32 %v10236_v50, %v7920_v49  ;;  %4001 = vmatpush.bf16.msrb.mxu3 %v8753_v57 }
 0x1e6   :  { %v10300_v26 = vld [vmem:[#allocation8 + $0xb6c] sm:$0xf0] }
 0x1e7   :  { %v8464_v58 = vld [vmem:[#allocation8 + $0xd90] sm:$0xf]  ;;  %v8177_v63 = vor.u32 %v10300_v26, %v8176_v55  ;;  %3964 = vmatpush.bf16.msrb.mxu0 %v7921_v60  ;;  %v3726_v60 = vpop.f32.mrf.mxu1 }
 0x1e8   :  { %v10372_v59 = vld [vmem:[#allocation8 + $0xdac] sm:$0xf0]  ;;  %v7442_v60 = vld [vmem:[#allocation8 + $0x5b0] sm:$0xf0] }
 0x1e9   :  { %v8720_v61 = vld [vmem:[#allocation8 + $0xf90] sm:$0xf]  ;;  %v8465_v3 = vor.u32 %v10372_v59, %v8464_v58  ;;  %3977 = vmatpush.bf16.msrb.mxu1 %v8177_v63 }
 0x1ea   :  { %v10436_v62 = vld [vmem:[#allocation8 + $0xfac] sm:$0xf0] }
 0x1eb   :  { %v7888_v0 = vld [vmem:[#allocation8 + $0x910] sm:$0xf]  ;;  %v8721_v7 = vor.u32 %v10436_v62, %v8720_v61  ;;  %3989 = vmatpush.bf16.msrb.mxu2 %v8465_v3 }
 0x1ec   :  { %v10228_v2 = vld [vmem:[#allocation8 + $0x92c] sm:$0xf0] }
 0x1ed   :  { %v8144_v4 = vld [vmem:[#allocation8 + $0xb10] sm:$0xf]  ;;  %v7889_v12 = vor.u32 %v10228_v2, %v7888_v0  ;;  %4002 = vmatpush.bf16.msrb.mxu3 %v8721_v7 }
 0x1ee   :  { %v10292_v5 = vld [vmem:[#allocation8 + $0xb2c] sm:$0xf0] }
 0x1ef   :  { %v8432_v9 = vld [vmem:[#allocation8 + $0xd50] sm:$0xf]  ;;  %v8145_v17 = vor.u32 %v10292_v5, %v8144_v4  ;;  %3965 = vmatpush.bf16.msrb.mxu0 %v7889_v12  ;;  %v3737_v12 = vpop.f32.mrf.mxu2 }
 0x1f0   :  { %v10364_v10 = vld [vmem:[#allocation8 + $0xd6c] sm:$0xf0] }
 0x1f1   :  { %v8688_v13 = vld [vmem:[#allocation8 + $0xf50] sm:$0xf]  ;;  %v8433_v19 = vor.u32 %v10364_v10, %v8432_v9  ;;  %3978 = vmatpush.bf16.msrb.mxu1 %v8145_v17  ;;  %v9992_v9 = vld [vmem:[#allocation8 + $0x1d4] sm:$0xf] }
 0x1f2   :  { %v10428_v15 = vld [vmem:[#allocation8 + $0xf6c] sm:$0xf0]  ;;  %v6962_v10 = vld [vmem:[#allocation8 + $0x1f0] sm:$0xf0] }
 0x1f3   :  { %v7856_v18 = vld [vmem:[#allocation8 + $0x8d0] sm:$0xf]  ;;  %v8689_v23 = vor.u32 %v10428_v15, %v8688_v13  ;;  %3990 = vmatpush.bf16.msrb.mxu2 %v8433_v19  ;;  %v7218_v15 = vld [vmem:[#allocation8 + $0x3f0] sm:$0xf0]  ;;  %v3750_v19 = vpop.f32.mrf.mxu3 }
 0x1f4   :  { %v10220_v51 = vld [vmem:[#allocation8 + $0x8ec] sm:$0xf0]  ;;  %v7221_v39 = vor.u32 %v10056_v11, %v7218_v15  ;;  %v7410_v11 = vld [vmem:[#allocation8 + $0x570] sm:$0xf0] }
 0x1f5   :  { %v8112_v20 = vld [vmem:[#allocation8 + $0xad0] sm:$0xf]  ;;  %v7857_v29 = vor.u32 %v10220_v51, %v7856_v18  ;;  %4003 = vmatpush.bf16.msrb.mxu3 %v8689_v23  ;;  %v3738_v51 = vadd.f32 %v3737_v12, %v3725_v40  ;;  %v7666_v15 = vld [vmem:[#allocation8 + $0x770] sm:$0xf0] }
 0x1f6   :  { %v10284_v21 = vld [vmem:[#allocation8 + $0xaec] sm:$0xf0] }
 0x1f7   :  { %v8400_v24 = vld [vmem:[#allocation8 + $0xd10] sm:$0xf]  ;;  %v8113_v35 = vor.u32 %v10284_v21, %v8112_v20  ;;  %3966 = vmatpush.bf16.msrb.mxu0 %v7857_v29  ;;  %v11191_v28 = vadd.f32 %v3750_v19, %v3738_v51  ;;  %v6834_v51 = vld [vmem:[#allocation8 + $0xf0] sm:$0xf0] }
 0x1f8   :  { %v10356_v27 = vld [vmem:[#allocation8 + $0xd2c] sm:$0xf0] }
 0x1f9   :  { %v8656_v31 = vld [vmem:[#allocation8 + $0xf10] sm:$0xf]  ;;  %v8401_v33 = vor.u32 %v10356_v27, %v8400_v24  ;;  %3979 = vmatpush.bf16.msrb.mxu1 %v8113_v35  ;;  %v6965_v24 = vor.u32 %v9992_v9, %v6962_v10  ;;  %v9984_v27 = vld [vmem:[#allocation8 + $0x194] sm:$0xf] }
 0x1fa   :  { %v10420_v34 = vld [vmem:[#allocation8 + $0xf2c] sm:$0xf0]  ;;  %v7186_v35 = vld [vmem:[#allocation8 + $0x3b0] sm:$0xf0] }
 0x1fb   :  { %v7824_v37 = vld [vmem:[#allocation8 + $0x890] sm:$0xf]  ;;  %v8657_v44 = vor.u32 %v10420_v34, %v8656_v31  ;;  %3991 = vmatpush.bf16.msrb.mxu2 %v8401_v33  ;;  %v6930_v31 = vld [vmem:[#allocation8 + $0x1b0] sm:$0xf0] }
 0x1fc   :  { %v10212_v38 = vld [vmem:[#allocation8 + $0x8ac] sm:$0xf0]  ;;  %v10048_v34 = vld [vmem:[#allocation8 + $0x394] sm:$0xf] }
 0x1fd   :  { %v8080_v42 = vld [vmem:[#allocation8 + $0xa90] sm:$0xf]  ;;  %v7825_v47 = vor.u32 %v10212_v38, %v7824_v37  ;;  %4004 = vmatpush.bf16.msrb.mxu3 %v8657_v44  ;;  %v7474_v44 = vld [vmem:[#allocation8 + $0x5f0] sm:$0xf0] }
 0x1fe   :  { %v10276_v43 = vld [vmem:[#allocation8 + $0xaac] sm:$0xf0]  ;;  %v10104_v10 = vld [vmem:[#allocation8 + $0x554] sm:$0xf] }
 0x1ff   :  { %v8368_v45 = vld [vmem:[#allocation8 + $0xcd0] sm:$0xf]  ;;  %v8081_v50 = vor.u32 %v10276_v43, %v8080_v42  ;;  %3967 = vmatpush.bf16.msrb.mxu0 %v7825_v47  ;;  %v10120_v43 = vld [vmem:[#allocation8 + $0x5d4] sm:$0xf]  ;;  %v7413_v19 = vor.u32 %v10104_v10, %v7410_v11 }
 0x200   :  { %v10348_v32 = vld [vmem:[#allocation8 + $0xcec] sm:$0xf0]  ;;  %v7730_v47 = vld [vmem:[#allocation8 + $0x7f0] sm:$0xf0] }
 0x201   :  { %v8624_v48 = vld [vmem:[#allocation8 + $0xed0] sm:$0xf]  ;;  %v8369_v54 = vor.u32 %v10348_v32, %v8368_v45  ;;  %3980 = vmatpush.bf16.msrb.mxu1 %v8081_v50  ;;  %v6933_v45 = vor.u32 %v9984_v27, %v6930_v31  ;;  %v10184_v32 = vld [vmem:[#allocation8 + $0x7d4] sm:$0xf] }
 0x202   :  { %v10412_v49 = vld [vmem:[#allocation8 + $0xeec] sm:$0xf0]  ;;  %v9976_v50 = vld [vmem:[#allocation8 + $0x154] sm:$0xf] }
 0x203   :  { %v7792_v52 = vld [vmem:[#allocation8 + $0x850] sm:$0xf]  ;;  %v8625_v57 = vor.u32 %v10412_v49, %v8624_v48  ;;  %3992 = vmatpush.bf16.msrb.mxu2 %v8369_v54  ;;  %v7189_v48 = vor.u32 %v10048_v34, %v7186_v35  ;;  %v7378_v27 = vld [vmem:[#allocation8 + $0x530] sm:$0xf0] }
 0x204   :  { %v10204_v53 = vld [vmem:[#allocation8 + $0x86c] sm:$0xf0]  ;;  %v10160_v34 = vld [vmem:[#allocation8 + $0x714] sm:$0xf] }
 0x205   :  { %v8048_v55 = vld [vmem:[#allocation8 + $0xa50] sm:$0xf]  ;;  %v7793_v61 = vor.u32 %v10204_v53, %v7792_v52  ;;  %4005 = vmatpush.bf16.msrb.mxu3 %v8625_v57  ;;  %v6898_v52 = vld [vmem:[#allocation8 + $0x170] sm:$0xf0]  ;;  %v3739_v53 = vpop.f32.mrf.mxu2  ;;  %v3752_v57 = vpop.f32.mrf.mxu3 }
 0x206   :  { %v10268_v26 = vld [vmem:[#allocation8 + $0xa6c] sm:$0xf0]  ;;  %v7634_v35 = vld [vmem:[#allocation8 + $0x730] sm:$0xf0] }
 0x207   :  { %v8336_v58 = vld [vmem:[#allocation8 + $0xc90] sm:$0xf]  ;;  %v8049_v2 = vor.u32 %v10268_v26, %v8048_v55  ;;  %3968 = vmatpush.bf16.msrb.mxu0 %v7793_v61  ;;  %v7477_v55 = vor.u32 %v10120_v43, %v7474_v44  ;;  %v10040_v26 = vld [vmem:[#allocation8 + $0x354] sm:$0xf]  ;;  %v6901_v61 = vor.u32 %v9976_v50, %v6898_v52 }
 0x208   :  { %v10340_v59 = vld [vmem:[#allocation8 + $0xcac] sm:$0xf0]  ;;  %v10016_v43 = vld [vmem:[#allocation8 + $0x294] sm:$0xf] }
 0x209   :  { %v8592_v62 = vld [vmem:[#allocation8 + $0xe90] sm:$0xf]  ;;  %v8337_v7 = vor.u32 %v10340_v59, %v8336_v58  ;;  %3981 = vmatpush.bf16.msrb.mxu1 %v8049_v2  ;;  %v7733_v58 = vor.u32 %v10184_v32, %v7730_v47  ;;  %v10112_v59 = vld [vmem:[#allocation8 + $0x594] sm:$0xf] }
 0x20a   :  { %v10404_v63 = vld [vmem:[#allocation8 + $0xeac] sm:$0xf0]  ;;  %v9968_v2 = vld [vmem:[#allocation8 + $0x114] sm:$0xf] }
 0x20b   :  { %v7760_v0 = vld [vmem:[#allocation8 + $0x810] sm:$0xf]  ;;  %v8593_v13 = vor.u32 %v10404_v63, %v8592_v62  ;;  %3993 = vmatpush.bf16.msrb.mxu2 %v8337_v7  ;;  %v10176_v62 = vld [vmem:[#allocation8 + $0x794] sm:$0xf] }
 0x20c   :  { %v10196_v3 = vld [vmem:[#allocation8 + $0x82c] sm:$0xf0]  ;;  %v7698_v63 = vld [vmem:[#allocation8 + $0x7b0] sm:$0xf0] }
 0x20d   :  { %v8016_v4 = vld [vmem:[#allocation8 + $0xa10] sm:$0xf]  ;;  %v7761_v20 = vor.u32 %v10196_v3, %v7760_v0  ;;  %4006 = vmatpush.bf16.msrb.mxu3 %v8593_v13  ;;  %v7157_v0 = vor.u32 %v10040_v26, %v7154_v56  ;;  %v6866_v3 = vld [vmem:[#allocation8 + $0x130] sm:$0xf0]  ;;  %v7701_v9 = vor.u32 %v10176_v62, %v7698_v63 }
 0x20e   :  { %v10260_v5 = vld [vmem:[#allocation8 + $0xa2c] sm:$0xf0]  ;;  %v7122_v7 = vld [vmem:[#allocation8 + $0x330] sm:$0xf0]  ;;  %v6869_v12 = vor.u32 %v9968_v2, %v6866_v3 }
 0x20f   :  { %v8304_v17 = vld [vmem:[#allocation8 + $0xc50] sm:$0xf]  ;;  %v8017_v23 = vor.u32 %v10260_v5, %v8016_v4  ;;  %3969 = vmatpush.bf16.msrb.mxu0 %v7761_v20  ;;  %v7445_v4 = vor.u32 %v10112_v59, %v7442_v60  ;;  %v10032_v5 = vld [vmem:[#allocation8 + $0x314] sm:$0xf] }
 0x210   :  { %v10332_v18 = vld [vmem:[#allocation8 + $0xc6c] sm:$0xf0]  ;;  %v10168_v13 = vld [vmem:[#allocation8 + $0x754] sm:$0xf] }
 0x211   :  { %v8560_v21 = vld [vmem:[#allocation8 + $0xe50] sm:$0xf]  ;;  %v8305_v29 = vor.u32 %v10332_v18, %v8304_v17  ;;  %3982 = vmatpush.bf16.msrb.mxu1 %v8017_v23  ;;  %v7125_v17 = vor.u32 %v10032_v5, %v7122_v7  ;;  %v9960_v18 = vld [vmem:[#allocation8 + $0xd4] sm:$0xf]  ;;  %v7669_v23 = vor.u32 %v10168_v13, %v7666_v15 }
 0x212   :  { %v10396_v22 = vld [vmem:[#allocation8 + $0xe6c] sm:$0xf0]  ;;  %3970 = vmatmul.bf16.vlgmr.msrb.gmra.mxu0 %v11139_v8  ;;  %v10024_v20 = vld [vmem:[#allocation8 + $0x2d4] sm:$0xf]  ;;  %v6837_v31 = vor.u32 %v9960_v18, %v6834_v51 }
 0x213   :  { %v8561_v37 = vor.u32 %v10396_v22, %v8560_v21  ;;  %v8272_v38 = vld [vmem:[#allocation8 + $0xc10] sm:$0xf]  ;;  %4014 = vmatpush.bf16.msra.mxu0 %v6965_v24  ;;  %3994 = vmatpush.bf16.msrb.mxu2 %v8305_v29  ;;  %v7090_v21 = vld [vmem:[#allocation8 + $0x2f0] sm:$0xf0]  ;;  %v3763_v22 = vpop.f32.mrf.mxu0  ;;  %v3776_v29 = vpop.f32.mrf.mxu1 }
 0x214   :  { %v10324_v40 = vld [vmem:[#allocation8 + $0xc2c] sm:$0xf0]  ;;  %3983 = vmatmul.bf16.vlgmr.msrb.gmra.mxu1 %v11141_v14  ;;  %v10096_v24 = vld [vmem:[#allocation8 + $0x514] sm:$0xf] }
 0x215   :  { %v8528_v33 = vld [vmem:[#allocation8 + $0xe10] sm:$0xf]  ;;  %4027 = vmatpush.bf16.msra.mxu1 %v7221_v39  ;;  %v8273_v49 = vor.u32 %v10324_v40, %v8272_v38  ;;  %4007 = vmatpush.bf16.msrb.mxu3 %v8561_v37  ;;  %v3764_v39 = vadd.f32 %v3763_v22, %v11191_v28  ;;  %v7093_v37 = vor.u32 %v10024_v20, %v7090_v21  ;;  %v9952_v38 = vld [vmem:[#allocation8 + $0x94] sm:$0xf] }
 0x216   :  { %v10388_v42 = vld [vmem:[#allocation8 + $0xe2c] sm:$0xf0]  ;;  %v6802_v40 = vld [vmem:[#allocation8 + $0xb0] sm:$0xf0] }
 0x217   :  { %v8529_v54 = vor.u32 %v10388_v42, %v8528_v33  ;;  %4015 = vmatpush.bf16.msra.mxu0 %v6933_v45  ;;  %3995 = vmatpush.bf16.msrb.mxu2 %v8273_v49  ;;  %v3777_v33 = vadd.f32 %v3776_v29, %v3764_v39  ;;  %v7381_v42 = vor.u32 %v10096_v24, %v7378_v27  ;;  %v7058_v44 = vld [vmem:[#allocation8 + $0x2b0] sm:$0xf0] }
 0x218   :  { %v7637_v45 = vor.u32 %v10160_v34, %v7634_v35  ;;  %v10088_v32 = vld [vmem:[#allocation8 + $0x4d4] sm:$0xf]  ;;  %v6805_v28 = vor.u32 %v9952_v38, %v6802_v40  ;;  %v7061_v50 = vor.u32 %v10016_v43, %v7058_v44 }
 0x219   :  { %4028 = vmatpush.bf16.msra.mxu1 %v7189_v48  ;;  %4008 = vmatpush.bf16.msrb.mxu3 %v8529_v54  ;;  %v7346_v47 = vld [vmem:[#allocation8 + $0x4f0] sm:$0xf0] }
 0x21a   :  { %3996 = vmatmul.bf16.vlgmr.msrb.gmra.mxu2 %v11145_v41  ;;  %v10152_v48 = vld [vmem:[#allocation8 + $0x6d4] sm:$0xf]  ;;  %v7349_v54 = vor.u32 %v10088_v32, %v7346_v47 }
 0x21b   :  { %4040 = vmatpush.bf16.msra.mxu2 %v7477_v55  ;;  %4016 = vmatpush.bf16.msra.mxu0 %v6901_v61  ;;  %v7602_v49 = vld [vmem:[#allocation8 + $0x6f0] sm:$0xf0]  ;;  %v3765_v56 = vpop.f32.mrf.mxu0  ;;  %v3778_v60 = vpop.f32.mrf.mxu1 }
 0x21c   :  { %4009 = vmatmul.bf16.vlgmr.msrb.gmra.mxu3 %v11147_v46  ;;  %v9944_v52 = vld [vmem:[#allocation8 + $0x54] sm:$0xf]  ;;  %v7605_v57 = vor.u32 %v10152_v48, %v7602_v49 }
 0x21d   :  { %4053 = vmatpush.bf16.msra.mxu3 %v7733_v58  ;;  %4029 = vmatpush.bf16.msra.mxu1 %v7157_v0  ;;  %v6770_v53 = vld [vmem:[#allocation8 + $0x70] sm:$0xf0] }
 0x21e   :  { %v10008_v55 = vld [vmem:[#allocation8 + $0x254] sm:$0xf]  ;;  %v6773_v61 = vor.u32 %v9944_v52, %v6770_v53 }
 0x21f   :  { %4041 = vmatpush.bf16.msra.mxu2 %v7445_v4  ;;  %4017 = vmatpush.bf16.msra.mxu0 %v6869_v12  ;;  %v7026_v26 = vld [vmem:[#allocation8 + $0x270] sm:$0xf0]  ;;  %v3789_v12 = vpop.f32.mrf.mxu2 }
 0x220   :  { %v10080_v58 = vld [vmem:[#allocation8 + $0x494] sm:$0xf]  ;;  %v7029_v2 = vor.u32 %v10008_v55, %v7026_v26  ;;  %v3790_v51 = vadd.f32 %v3789_v12, %v3777_v33  ;;  %v11203_v12 = vld [vmem:[#allocation10] sm:$0xff] }
 0x221   :  { %4054 = vmatpush.bf16.msra.mxu3 %v7701_v9  ;;  %4030 = vmatpush.bf16.msra.mxu1 %v7125_v17  ;;  %v7314_v59 = vld [vmem:[#allocation8 + $0x4b0] sm:$0xf0] }
 0x222   :  { %v10144_v62 = vld [vmem:[#allocation8 + $0x694] sm:$0xf]  ;;  %v7317_v7 = vor.u32 %v10080_v58, %v7314_v59 }
 0x223   :  { %4042 = vmatpush.bf16.msra.mxu2 %v7413_v19  ;;  %4018 = vmatpush.bf16.msra.mxu0 %v6837_v31  ;;  %v7570_v63 = vld [vmem:[#allocation8 + $0x6b0] sm:$0xf0]  ;;  %v3802_v19 = vpop.f32.mrf.mxu3 }
 0x224   :  { %v9936_v0 = vld [vmem:[#allocation8 + $0x14] sm:$0xf]  ;;  %v7573_v13 = vor.u32 %v10144_v62, %v7570_v63  ;;  %v11198_v39 = vadd.f32 %v3802_v19, %v3790_v51 }
 0x225   :  { %4055 = vmatpush.bf16.msra.mxu3 %v7669_v23  ;;  %4031 = vmatpush.bf16.msra.mxu1 %v7093_v37  ;;  %v6738_v3 = vld [vmem:[#allocation8 + $0x30] sm:$0xf0] }
 0x226   :  { %v10000_v4 = vld [vmem:[#allocation8 + $0x214] sm:$0xf]  ;;  %v6741_v20 = vor.u32 %v9936_v0, %v6738_v3 }
 0x227   :  { %4043 = vmatpush.bf16.msra.mxu2 %v7381_v42  ;;  %4019 = vmatpush.bf16.msra.mxu0 %v6805_v28  ;;  %v6994_v5 = vld [vmem:[#allocation8 + $0x230] sm:$0xf0]  ;;  %v3791_v53 = vpop.f32.mrf.mxu2 }
 0x228   :  { %v10248_v9 = vld [vmem:[#allocation8 + $0x9d4] sm:$0xf]  ;;  %v6997_v23 = vor.u32 %v10000_v4, %v6994_v5 }
 0x229   :  { %4056 = vmatpush.bf16.msra.mxu3 %v7637_v45  ;;  %4032 = vmatpush.bf16.msra.mxu1 %v7061_v50  ;;  %v7986_v10 = vld [vmem:[#allocation8 + $0x9f0] sm:$0xf0] }
 0x22a   :  { %v10312_v11 = vld [vmem:[#allocation8 + $0xbd4] sm:$0xf]  ;;  %v7989_v24 = vor.u32 %v10248_v9, %v7986_v10 }
 0x22b   :  { %4044 = vmatpush.bf16.msra.mxu2 %v7349_v54  ;;  %v8242_v15 = vld [vmem:[#allocation8 + $0xbf0] sm:$0xf0]  ;;  %4020 = vmatpush.bf16.msra.mxu0 %v6773_v61 }
 0x22c   :  { %v10072_v17 = vld [vmem:[#allocation8 + $0x454] sm:$0xf]  ;;  %v8245_v29 = vor.u32 %v10312_v11, %v8242_v15 }
 0x22d   :  { %4057 = vmatpush.bf16.msra.mxu3 %v7605_v57  ;;  %v7282_v18 = vld [vmem:[#allocation8 + $0x470] sm:$0xf0]  ;;  %4033 = vmatpush.bf16.msra.mxu1 %v7029_v2  ;;  %v3804_v57 = vpop.f32.mrf.mxu3 }
 0x22e   :  { %v10136_v21 = vld [vmem:[#allocation8 + $0x654] sm:$0xf]  ;;  %v7285_v31 = vor.u32 %v10072_v17, %v7282_v18 }
 0x22f   :  { %v7538_v22 = vld [vmem:[#allocation8 + $0x670] sm:$0xf0]  ;;  %4045 = vmatpush.bf16.msra.mxu2 %v7317_v7  ;;  %4021 = vmatpush.bf16.msra.mxu0 %v6741_v20 }
 0x230   :  { %v10240_v27 = vld [vmem:[#allocation8 + $0x994] sm:$0xf]  ;;  %v7541_v38 = vor.u32 %v10136_v21, %v7538_v22 }
 0x231   :  { %v7954_v34 = vld [vmem:[#allocation8 + $0x9b0] sm:$0xf0]  ;;  %4058 = vmatpush.bf16.msra.mxu3 %v7573_v13  ;;  %4034 = vmatpush.bf16.msra.mxu1 %v6997_v23  ;;  %v921_v13 = vperm.slane %v11203_v12, 3 }
 0x232   :  { %v10304_v35 = vld [vmem:[#allocation8 + $0xb94] sm:$0xf]  ;;  %v7957_v32 = vor.u32 %v10240_v27, %v7954_v34  ;;  %4022 = vmatmul.bf16.vlgmr.msra.gmra.mxu0 %v11122_v1 }
 0x233   :  { %v8210_v37 = vld [vmem:[#allocation8 + $0xbb0] sm:$0xf0]  ;;  %4066 = vmatpush.bf16.msrb.mxu0 %v7989_v24  ;;  %4046 = vmatpush.bf16.msra.mxu2 %v7285_v31  ;;  %v3815_v24 = vpop.f32.mrf.mxu0 }
 0x234   :  { %v10064_v40 = vld [vmem:[#allocation8 + $0x414] sm:$0xf]  ;;  %v8213_v48 = vor.u32 %v10304_v35, %v8210_v37  ;;  %4035 = vmatmul.bf16.vlgmr.msra.gmra.mxu1 %v11125_v6  ;;  %v3816_v34 = vadd.f32 %v3815_v24, %v921_v13  ;;  %v3828_v35 = vpop.f32.mrf.mxu1  ;;  %v6968_v13 = vld [vmem:[#allocation8 + $0x1d8] sm:$0xf] }
 0x235   :  { %v7250_v33 = vld [vmem:[#allocation8 + $0x430] sm:$0xf0]  ;;  %4079 = vmatpush.bf16.msrb.mxu1 %v8245_v29  ;;  %4059 = vmatpush.bf16.msra.mxu3 %v7541_v38 }
 0x236   :  { %v10128_v42 = vld [vmem:[#allocation8 + $0x614] sm:$0xf]  ;;  %v7253_v49 = vor.u32 %v10064_v40, %v7250_v33 }
 0x237   :  { %v7506_v43 = vld [vmem:[#allocation8 + $0x630] sm:$0xf0]  ;;  %4067 = vmatpush.bf16.msrb.mxu0 %v7957_v32 }
 0x238   :  { %v10376_v44 = vld [vmem:[#allocation8 + $0xdd4] sm:$0xf]  ;;  %v7509_v54 = vor.u32 %v10128_v42, %v7506_v43  ;;  %4047 = vmatpush.bf16.msra.mxu2 %v7253_v49 }
 0x239   :  { %v8498_v45 = vld [vmem:[#allocation8 + $0xdf0] sm:$0xf0]  ;;  %4080 = vmatpush.bf16.msrb.mxu1 %v8213_v48 }
 0x23a   :  { %v10440_v47 = vld [vmem:[#allocation8 + $0xfd4] sm:$0xf]  ;;  %v8501_v55 = vor.u32 %v10376_v44, %v8498_v45  ;;  %4060 = vmatpush.bf16.msra.mxu3 %v7509_v54  ;;  %v3829_v44 = vadd.f32 %v3828_v35, %v3816_v34  ;;  %v6936_v35 = vld [vmem:[#allocation8 + $0x198] sm:$0xf] }
 0x23b   :  { %v8754_v28 = vld [vmem:[#allocation8 + $0xff0] sm:$0xf0]  ;;  %4048 = vmatmul.bf16.vlgmr.msra.gmra.mxu2 %v11130_v30 }
 0x23c   :  { %v10232_v50 = vld [vmem:[#allocation8 + $0x954] sm:$0xf]  ;;  %v8757_v58 = vor.u32 %v10440_v47, %v8754_v28  ;;  %4092 = vmatpush.bf16.msrb.mxu2 %v8501_v55 }
 0x23d   :  { %v7922_v52 = vld [vmem:[#allocation8 + $0x970] sm:$0xf0]  ;;  %4061 = vmatmul.bf16.vlgmr.msra.gmra.mxu3 %v11132_v36 }
 0x23e   :  { %v10296_v26 = vld [vmem:[#allocation8 + $0xb54] sm:$0xf]  ;;  %v7925_v61 = vor.u32 %v10232_v50, %v7922_v52  ;;  %4105 = vmatpush.bf16.msrb.mxu3 %v8757_v58 }
 0x23f   :  { %v8178_v56 = vld [vmem:[#allocation8 + $0xb70] sm:$0xf0] }
 0x240   :  { %v10368_v59 = vld [vmem:[#allocation8 + $0xd94] sm:$0xf]  ;;  %v8181_v0 = vor.u32 %v10296_v26, %v8178_v56  ;;  %4068 = vmatpush.bf16.msrb.mxu0 %v7925_v61 }
 0x241   :  { %v8466_v60 = vld [vmem:[#allocation8 + $0xdb0] sm:$0xf0] }
 0x242   :  { %v10432_v62 = vld [vmem:[#allocation8 + $0xf94] sm:$0xf]  ;;  %v8469_v4 = vor.u32 %v10368_v59, %v8466_v60  ;;  %4081 = vmatpush.bf16.msrb.mxu1 %v8181_v0  ;;  %v3817_v59 = vpop.f32.mrf.mxu0 }
 0x243   :  { %v8722_v63 = vld [vmem:[#allocation8 + $0xfb0] sm:$0xf0] }
 0x244   :  { %v10224_v2 = vld [vmem:[#allocation8 + $0x914] sm:$0xf]  ;;  %v8725_v9 = vor.u32 %v10432_v62, %v8722_v63  ;;  %4093 = vmatpush.bf16.msrb.mxu2 %v8469_v4  ;;  %v3830_v63 = vpop.f32.mrf.mxu1 }
 0x245   :  { %v7890_v3 = vld [vmem:[#allocation8 + $0x930] sm:$0xf0] }
 0x246   :  { %v10288_v5 = vld [vmem:[#allocation8 + $0xb14] sm:$0xf]  ;;  %v7893_v15 = vor.u32 %v10224_v2, %v7890_v3  ;;  %4106 = vmatpush.bf16.msrb.mxu3 %v8725_v9 }
 0x247   :  { %v8146_v7 = vld [vmem:[#allocation8 + $0xb30] sm:$0xf0] }
 0x248   :  { %v10360_v10 = vld [vmem:[#allocation8 + $0xd54] sm:$0xf]  ;;  %v8149_v51 = vor.u32 %v10288_v5, %v8146_v7  ;;  %4069 = vmatpush.bf16.msrb.mxu0 %v7893_v15  ;;  %v9997_v15 = vld [vmem:[#allocation8 + $0x1f4] sm:$0xf0] }
 0x249   :  { %v8434_v11 = vld [vmem:[#allocation8 + $0xd70] sm:$0xf0]  ;;  %v6969_v34 = vor.u32 %v9997_v15, %v6968_v13  ;;  %v7128_v13 = vld [vmem:[#allocation8 + $0x318] sm:$0xf] }
 0x24a   :  { %v10424_v17 = vld [vmem:[#allocation8 + $0xf54] sm:$0xf]  ;;  %v8437_v21 = vor.u32 %v10360_v10, %v8434_v11  ;;  %4082 = vmatpush.bf16.msrb.mxu1 %v8149_v51  ;;  %v10037_v15 = vld [vmem:[#allocation8 + $0x334] sm:$0xf0] }
 0x24b   :  { %v8690_v18 = vld [vmem:[#allocation8 + $0xf70] sm:$0xf0] }
 0x24c   :  { %v10216_v19 = vld [vmem:[#allocation8 + $0x8d4] sm:$0xf]  ;;  %v8693_v27 = vor.u32 %v10424_v17, %v8690_v18  ;;  %4094 = vmatpush.bf16.msrb.mxu2 %v8437_v21  ;;  %v7224_v17 = vld [vmem:[#allocation8 + $0x3d8] sm:$0xf]  ;;  %v3841_v18 = vpop.f32.mrf.mxu2 }
 0x24d   :  { %v7858_v20 = vld [vmem:[#allocation8 + $0x8f0] sm:$0xf0] }
 0x24e   :  { %v10280_v22 = vld [vmem:[#allocation8 + $0xad4] sm:$0xf]  ;;  %v7861_v37 = vor.u32 %v10216_v19, %v7858_v20  ;;  %4107 = vmatpush.bf16.msrb.mxu3 %v8693_v27  ;;  %v10061_v19 = vld [vmem:[#allocation8 + $0x3f4] sm:$0xf0] }
 0x24f   :  { %v8114_v23 = vld [vmem:[#allocation8 + $0xaf0] sm:$0xf0] }
 0x250   :  { %v10352_v29 = vld [vmem:[#allocation8 + $0xd14] sm:$0xf]  ;;  %v8117_v33 = vor.u32 %v10280_v22, %v8114_v23  ;;  %4070 = vmatpush.bf16.msrb.mxu0 %v7861_v37  ;;  %v3842_v22 = vadd.f32 %v3841_v18, %v3829_v44  ;;  %v3854_v23 = vpop.f32.mrf.mxu3  ;;  %v7416_v18 = vld [vmem:[#allocation8 + $0x558] sm:$0xf] }
 0x251   :  { %v8402_v31 = vld [vmem:[#allocation8 + $0xd30] sm:$0xf0] }
 0x252   :  { %v10416_v38 = vld [vmem:[#allocation8 + $0xf14] sm:$0xf]  ;;  %v8405_v45 = vor.u32 %v10352_v29, %v8402_v31  ;;  %4083 = vmatpush.bf16.msrb.mxu1 %v8117_v33  ;;  %v11207_v37 = vadd.f32 %v3854_v23, %v3842_v22  ;;  %v9989_v33 = vld [vmem:[#allocation8 + $0x1b4] sm:$0xf0]  ;;  %v7129_v22 = vor.u32 %v10037_v15, %v7128_v13 }
 0x253   :  { %v8658_v40 = vld [vmem:[#allocation8 + $0xf30] sm:$0xf0]  ;;  %v6840_v23 = vld [vmem:[#allocation8 + $0xd8] sm:$0xf] }
 0x254   :  { %v10208_v42 = vld [vmem:[#allocation8 + $0x894] sm:$0xf]  ;;  %v8661_v28 = vor.u32 %v10416_v38, %v8658_v40  ;;  %4095 = vmatpush.bf16.msrb.mxu2 %v8405_v45  ;;  %v7225_v38 = vor.u32 %v10061_v19, %v7224_v17  ;;  %v9941_v13 = vld [vmem:[#allocation8 + $0x34] sm:$0xf0] }
 0x255   :  { %v7826_v43 = vld [vmem:[#allocation8 + $0x8b0] sm:$0xf0]  ;;  %v7000_v15 = vld [vmem:[#allocation8 + $0x218] sm:$0xf] }
 0x256   :  { %v10272_v32 = vld [vmem:[#allocation8 + $0xa94] sm:$0xf]  ;;  %v7829_v50 = vor.u32 %v10208_v42, %v7826_v43  ;;  %4108 = vmatpush.bf16.msrb.mxu3 %v8661_v28  ;;  %v7192_v42 = vld [vmem:[#allocation8 + $0x398] sm:$0xf] }
 0x257   :  { %v8082_v47 = vld [vmem:[#allocation8 + $0xab0] sm:$0xf0]  ;;  %v10053_v43 = vld [vmem:[#allocation8 + $0x3b4] sm:$0xf0] }
 0x258   :  { %v10344_v48 = vld [vmem:[#allocation8 + $0xcd4] sm:$0xf]  ;;  %v8085_v54 = vor.u32 %v10272_v32, %v8082_v47  ;;  %4071 = vmatpush.bf16.msrb.mxu0 %v7829_v50  ;;  %v6937_v50 = vor.u32 %v9989_v33, %v6936_v35 }
 0x259   :  { %v8370_v49 = vld [vmem:[#allocation8 + $0xcf0] sm:$0xf0] }
 0x25a   :  { %v10408_v52 = vld [vmem:[#allocation8 + $0xed4] sm:$0xf]  ;;  %v8373_v56 = vor.u32 %v10344_v48, %v8370_v49  ;;  %4084 = vmatpush.bf16.msrb.mxu1 %v8085_v54  ;;  %v7480_v48 = vld [vmem:[#allocation8 + $0x5d8] sm:$0xf]  ;;  %v7193_v54 = vor.u32 %v10053_v43, %v7192_v42  ;;  %v3880_v42 = vpop.f32.mrf.mxu1 }
 0x25b   :  { %v8626_v53 = vld [vmem:[#allocation8 + $0xef0] sm:$0xf0]  ;;  %v10125_v49 = vld [vmem:[#allocation8 + $0x5f4] sm:$0xf0] }
 0x25c   :  { %v10200_v55 = vld [vmem:[#allocation8 + $0x854] sm:$0xf]  ;;  %v8629_v60 = vor.u32 %v10408_v52, %v8626_v53  ;;  %4096 = vmatpush.bf16.msrb.mxu2 %v8373_v56  ;;  %v7736_v52 = vld [vmem:[#allocation8 + $0x7d8] sm:$0xf]  ;;  %v7481_v59 = vor.u32 %v10125_v49, %v7480_v48 }
 0x25d   :  { %v7794_v26 = vld [vmem:[#allocation8 + $0x870] sm:$0xf0]  ;;  %v10189_v53 = vld [vmem:[#allocation8 + $0x7f4] sm:$0xf0] }
 0x25e   :  { %v10264_v57 = vld [vmem:[#allocation8 + $0xa54] sm:$0xf]  ;;  %v7797_v0 = vor.u32 %v10200_v55, %v7794_v26  ;;  %4109 = vmatpush.bf16.msrb.mxu3 %v8629_v60  ;;  %v6904_v26 = vld [vmem:[#allocation8 + $0x158] sm:$0xf]  ;;  %v7737_v63 = vor.u32 %v10189_v53, %v7736_v52 }
 0x25f   :  { %v8050_v58 = vld [vmem:[#allocation8 + $0xa70] sm:$0xf0]  ;;  %v9981_v56 = vld [vmem:[#allocation8 + $0x174] sm:$0xf0] }
 0x260   :  { %v10336_v61 = vld [vmem:[#allocation8 + $0xc94] sm:$0xf]  ;;  %v8053_v5 = vor.u32 %v10264_v57, %v8050_v58  ;;  %4072 = vmatpush.bf16.msrb.mxu0 %v7797_v0  ;;  %v3843_v57 = vpop.f32.mrf.mxu2  ;;  %v7160_v60 = vld [vmem:[#allocation8 + $0x358] sm:$0xf] }
 0x261   :  { %v8338_v62 = vld [vmem:[#allocation8 + $0xcb0] sm:$0xf0]  ;;  %v7448_v0 = vld [vmem:[#allocation8 + $0x598] sm:$0xf] }
 0x262   :  { %v10400_v2 = vld [vmem:[#allocation8 + $0xe94] sm:$0xf]  ;;  %v8341_v11 = vor.u32 %v10336_v61, %v8338_v62  ;;  %4085 = vmatpush.bf16.msrb.mxu1 %v8053_v5  ;;  %v10045_v61 = vld [vmem:[#allocation8 + $0x374] sm:$0xf0]  ;;  %v3856_v62 = vpop.f32.mrf.mxu3 }
 0x263   :  { %v8594_v3 = vld [vmem:[#allocation8 + $0xeb0] sm:$0xf0]  ;;  %v10181_v5 = vld [vmem:[#allocation8 + $0x7b4] sm:$0xf0] }
 0x264   :  { %v10192_v4 = vld [vmem:[#allocation8 + $0x814] sm:$0xf]  ;;  %v8597_v51 = vor.u32 %v10400_v2, %v8594_v3  ;;  %4097 = vmatpush.bf16.msrb.mxu2 %v8341_v11  ;;  %v10117_v2 = vld [vmem:[#allocation8 + $0x5b4] sm:$0xf0]  ;;  %v6905_v3 = vor.u32 %v9981_v56, %v6904_v26 }
 0x265   :  { %v7762_v7 = vld [vmem:[#allocation8 + $0x830] sm:$0xf0]  ;;  %v7449_v11 = vor.u32 %v10117_v2, %v7448_v0  ;;  %v10021_v52 = vld [vmem:[#allocation8 + $0x2b4] sm:$0xf0] }
 0x266   :  { %v10256_v9 = vld [vmem:[#allocation8 + $0xa14] sm:$0xf]  ;;  %v7765_v24 = vor.u32 %v10192_v4, %v7762_v7  ;;  %4110 = vmatpush.bf16.msrb.mxu3 %v8597_v51  ;;  %v7704_v4 = vld [vmem:[#allocation8 + $0x798] sm:$0xf]  ;;  %v7161_v7 = vor.u32 %v10045_v61, %v7160_v60 }
 0x267   :  { %v8018_v10 = vld [vmem:[#allocation8 + $0xa30] sm:$0xf0]  ;;  %v7705_v17 = vor.u32 %v10181_v5, %v7704_v4  ;;  %v10109_v51 = vld [vmem:[#allocation8 + $0x574] sm:$0xf0]  ;;  %v3882_v4 = vpop.f32.mrf.mxu1 }
 0x268   :  { %v10328_v20 = vld [vmem:[#allocation8 + $0xc54] sm:$0xf]  ;;  %v8021_v31 = vor.u32 %v10256_v9, %v8018_v10  ;;  %4073 = vmatpush.bf16.msrb.mxu0 %v7765_v24  ;;  %v6872_v9 = vld [vmem:[#allocation8 + $0x118] sm:$0xf] }
 0x269   :  { %v8306_v21 = vld [vmem:[#allocation8 + $0xc70] sm:$0xf0]  ;;  %v9973_v10 = vld [vmem:[#allocation8 + $0x134] sm:$0xf0] }
 0x26a   :  { %v10392_v27 = vld [vmem:[#allocation8 + $0xe54] sm:$0xf]  ;;  %v8309_v40 = vor.u32 %v10328_v20, %v8306_v21  ;;  %4086 = vmatpush.bf16.msrb.mxu1 %v8021_v31  ;;  %v6873_v19 = vor.u32 %v9973_v10, %v6872_v9  ;;  %v7672_v20 = vld [vmem:[#allocation8 + $0x758] sm:$0xf] }
 0x26b   :  { %v8562_v29 = vld [vmem:[#allocation8 + $0xe70] sm:$0xf0]  ;;  %4074 = vmatmul.bf16.vlgmr.msrb.gmra.mxu0 %v11139_v8  ;;  %v10173_v21 = vld [vmem:[#allocation8 + $0x774] sm:$0xf0] }
 0x26c   :  { %v8565_v45 = vor.u32 %v10392_v27, %v8562_v29  ;;  %v10320_v44 = vld [vmem:[#allocation8 + $0xc14] sm:$0xf]  ;;  %4118 = vmatpush.bf16.msra.mxu0 %v6969_v34  ;;  %4098 = vmatpush.bf16.msrb.mxu2 %v8309_v40  ;;  %v9965_v24 = vld [vmem:[#allocation8 + $0xf4] sm:$0xf0]  ;;  %v7417_v27 = vor.u32 %v10109_v51, %v7416_v18  ;;  %v3867_v34 = vpop.f32.mrf.mxu0  ;;  %v7673_v35 = vor.u32 %v10173_v21, %v7672_v20  ;;  %v3893_v21 = vpop.f32.mrf.mxu2 }
 0x26d   :  { %v8274_v32 = vld [vmem:[#allocation8 + $0xc30] sm:$0xf0]  ;;  %4087 = vmatmul.bf16.vlgmr.msrb.gmra.mxu1 %v11141_v14  ;;  %v7096_v29 = vld [vmem:[#allocation8 + $0x2d8] sm:$0xf]  ;;  %v3868_v33 = vadd.f32 %v3867_v34, %v11207_v37  ;;  %v6841_v43 = vor.u32 %v9965_v24, %v6840_v23 }
 0x26e   :  { %v10384_v47 = vld [vmem:[#allocation8 + $0xe14] sm:$0xf]  ;;  %4131 = vmatpush.bf16.msra.mxu1 %v7225_v38  ;;  %v8277_v55 = vor.u32 %v10320_v44, %v8274_v32  ;;  %4111 = vmatpush.bf16.msrb.mxu3 %v8565_v45  ;;  %v10029_v31 = vld [vmem:[#allocation8 + $0x2f4] sm:$0xf0] }
 0x26f   :  { %v8530_v28 = vld [vmem:[#allocation8 + $0xe30] sm:$0xf0]  ;;  %v7384_v38 = vld [vmem:[#allocation8 + $0x518] sm:$0xf]  ;;  %v7097_v32 = vor.u32 %v10029_v31, %v7096_v29  ;;  %v3881_v48 = vadd.f32 %v3880_v42, %v3868_v33  ;;  %v3906_v31 = vpop.f32.mrf.mxu3 }
 0x270   :  { %v8533_v58 = vor.u32 %v10384_v47, %v8530_v28  ;;  %4119 = vmatpush.bf16.msra.mxu0 %v6937_v50  ;;  %4099 = vmatpush.bf16.msrb.mxu2 %v8277_v55  ;;  %v10101_v40 = vld [vmem:[#allocation8 + $0x534] sm:$0xf0] }
 0x271   :  { %v7640_v45 = vld [vmem:[#allocation8 + $0x718] sm:$0xf]  ;;  %v7385_v49 = vor.u32 %v10101_v40, %v7384_v38  ;;  %v3894_v29 = vadd.f32 %v3893_v21, %v3881_v48 }
 0x272   :  { %4132 = vmatpush.bf16.msra.mxu1 %v7193_v54  ;;  %4112 = vmatpush.bf16.msrb.mxu3 %v8533_v58  ;;  %v10165_v44 = vld [vmem:[#allocation8 + $0x734] sm:$0xf0] }
 0x273   :  { %4100 = vmatmul.bf16.vlgmr.msrb.gmra.mxu2 %v11145_v41  ;;  %v6808_v47 = vld [vmem:[#allocation8 + $0x98] sm:$0xf]  ;;  %v7641_v53 = vor.u32 %v10165_v44, %v7640_v45 }
 0x274   :  { %4144 = vmatpush.bf16.msra.mxu2 %v7481_v59  ;;  %4120 = vmatpush.bf16.msra.mxu0 %v6905_v3  ;;  %v9957_v28 = vld [vmem:[#allocation8 + $0xb4] sm:$0xf0] }
 0x275   :  { %4113 = vmatmul.bf16.vlgmr.msrb.gmra.mxu3 %v11147_v46  ;;  %v7064_v50 = vld [vmem:[#allocation8 + $0x298] sm:$0xf]  ;;  %v6809_v37 = vor.u32 %v9957_v28, %v6808_v47 }
 0x276   :  { %4157 = vmatpush.bf16.msra.mxu3 %v7737_v63  ;;  %4133 = vmatpush.bf16.msra.mxu1 %v7161_v7  ;;  %v7352_v54 = vld [vmem:[#allocation8 + $0x4d8] sm:$0xf]  ;;  %v7065_v57 = vor.u32 %v10021_v52, %v7064_v50  ;;  %v3869_v63 = vpop.f32.mrf.mxu0 }
 0x277   :  { %v10093_v55 = vld [vmem:[#allocation8 + $0x4f4] sm:$0xf0] }
 0x278   :  { %4145 = vmatpush.bf16.msra.mxu2 %v7449_v11  ;;  %4121 = vmatpush.bf16.msra.mxu0 %v6873_v19  ;;  %v7608_v26 = vld [vmem:[#allocation8 + $0x6d8] sm:$0xf]  ;;  %v7353_v60 = vor.u32 %v10093_v55, %v7352_v54 }
 0x279   :  { %v10157_v56 = vld [vmem:[#allocation8 + $0x6f4] sm:$0xf0] }
 0x27a   :  { %4158 = vmatpush.bf16.msra.mxu3 %v7705_v17  ;;  %4134 = vmatpush.bf16.msra.mxu1 %v7129_v22  ;;  %v6776_v58 = vld [vmem:[#allocation8 + $0x58] sm:$0xf]  ;;  %v7609_v0 = vor.u32 %v10157_v56, %v7608_v26 }
 0x27b   :  { %v9949_v59 = vld [vmem:[#allocation8 + $0x74] sm:$0xf0] }
 0x27c   :  { %4146 = vmatpush.bf16.msra.mxu2 %v7417_v27  ;;  %4122 = vmatpush.bf16.msra.mxu0 %v6841_v43  ;;  %v7032_v61 = vld [vmem:[#allocation8 + $0x258] sm:$0xf]  ;;  %v6777_v5 = vor.u32 %v9949_v59, %v6776_v58  ;;  %v11214_v43 = vadd.f32 %v3906_v31, %v3894_v29 }
 0x27d   :  { %v10013_v62 = vld [vmem:[#allocation8 + $0x274] sm:$0xf0] }
 0x27e   :  { %4159 = vmatpush.bf16.msra.mxu3 %v7673_v35  ;;  %4135 = vmatpush.bf16.msra.mxu1 %v7097_v32  ;;  %v7320_v2 = vld [vmem:[#allocation8 + $0x498] sm:$0xf]  ;;  %v7033_v11 = vor.u32 %v10013_v62, %v7032_v61  ;;  %v3895_v61 = vpop.f32.mrf.mxu2 }
 0x27f   :  { %v10085_v3 = vld [vmem:[#allocation8 + $0x4b4] sm:$0xf0] }
 0x280   :  { %4147 = vmatpush.bf16.msra.mxu2 %v7385_v49  ;;  %4123 = vmatpush.bf16.msra.mxu0 %v6809_v37  ;;  %v7576_v7 = vld [vmem:[#allocation8 + $0x698] sm:$0xf]  ;;  %v7321_v18 = vor.u32 %v10085_v3, %v7320_v2  ;;  %v3908_v3 = vpop.f32.mrf.mxu3 }
 0x281   :  { %v10149_v9 = vld [vmem:[#allocation8 + $0x6b4] sm:$0xf0] }
 0x282   :  { %4160 = vmatpush.bf16.msra.mxu3 %v7641_v53  ;;  %v6744_v10 = vld [vmem:[#allocation8 + $0x18] sm:$0xf]  ;;  %4136 = vmatpush.bf16.msra.mxu1 %v7065_v57  ;;  %v7577_v22 = vor.u32 %v10149_v9, %v7576_v7 }
 0x283   :  { %v10005_v17 = vld [vmem:[#allocation8 + $0x234] sm:$0xf0]  ;;  %v6745_v34 = vor.u32 %v9941_v13, %v6744_v10 }
 0x284   :  { %4148 = vmatpush.bf16.msra.mxu2 %v7353_v60  ;;  %v7992_v51 = vld [vmem:[#allocation8 + $0x9d8] sm:$0xf]  ;;  %4124 = vmatpush.bf16.msra.mxu0 %v6777_v5  ;;  %v7001_v40 = vor.u32 %v10005_v17, %v7000_v15 }
 0x285   :  { %v10253_v19 = vld [vmem:[#allocation8 + $0x9f4] sm:$0xf0] }
 0x286   :  { %v8248_v20 = vld [vmem:[#allocation8 + $0xbd8] sm:$0xf]  ;;  %4161 = vmatpush.bf16.msra.mxu3 %v7609_v0  ;;  %4137 = vmatpush.bf16.msra.mxu1 %v7033_v11  ;;  %v7993_v33 = vor.u32 %v10253_v19, %v7992_v51 }
 0x287   :  { %v10317_v23 = vld [vmem:[#allocation8 + $0xbf4] sm:$0xf0] }
 0x288   :  { %v7288_v24 = vld [vmem:[#allocation8 + $0x458] sm:$0xf]  ;;  %4149 = vmatpush.bf16.msra.mxu2 %v7321_v18  ;;  %v8249_v45 = vor.u32 %v10317_v23, %v8248_v20  ;;  %4125 = vmatpush.bf16.msra.mxu0 %v6745_v34  ;;  %v922_v23 = vperm.slane %v11203_v12, 4  ;;  %v3932_v12 = vpop.f32.mrf.mxu1 }
 0x289   :  { %v10077_v27 = vld [vmem:[#allocation8 + $0x474] sm:$0xf0] }
 0x28a   :  { %v7544_v35 = vld [vmem:[#allocation8 + $0x658] sm:$0xf]  ;;  %v7289_v44 = vor.u32 %v10077_v27, %v7288_v24  ;;  %4162 = vmatpush.bf16.msra.mxu3 %v7577_v22  ;;  %4138 = vmatpush.bf16.msra.mxu1 %v7001_v40 }
 0x28b   :  { %v10141_v38 = vld [vmem:[#allocation8 + $0x674] sm:$0xf0]  ;;  %4126 = vmatmul.bf16.vlgmr.msra.gmra.mxu0 %v11122_v1 }
 0x28c   :  { %v7960_v42 = vld [vmem:[#allocation8 + $0x998] sm:$0xf]  ;;  %v7545_v49 = vor.u32 %v10141_v38, %v7544_v35  ;;  %4170 = vmatpush.bf16.msrb.mxu0 %v7993_v33  ;;  %4150 = vmatpush.bf16.msra.mxu2 %v7289_v44 }
 0x28d   :  { %v10245_v32 = vld [vmem:[#allocation8 + $0x9b4] sm:$0xf0]  ;;  %4139 = vmatmul.bf16.vlgmr.msra.gmra.mxu1 %v11125_v6 }
 0x28e   :  { %v8216_v47 = vld [vmem:[#allocation8 + $0xb98] sm:$0xf]  ;;  %v7961_v37 = vor.u32 %v10245_v32, %v7960_v42  ;;  %4183 = vmatpush.bf16.msrb.mxu1 %v8249_v45  ;;  %4163 = vmatpush.bf16.msra.mxu3 %v7545_v49  ;;  %v3919_v42 = vpop.f32.mrf.mxu0 }
 0x28f   :  { %v10309_v28 = vld [vmem:[#allocation8 + $0xbb4] sm:$0xf0] }
 0x290   :  { %v7256_v48 = vld [vmem:[#allocation8 + $0x418] sm:$0xf]  ;;  %v8217_v57 = vor.u32 %v10309_v28, %v8216_v47  ;;  %4171 = vmatpush.bf16.msrb.mxu0 %v7961_v37  ;;  %v3920_v47 = vadd.f32 %v3919_v42, %v922_v23  ;;  %v9993_v23 = vld [vmem:[#allocation8 + $0x1dc] sm:$0xf] }
 0x291   :  { %v10069_v50 = vld [vmem:[#allocation8 + $0x434] sm:$0xf0] }
 0x292   :  { %v7512_v52 = vld [vmem:[#allocation8 + $0x618] sm:$0xf]  ;;  %v7257_v58 = vor.u32 %v10069_v50, %v7256_v48  ;;  %4184 = vmatpush.bf16.msrb.mxu1 %v8217_v57 }
 0x293   :  { %v10133_v53 = vld [vmem:[#allocation8 + $0x634] sm:$0xf0] }
 0x294   :  { %v8504_v54 = vld [vmem:[#allocation8 + $0xdd8] sm:$0xf]  ;;  %v7513_v62 = vor.u32 %v10133_v53, %v7512_v52  ;;  %4151 = vmatpush.bf16.msra.mxu2 %v7257_v58 }
 0x295   :  { %v10381_v55 = vld [vmem:[#allocation8 + $0xdf4] sm:$0xf0] }
 0x296   :  { %v8760_v26 = vld [vmem:[#allocation8 + $0xfd8] sm:$0xf]  ;;  %v8505_v63 = vor.u32 %v10381_v55, %v8504_v54  ;;  %4164 = vmatpush.bf16.msra.mxu3 %v7513_v62  ;;  %v3933_v54 = vadd.f32 %v3932_v12, %v3920_v47  ;;  %v9985_v12 = vld [vmem:[#allocation8 + $0x19c] sm:$0xf] }
 0x297   :  { %v10445_v56 = vld [vmem:[#allocation8 + $0xff4] sm:$0xf0]  ;;  %4152 = vmatmul.bf16.vlgmr.msra.gmra.mxu2 %v11130_v30 }
 0x298   :  { %v7928_v59 = vld [vmem:[#allocation8 + $0x958] sm:$0xf]  ;;  %v8761_v4 = vor.u32 %v10445_v56, %v8760_v26  ;;  %4196 = vmatpush.bf16.msrb.mxu2 %v8505_v63 }
 0x299   :  { %v10237_v60 = vld [vmem:[#allocation8 + $0x974] sm:$0xf0]  ;;  %4165 = vmatmul.bf16.vlgmr.msra.gmra.mxu3 %v11132_v36 }
 0x29a   :  { %v8184_v0 = vld [vmem:[#allocation8 + $0xb58] sm:$0xf]  ;;  %v7929_v9 = vor.u32 %v10237_v60, %v7928_v59  ;;  %4209 = vmatpush.bf16.msrb.mxu3 %v8761_v4 }
 0x29b   :  { %v10301_v2 = vld [vmem:[#allocation8 + $0xb74] sm:$0xf0] }
 0x29c   :  { %v8472_v5 = vld [vmem:[#allocation8 + $0xd98] sm:$0xf]  ;;  %v8185_v13 = vor.u32 %v10301_v2, %v8184_v0  ;;  %4172 = vmatpush.bf16.msrb.mxu0 %v7929_v9 }
 0x29d   :  { %v10373_v7 = vld [vmem:[#allocation8 + $0xdb4] sm:$0xf0] }
 0x29e   :  { %v8728_v10 = vld [vmem:[#allocation8 + $0xf98] sm:$0xf]  ;;  %v8473_v18 = vor.u32 %v10373_v7, %v8472_v5  ;;  %4185 = vmatpush.bf16.msrb.mxu1 %v8185_v13  ;;  %v3921_v5 = vpop.f32.mrf.mxu0 }
 0x29f   :  { %v10437_v11 = vld [vmem:[#allocation8 + $0xfb4] sm:$0xf0] }
 0x2a0   :  { %v7896_v15 = vld [vmem:[#allocation8 + $0x918] sm:$0xf]  ;;  %v8729_v20 = vor.u32 %v10437_v11, %v8728_v10  ;;  %4197 = vmatpush.bf16.msrb.mxu2 %v8473_v18  ;;  %v3934_v11 = vpop.f32.mrf.mxu1 }
 0x2a1   :  { %v10229_v17 = vld [vmem:[#allocation8 + $0x934] sm:$0xf0] }
 0x2a2   :  { %v8152_v51 = vld [vmem:[#allocation8 + $0xb18] sm:$0xf]  ;;  %v7897_v24 = vor.u32 %v10229_v17, %v7896_v15  ;;  %4210 = vmatpush.bf16.msrb.mxu3 %v8729_v20 }
 0x2a3   :  { %v10293_v19 = vld [vmem:[#allocation8 + $0xb34] sm:$0xf0] }
 0x2a4   :  { %v8440_v21 = vld [vmem:[#allocation8 + $0xd58] sm:$0xf]  ;;  %v8153_v31 = vor.u32 %v10293_v19, %v8152_v51  ;;  %4173 = vmatpush.bf16.msrb.mxu0 %v7897_v24  ;;  %v6970_v24 = vld [vmem:[#allocation8 + $0x1f8] sm:$0xf0] }
 0x2a5   :  { %v10365_v22 = vld [vmem:[#allocation8 + $0xd74] sm:$0xf0]  ;;  %v6973_v47 = vor.u32 %v9993_v23, %v6970_v24  ;;  %v10033_v23 = vld [vmem:[#allocation8 + $0x31c] sm:$0xf] }
 0x2a6   :  { %v8696_v27 = vld [vmem:[#allocation8 + $0xf58] sm:$0xf]  ;;  %v8441_v38 = vor.u32 %v10365_v22, %v8440_v21  ;;  %4186 = vmatpush.bf16.msrb.mxu1 %v8153_v31  ;;  %v7130_v24 = vld [vmem:[#allocation8 + $0x338] sm:$0xf0] }
 0x2a7   :  { %v10429_v29 = vld [vmem:[#allocation8 + $0xf74] sm:$0xf0] }
 0x2a8   :  { %v7864_v34 = vld [vmem:[#allocation8 + $0x8d8] sm:$0xf]  ;;  %v8697_v45 = vor.u32 %v10429_v29, %v8696_v27  ;;  %4198 = vmatpush.bf16.msrb.mxu2 %v8441_v38  ;;  %v10057_v27 = vld [vmem:[#allocation8 + $0x3dc] sm:$0xf]  ;;  %v3945_v29 = vpop.f32.mrf.mxu2 }
 0x2a9   :  { %v10221_v35 = vld [vmem:[#allocation8 + $0x8f4] sm:$0xf0] }
 0x2aa   :  { %v8120_v40 = vld [vmem:[#allocation8 + $0xad8] sm:$0xf]  ;;  %v7865_v28 = vor.u32 %v10221_v35, %v7864_v34  ;;  %4211 = vmatpush.bf16.msrb.mxu3 %v8697_v45  ;;  %v7226_v34 = vld [vmem:[#allocation8 + $0x3f8] sm:$0xf0] }
 0x2ab   :  { %v10285_v33 = vld [vmem:[#allocation8 + $0xaf4] sm:$0xf0] }
 0x2ac   :  { %v8408_v44 = vld [vmem:[#allocation8 + $0xd18] sm:$0xf]  ;;  %v8121_v50 = vor.u32 %v10285_v33, %v8120_v40  ;;  %4174 = vmatpush.bf16.msrb.mxu0 %v7865_v28  ;;  %v3946_v40 = vadd.f32 %v3945_v29, %v3933_v54  ;;  %v3958_v33 = vpop.f32.mrf.mxu3  ;;  %v10105_v29 = vld [vmem:[#allocation8 + $0x55c] sm:$0xf] }
 0x2ad   :  { %v10357_v32 = vld [vmem:[#allocation8 + $0xd34] sm:$0xf0] }
 0x2ae   :  { %v8664_v49 = vld [vmem:[#allocation8 + $0xf18] sm:$0xf]  ;;  %v8409_v55 = vor.u32 %v10357_v32, %v8408_v44  ;;  %4187 = vmatpush.bf16.msrb.mxu1 %v8121_v50  ;;  %v11221_v28 = vadd.f32 %v3958_v33, %v3946_v40  ;;  %v6938_v50 = vld [vmem:[#allocation8 + $0x1b8] sm:$0xf0]  ;;  %v7133_v40 = vor.u32 %v10033_v23, %v7130_v24 }
 0x2af   :  { %v10421_v48 = vld [vmem:[#allocation8 + $0xf34] sm:$0xf0]  ;;  %v9961_v33 = vld [vmem:[#allocation8 + $0xdc] sm:$0xf] }
 0x2b0   :  { %v7832_v52 = vld [vmem:[#allocation8 + $0x898] sm:$0xf]  ;;  %v8665_v56 = vor.u32 %v10421_v48, %v8664_v49  ;;  %4199 = vmatpush.bf16.msrb.mxu2 %v8409_v55  ;;  %v7229_v49 = vor.u32 %v10057_v27, %v7226_v34  ;;  %v6746_v23 = vld [vmem:[#allocation8 + $0x38] sm:$0xf0] }
 0x2b1   :  { %v10213_v53 = vld [vmem:[#allocation8 + $0x8b4] sm:$0xf0]  ;;  %v10001_v24 = vld [vmem:[#allocation8 + $0x21c] sm:$0xf] }
 0x2b2   :  { %v8088_v37 = vld [vmem:[#allocation8 + $0xa98] sm:$0xf]  ;;  %v7833_v59 = vor.u32 %v10213_v53, %v7832_v52  ;;  %4212 = vmatpush.bf16.msrb.mxu3 %v8665_v56  ;;  %v10049_v52 = vld [vmem:[#allocation8 + $0x39c] sm:$0xf] }
 0x2b3   :  { %v10277_v26 = vld [vmem:[#allocation8 + $0xab4] sm:$0xf0]  ;;  %v7194_v53 = vld [vmem:[#allocation8 + $0x3b8] sm:$0xf0] }
 0x2b4   :  { %v8376_v57 = vld [vmem:[#allocation8 + $0xcd8] sm:$0xf]  ;;  %v8089_v62 = vor.u32 %v10277_v26, %v8088_v37  ;;  %4175 = vmatpush.bf16.msrb.mxu0 %v7833_v59  ;;  %v6941_v59 = vor.u32 %v9985_v12, %v6938_v50 }
 0x2b5   :  { %v10349_v58 = vld [vmem:[#allocation8 + $0xcf4] sm:$0xf0] }
 0x2b6   :  { %v8632_v60 = vld [vmem:[#allocation8 + $0xed8] sm:$0xf]  ;;  %v8377_v2 = vor.u32 %v10349_v58, %v8376_v57  ;;  %4188 = vmatpush.bf16.msrb.mxu1 %v8089_v62  ;;  %v10121_v57 = vld [vmem:[#allocation8 + $0x5dc] sm:$0xf]  ;;  %v7197_v62 = vor.u32 %v10049_v52, %v7194_v53  ;;  %v3984_v52 = vpop.f32.mrf.mxu1 }
 0x2b7   :  { %v10413_v61 = vld [vmem:[#allocation8 + $0xef4] sm:$0xf0]  ;;  %v7482_v58 = vld [vmem:[#allocation8 + $0x5f8] sm:$0xf0] }
 0x2b8   :  { %v7800_v63 = vld [vmem:[#allocation8 + $0x858] sm:$0xf]  ;;  %v8633_v7 = vor.u32 %v10413_v61, %v8632_v60  ;;  %4200 = vmatpush.bf16.msrb.mxu2 %v8377_v2  ;;  %v10185_v60 = vld [vmem:[#allocation8 + $0x7dc] sm:$0xf]  ;;  %v7485_v5 = vor.u32 %v10121_v57, %v7482_v58 }
 0x2b9   :  { %v10205_v0 = vld [vmem:[#allocation8 + $0x874] sm:$0xf0]  ;;  %v7738_v61 = vld [vmem:[#allocation8 + $0x7f8] sm:$0xf0] }
 0x2ba   :  { %v8056_v3 = vld [vmem:[#allocation8 + $0xa58] sm:$0xf]  ;;  %v7801_v13 = vor.u32 %v10205_v0, %v7800_v63  ;;  %4213 = vmatpush.bf16.msrb.mxu3 %v8633_v7  ;;  %v9977_v0 = vld [vmem:[#allocation8 + $0x15c] sm:$0xf]  ;;  %v7741_v11 = vor.u32 %v10185_v60, %v7738_v61 }
 0x2bb   :  { %v10269_v4 = vld [vmem:[#allocation8 + $0xa74] sm:$0xf0]  ;;  %v6906_v2 = vld [vmem:[#allocation8 + $0x178] sm:$0xf0] }
 0x2bc   :  { %v8344_v9 = vld [vmem:[#allocation8 + $0xc98] sm:$0xf]  ;;  %v8057_v51 = vor.u32 %v10269_v4, %v8056_v3  ;;  %4176 = vmatpush.bf16.msrb.mxu0 %v7801_v13  ;;  %v3947_v3 = vpop.f32.mrf.mxu2  ;;  %v10041_v7 = vld [vmem:[#allocation8 + $0x35c] sm:$0xf] }
 0x2bd   :  { %v10341_v10 = vld [vmem:[#allocation8 + $0xcb4] sm:$0xf0]  ;;  %v10113_v13 = vld [vmem:[#allocation8 + $0x59c] sm:$0xf] }
 0x2be   :  { %v8600_v15 = vld [vmem:[#allocation8 + $0xe98] sm:$0xf]  ;;  %v8345_v22 = vor.u32 %v10341_v10, %v8344_v9  ;;  %4189 = vmatpush.bf16.msrb.mxu1 %v8057_v51  ;;  %v7162_v9 = vld [vmem:[#allocation8 + $0x378] sm:$0xf0]  ;;  %v3960_v10 = vpop.f32.mrf.mxu3 }
 0x2bf   :  { %v10405_v17 = vld [vmem:[#allocation8 + $0xeb4] sm:$0xf0]  ;;  %v7706_v51 = vld [vmem:[#allocation8 + $0x7b8] sm:$0xf0] }
 0x2c0   :  { %v7768_v18 = vld [vmem:[#allocation8 + $0x818] sm:$0xf]  ;;  %v8601_v31 = vor.u32 %v10405_v17, %v8600_v15  ;;  %4201 = vmatpush.bf16.msrb.mxu2 %v8345_v22  ;;  %v7450_v15 = vld [vmem:[#allocation8 + $0x5b8] sm:$0xf0]  ;;  %v6909_v17 = vor.u32 %v9977_v0, %v6906_v2 }
 0x2c1   :  { %v10197_v19 = vld [vmem:[#allocation8 + $0x834] sm:$0xf0]  ;;  %v7453_v22 = vor.u32 %v10113_v13, %v7450_v15  ;;  %v7066_v60 = vld [vmem:[#allocation8 + $0x2b8] sm:$0xf0] }
 0x2c2   :  { %v8024_v20 = vld [vmem:[#allocation8 + $0xa18] sm:$0xf]  ;;  %v7769_v42 = vor.u32 %v10197_v19, %v7768_v18  ;;  %4214 = vmatpush.bf16.msrb.mxu3 %v8601_v31  ;;  %v10177_v18 = vld [vmem:[#allocation8 + $0x79c] sm:$0xf]  ;;  %v7165_v19 = vor.u32 %v10041_v7, %v7162_v9 }
 0x2c3   :  { %v10261_v21 = vld [vmem:[#allocation8 + $0xa34] sm:$0xf0]  ;;  %v7709_v27 = vor.u32 %v10177_v18, %v7706_v51  ;;  %v7418_v31 = vld [vmem:[#allocation8 + $0x578] sm:$0xf0]  ;;  %v3986_v18 = vpop.f32.mrf.mxu1 }
 0x2c4   :  { %v8312_v35 = vld [vmem:[#allocation8 + $0xc58] sm:$0xf]  ;;  %v8025_v32 = vor.u32 %v10261_v21, %v8024_v20  ;;  %4177 = vmatpush.bf16.msrb.mxu0 %v7769_v42  ;;  %v9969_v20 = vld [vmem:[#allocation8 + $0x11c] sm:$0xf] }
 0x2c5   :  { %v10333_v38 = vld [vmem:[#allocation8 + $0xc74] sm:$0xf0]  ;;  %v6874_v21 = vld [vmem:[#allocation8 + $0x138] sm:$0xf0] }
 0x2c6   :  { %v8568_v45 = vld [vmem:[#allocation8 + $0xe58] sm:$0xf]  ;;  %v8313_v48 = vor.u32 %v10333_v38, %v8312_v35  ;;  %4190 = vmatpush.bf16.msrb.mxu1 %v8025_v32  ;;  %v6877_v34 = vor.u32 %v9969_v20, %v6874_v21  ;;  %v10169_v35 = vld [vmem:[#allocation8 + $0x75c] sm:$0xf] }
 0x2c7   :  { %v10397_v44 = vld [vmem:[#allocation8 + $0xe74] sm:$0xf0]  ;;  %4178 = vmatmul.bf16.vlgmr.msrb.gmra.mxu0 %v11139_v8  ;;  %v7674_v38 = vld [vmem:[#allocation8 + $0x778] sm:$0xf0] }
 0x2c8   :  { %v8569_v55 = vor.u32 %v10397_v44, %v8568_v45  ;;  %v8280_v54 = vld [vmem:[#allocation8 + $0xc18] sm:$0xf]  ;;  %4222 = vmatpush.bf16.msra.mxu0 %v6973_v47  ;;  %4202 = vmatpush.bf16.msrb.mxu2 %v8313_v48  ;;  %v6842_v42 = vld [vmem:[#allocation8 + $0xf8] sm:$0xf0]  ;;  %v7421_v45 = vor.u32 %v10105_v29, %v7418_v31  ;;  %v3971_v47 = vpop.f32.mrf.mxu0  ;;  %v7677_v12 = vor.u32 %v10169_v35, %v7674_v38  ;;  %v3997_v38 = vpop.f32.mrf.mxu2 }
 0x2c9   :  { %v10325_v37 = vld [vmem:[#allocation8 + $0xc34] sm:$0xf0]  ;;  %4191 = vmatmul.bf16.vlgmr.msrb.gmra.mxu1 %v11141_v14  ;;  %v10025_v44 = vld [vmem:[#allocation8 + $0x2dc] sm:$0xf]  ;;  %v3972_v50 = vadd.f32 %v3971_v47, %v11221_v28  ;;  %v6845_v53 = vor.u32 %v9961_v33, %v6842_v42 }
 0x2ca   :  { %v8536_v26 = vld [vmem:[#allocation8 + $0xe18] sm:$0xf]  ;;  %4235 = vmatpush.bf16.msra.mxu1 %v7229_v49  ;;  %v8281_v63 = vor.u32 %v10325_v37, %v8280_v54  ;;  %4215 = vmatpush.bf16.msrb.mxu3 %v8569_v55  ;;  %v7098_v32 = vld [vmem:[#allocation8 + $0x2f8] sm:$0xf0] }
 0x2cb   :  { %v10389_v56 = vld [vmem:[#allocation8 + $0xe34] sm:$0xf0]  ;;  %v10097_v49 = vld [vmem:[#allocation8 + $0x51c] sm:$0xf]  ;;  %v7101_v37 = vor.u32 %v10025_v44, %v7098_v32  ;;  %v3985_v57 = vadd.f32 %v3984_v52, %v3972_v50  ;;  %v4010_v32 = vpop.f32.mrf.mxu3 }
 0x2cc   :  { %v8537_v4 = vor.u32 %v10389_v56, %v8536_v26  ;;  %4223 = vmatpush.bf16.msra.mxu0 %v6941_v59  ;;  %4203 = vmatpush.bf16.msrb.mxu2 %v8281_v63  ;;  %v7386_v48 = vld [vmem:[#allocation8 + $0x538] sm:$0xf0] }
 0x2cd   :  { %v10161_v55 = vld [vmem:[#allocation8 + $0x71c] sm:$0xf]  ;;  %v7389_v58 = vor.u32 %v10097_v49, %v7386_v48  ;;  %v3998_v44 = vadd.f32 %v3997_v38, %v3985_v57 }
 0x2ce   :  { %4236 = vmatpush.bf16.msra.mxu1 %v7197_v62  ;;  %4216 = vmatpush.bf16.msrb.mxu3 %v8537_v4  ;;  %v7642_v54 = vld [vmem:[#allocation8 + $0x738] sm:$0xf0] }
 0x2cf   :  { %4204 = vmatmul.bf16.vlgmr.msrb.gmra.mxu2 %v11145_v41  ;;  %v9953_v26 = vld [vmem:[#allocation8 + $0x9c] sm:$0xf]  ;;  %v7645_v61 = vor.u32 %v10161_v55, %v7642_v54 }
 0x2d0   :  { %4248 = vmatpush.bf16.msra.mxu2 %v7485_v5  ;;  %4224 = vmatpush.bf16.msra.mxu0 %v6909_v17  ;;  %v6810_v56 = vld [vmem:[#allocation8 + $0xb8] sm:$0xf0] }
 0x2d1   :  { %4217 = vmatmul.bf16.vlgmr.msrb.gmra.mxu3 %v11147_v46  ;;  %v10017_v59 = vld [vmem:[#allocation8 + $0x29c] sm:$0xf]  ;;  %v6813_v28 = vor.u32 %v9953_v26, %v6810_v56 }
 0x2d2   :  { %4261 = vmatpush.bf16.msra.mxu3 %v7741_v11  ;;  %4237 = vmatpush.bf16.msra.mxu1 %v7165_v19  ;;  %v10089_v62 = vld [vmem:[#allocation8 + $0x4dc] sm:$0xf]  ;;  %v7069_v3 = vor.u32 %v10017_v59, %v7066_v60  ;;  %v3973_v11 = vpop.f32.mrf.mxu0 }
 0x2d3   :  { %v7354_v63 = vld [vmem:[#allocation8 + $0x4f8] sm:$0xf0] }
 0x2d4   :  { %4249 = vmatpush.bf16.msra.mxu2 %v7453_v22  ;;  %4225 = vmatpush.bf16.msra.mxu0 %v6877_v34  ;;  %v10153_v0 = vld [vmem:[#allocation8 + $0x6dc] sm:$0xf]  ;;  %v7357_v7 = vor.u32 %v10089_v62, %v7354_v63 }
 0x2d5   :  { %v7610_v2 = vld [vmem:[#allocation8 + $0x6f8] sm:$0xf0] }
 0x2d6   :  { %4262 = vmatpush.bf16.msra.mxu3 %v7709_v27  ;;  %4238 = vmatpush.bf16.msra.mxu1 %v7133_v40  ;;  %v9945_v4 = vld [vmem:[#allocation8 + $0x5c] sm:$0xf]  ;;  %v7613_v13 = vor.u32 %v10153_v0, %v7610_v2 }
 0x2d7   :  { %v6778_v5 = vld [vmem:[#allocation8 + $0x78] sm:$0xf0] }
 0x2d8   :  { %4250 = vmatpush.bf16.msra.mxu2 %v7421_v45  ;;  %4226 = vmatpush.bf16.msra.mxu0 %v6845_v53  ;;  %v10009_v9 = vld [vmem:[#allocation8 + $0x25c] sm:$0xf]  ;;  %v6781_v51 = vor.u32 %v9945_v4, %v6778_v5  ;;  %v11228_v53 = vadd.f32 %v4010_v32, %v3998_v44 }
 0x2d9   :  { %v7034_v10 = vld [vmem:[#allocation8 + $0x278] sm:$0xf0] }
 0x2da   :  { %4263 = vmatpush.bf16.msra.mxu3 %v7677_v12  ;;  %4239 = vmatpush.bf16.msra.mxu1 %v7101_v37  ;;  %v10081_v15 = vld [vmem:[#allocation8 + $0x49c] sm:$0xf]  ;;  %v7037_v22 = vor.u32 %v10009_v9, %v7034_v10  ;;  %v3999_v9 = vpop.f32.mrf.mxu2 }
 0x2db   :  { %v7322_v17 = vld [vmem:[#allocation8 + $0x4b8] sm:$0xf0] }
 0x2dc   :  { %4251 = vmatpush.bf16.msra.mxu2 %v7389_v58  ;;  %4227 = vmatpush.bf16.msra.mxu0 %v6813_v28  ;;  %v10145_v19 = vld [vmem:[#allocation8 + $0x69c] sm:$0xf]  ;;  %v7325_v29 = vor.u32 %v10081_v15, %v7322_v17  ;;  %v4012_v17 = vpop.f32.mrf.mxu3 }
 0x2dd   :  { %v7578_v20 = vld [vmem:[#allocation8 + $0x6b8] sm:$0xf0] }
 0x2de   :  { %4264 = vmatpush.bf16.msra.mxu3 %v7645_v61  ;;  %v9937_v21 = vld [vmem:[#allocation8 + $0x1c] sm:$0xf]  ;;  %4240 = vmatpush.bf16.msra.mxu1 %v7069_v3  ;;  %v7581_v40 = vor.u32 %v10145_v19, %v7578_v20 }
 0x2df   :  { %v7002_v27 = vld [vmem:[#allocation8 + $0x238] sm:$0xf0]  ;;  %v6749_v47 = vor.u32 %v9937_v21, %v6746_v23 }
 0x2e0   :  { %4252 = vmatpush.bf16.msra.mxu2 %v7357_v7  ;;  %v10249_v31 = vld [vmem:[#allocation8 + $0x9dc] sm:$0xf]  ;;  %4228 = vmatpush.bf16.msra.mxu0 %v6781_v51  ;;  %v7005_v48 = vor.u32 %v10001_v24, %v7002_v27 }
 0x2e1   :  { %v7994_v34 = vld [vmem:[#allocation8 + $0x9f8] sm:$0xf0] }
 0x2e2   :  { %v10313_v35 = vld [vmem:[#allocation8 + $0xbdc] sm:$0xf]  ;;  %4265 = vmatpush.bf16.msra.mxu3 %v7613_v13  ;;  %4241 = vmatpush.bf16.msra.mxu1 %v7037_v22  ;;  %v7997_v50 = vor.u32 %v10249_v31, %v7994_v34 }
 0x2e3   :  { %v8250_v33 = vld [vmem:[#allocation8 + $0xbf8] sm:$0xf0] }
 0x2e4   :  { %v10073_v42 = vld [vmem:[#allocation8 + $0x45c] sm:$0xf]  ;;  %4253 = vmatpush.bf16.msra.mxu2 %v7325_v29  ;;  %v8253_v55 = vor.u32 %v10313_v35, %v8250_v33  ;;  %4229 = vmatpush.bf16.msra.mxu0 %v6749_v47 }
 0x2e5   :  { %v7290_v45 = vld [vmem:[#allocation8 + $0x478] sm:$0xf0] }
 0x2e6   :  { %v10137_v12 = vld [vmem:[#allocation8 + $0x65c] sm:$0xf]  ;;  %v7293_v54 = vor.u32 %v10073_v42, %v7290_v45  ;;  %4266 = vmatpush.bf16.msra.mxu3 %v7581_v40  ;;  %4242 = vmatpush.bf16.msra.mxu1 %v7005_v48 }
 0x2e7   :  { %v7546_v49 = vld [vmem:[#allocation8 + $0x678] sm:$0xf0]  ;;  %4230 = vmatmul.bf16.vlgmr.msra.gmra.mxu0 %v11122_v1 }
 0x2e8   :  { %v10241_v52 = vld [vmem:[#allocation8 + $0x99c] sm:$0xf]  ;;  %v7549_v58 = vor.u32 %v10137_v12, %v7546_v49  ;;  %4274 = vmatpush.bf16.msrb.mxu0 %v7997_v50  ;;  %4254 = vmatpush.bf16.msra.mxu2 %v7293_v54  ;;  %v11234_v49 = vpop.f32.mrf.mxu0 }
 0x2e9   :  { %v7962_v37 = vld [vmem:[#allocation8 + $0x9b8] sm:$0xf0]  ;;  %4243 = vmatmul.bf16.vlgmr.msra.gmra.mxu1 %v11125_v6 }
 0x2ea   :  { %v10305_v26 = vld [vmem:[#allocation8 + $0xb9c] sm:$0xf]  ;;  %v7965_v28 = vor.u32 %v10241_v52, %v7962_v37  ;;  %4287 = vmatpush.bf16.msrb.mxu1 %v8253_v55  ;;  %4267 = vmatpush.bf16.msra.mxu3 %v7549_v58  ;;  %v11236_v52 = vpop.f32.mrf.mxu1 }
 0x2eb   :  { %v8218_v56 = vld [vmem:[#allocation8 + $0xbb8] sm:$0xf0] }
 0x2ec   :  { %v10065_v57 = vld [vmem:[#allocation8 + $0x41c] sm:$0xf]  ;;  %v8221_v3 = vor.u32 %v10305_v26, %v8218_v56  ;;  %4275 = vmatpush.bf16.msrb.mxu0 %v7965_v28 }
 0x2ed   :  { %v7258_v59 = vld [vmem:[#allocation8 + $0x438] sm:$0xf0] }
 0x2ee   :  { %v10129_v60 = vld [vmem:[#allocation8 + $0x61c] sm:$0xf]  ;;  %v7261_v4 = vor.u32 %v10065_v57, %v7258_v59  ;;  %4288 = vmatpush.bf16.msrb.mxu1 %v8221_v3 }
 0x2ef   :  { %v7514_v61 = vld [vmem:[#allocation8 + $0x638] sm:$0xf0] }
 0x2f0   :  { %v10377_v62 = vld [vmem:[#allocation8 + $0xddc] sm:$0xf]  ;;  %v7517_v10 = vor.u32 %v10129_v60, %v7514_v61  ;;  %4255 = vmatpush.bf16.msra.mxu2 %v7261_v4 }
 0x2f1   :  { %v8506_v63 = vld [vmem:[#allocation8 + $0xdf8] sm:$0xf0] }
 0x2f2   :  { %v10441_v0 = vld [vmem:[#allocation8 + $0xfdc] sm:$0xf]  ;;  %v8509_v11 = vor.u32 %v10377_v62, %v8506_v63  ;;  %4268 = vmatpush.bf16.msra.mxu3 %v7517_v10  ;;  %v4025_v10 = vpop.f32.mrf.mxu0  ;;  %v4038_v17 = vpop.f32.mrf.mxu1 }
 0x2f3   :  { %v8762_v2 = vld [vmem:[#allocation8 + $0xff8] sm:$0xf0]  ;;  %4256 = vmatmul.bf16.vlgmr.msra.gmra.mxu2 %v11130_v30 }
 0x2f4   :  { %v10233_v5 = vld [vmem:[#allocation8 + $0x95c] sm:$0xf]  ;;  %v8765_v18 = vor.u32 %v10441_v0, %v8762_v2  ;;  %4300 = vmatpush.bf16.msrb.mxu2 %v8509_v11 }
 0x2f5   :  { %v7930_v7 = vld [vmem:[#allocation8 + $0x978] sm:$0xf0]  ;;  %4269 = vmatmul.bf16.vlgmr.msra.gmra.mxu3 %v11132_v36 }
 0x2f6   :  { %v10297_v13 = vld [vmem:[#allocation8 + $0xb5c] sm:$0xf]  ;;  %v7933_v20 = vor.u32 %v10233_v5, %v7930_v7  ;;  %4313 = vmatpush.bf16.msrb.mxu3 %v8765_v18 }
 0x2f7   :  { %v8186_v15 = vld [vmem:[#allocation8 + $0xb78] sm:$0xf0] }
 0x2f8   :  { %v10369_v51 = vld [vmem:[#allocation8 + $0xd9c] sm:$0xf]  ;;  %v8189_v23 = vor.u32 %v10297_v13, %v8186_v15  ;;  %4276 = vmatpush.bf16.msrb.mxu0 %v7933_v20 }
 0x2f9   :  { %v8474_v19 = vld [vmem:[#allocation8 + $0xdb8] sm:$0xf0] }
 0x2fa   :  { %v10433_v21 = vld [vmem:[#allocation8 + $0xf9c] sm:$0xf]  ;;  %v8477_v1 = vor.u32 %v10369_v51, %v8474_v19  ;;  %4289 = vmatpush.bf16.msrb.mxu1 %v8189_v23 }
 0x2fb   :  { %v8730_v22 = vld [vmem:[#allocation8 + $0xfb8] sm:$0xf0] }
 0x2fc   :  { %v10225_v24 = vld [vmem:[#allocation8 + $0x91c] sm:$0xf]  ;;  %v8733_v34 = vor.u32 %v10433_v21, %v8730_v22  ;;  %4301 = vmatpush.bf16.msrb.mxu2 %v8477_v1  ;;  %v8880_v1 = vld [vmem:[#allocation11 + $0xe0] sm:$0xf] }
 0x2fd   :  { %v7898_v27 = vld [vmem:[#allocation8 + $0x938] sm:$0xf0] }
 0x2fe   :  { %v10289_v29 = vld [vmem:[#allocation8 + $0xb1c] sm:$0xf]  ;;  %v7901_v38 = vor.u32 %v10225_v24, %v7898_v27  ;;  %4314 = vmatpush.bf16.msrb.mxu3 %v8733_v34  ;;  %v11238_v34 = vpop.f32.mrf.mxu2 }
 0x2ff   :  { %v8154_v31 = vld [vmem:[#allocation8 + $0xb38] sm:$0xf0] }
 0x300   :  { %v10361_v6 = vld [vmem:[#allocation8 + $0xd5c] sm:$0xf]  ;;  %v8157_v42 = vor.u32 %v10289_v29, %v8154_v31  ;;  %4277 = vmatpush.bf16.msrb.mxu0 %v7901_v38  ;;  %v10476_v29 = vld [vmem:[#allocation11 + $0xec] sm:$0xf0]  ;;  %v9008_v31 = vld [vmem:[#allocation11 + $0x1e0] sm:$0xf] }
 0x301   :  { %v8442_v35 = vld [vmem:[#allocation8 + $0xd78] sm:$0xf0] }
 0x302   :  { %v10425_v40 = vld [vmem:[#allocation8 + $0xf5c] sm:$0xf]  ;;  %v8445_v32 = vor.u32 %v10361_v6, %v8442_v35  ;;  %4290 = vmatpush.bf16.msrb.mxu1 %v8157_v42  ;;  %v10508_v35 = vld [vmem:[#allocation11 + $0x1ec] sm:$0xf0] }
 0x303   :  { %v8698_v33 = vld [vmem:[#allocation8 + $0xf78] sm:$0xf0] }
 0x304   :  { %v10217_v45 = vld [vmem:[#allocation8 + $0x8dc] sm:$0xf]  ;;  %v8701_v48 = vor.u32 %v10425_v40, %v8698_v33  ;;  %4302 = vmatpush.bf16.msrb.mxu2 %v8445_v32  ;;  %v11240_v33 = vpop.f32.mrf.mxu3 }
 0x305   :  { %v7866_v44 = vld [vmem:[#allocation8 + $0x8f8] sm:$0xf0] }
 0x306   :  { %v10281_v47 = vld [vmem:[#allocation8 + $0xadc] sm:$0xf]  ;;  %v7869_v55 = vor.u32 %v10217_v45, %v7866_v44  ;;  %4315 = vmatpush.bf16.msrb.mxu3 %v8701_v48  ;;  %v9009_v48 = vor.u32 %v10508_v35, %v9008_v31  ;;  %v10564_v31 = vld [vmem:[#allocation11 + $0x3ac] sm:$0xf0]  ;;  %v8816_v35 = vld [vmem:[#allocation11 + $0x60] sm:$0xf] }
 0x307   :  { %v8122_v12 = vld [vmem:[#allocation8 + $0xaf8] sm:$0xf0] }
 0x308   :  { %v10353_v50 = vld [vmem:[#allocation8 + $0xd1c] sm:$0xf]  ;;  %v8125_v37 = vor.u32 %v10281_v47, %v8122_v12  ;;  %4278 = vmatpush.bf16.msrb.mxu0 %v7869_v55  ;;  %v8881_v47 = vor.u32 %v10476_v29, %v8880_v1  ;;  %v8864_v12 = vld [vmem:[#allocation11 + $0xc0] sm:$0xf] }
 0x309   :  { %v8410_v30 = vld [vmem:[#allocation8 + $0xd38] sm:$0xf0]  ;;  %v8992_v55 = vld [vmem:[#allocation11 + $0x1c0] sm:$0xf] }
 0x30a   :  { %v10417_v54 = vld [vmem:[#allocation8 + $0xf1c] sm:$0xf]  ;;  %v8413_v58 = vor.u32 %v10353_v50, %v8410_v30  ;;  %4291 = vmatpush.bf16.msrb.mxu1 %v8125_v37  ;;  %v10472_v30 = vld [vmem:[#allocation11 + $0xcc] sm:$0xf0]  ;;  %v9232_v29 = vld [vmem:[#allocation11 + $0x3a0] sm:$0xf] }
 0x30b   :  { %v8666_v36 = vld [vmem:[#allocation8 + $0xf38] sm:$0xf0] }
 0x30c   :  { %v10209_v26 = vld [vmem:[#allocation8 + $0x89c] sm:$0xf]  ;;  %v8669_v60 = vor.u32 %v10417_v54, %v8666_v36  ;;  %4303 = vmatpush.bf16.msrb.mxu2 %v8413_v58  ;;  %v10504_v54 = vld [vmem:[#allocation11 + $0x1cc] sm:$0xf0]  ;;  %v4064_v10 = vpop.f32.mrf.mxu3 }
 0x30d   :  { %v7834_v56 = vld [vmem:[#allocation8 + $0x8b8] sm:$0xf0] }
 0x30e   :  { %v10273_v57 = vld [vmem:[#allocation8 + $0xa9c] sm:$0xf]  ;;  %v7837_v63 = vor.u32 %v10209_v26, %v7834_v56  ;;  %4316 = vmatpush.bf16.msrb.mxu3 %v8669_v60  ;;  %v8865_v60 = vor.u32 %v10472_v30, %v8864_v12  ;;  %v11248_v12 = vpop.f32.mrf.mxu1 }
 0x30f   :  { %v8090_v59 = vld [vmem:[#allocation8 + $0xab8] sm:$0xf0] }
 0x310   :  { %v10345_v61 = vld [vmem:[#allocation8 + $0xcdc] sm:$0xf]  ;;  %v8093_v2 = vor.u32 %v10273_v57, %v8090_v59  ;;  %4279 = vmatpush.bf16.msrb.mxu0 %v7837_v63  ;;  %v9136_v57 = vld [vmem:[#allocation11 + $0x2e0] sm:$0xf]  ;;  %v10540_v59 = vld [vmem:[#allocation11 + $0x2ec] sm:$0xf0]  ;;  %v8993_v63 = vor.u32 %v10504_v54, %v8992_v55 }
 0x311   :  { %v8378_v62 = vld [vmem:[#allocation8 + $0xcf8] sm:$0xf0]  ;;  %v8800_v55 = vld [vmem:[#allocation11 + $0x40] sm:$0xf]  ;;  %v10456_v54 = vld [vmem:[#allocation11 + $0x4c] sm:$0xf0] }
 0x312   :  { %v10409_v28 = vld [vmem:[#allocation8 + $0xedc] sm:$0xf]  ;;  %v8381_v5 = vor.u32 %v10345_v61, %v8378_v62  ;;  %4292 = vmatpush.bf16.msrb.mxu1 %v8093_v2  ;;  %v9264_v61 = vld [vmem:[#allocation11 + $0x3e0] sm:$0xf]  ;;  %v10572_v62 = vld [vmem:[#allocation11 + $0x3ec] sm:$0xf0] }
 0x313   :  { %v8634_v0 = vld [vmem:[#allocation8 + $0xef8] sm:$0xf0]  ;;  %v10468_v2 = vld [vmem:[#allocation11 + $0xac] sm:$0xf0] }
 0x314   :  { %v10201_v3 = vld [vmem:[#allocation8 + $0x85c] sm:$0xf]  ;;  %v8637_v11 = vor.u32 %v10409_v28, %v8634_v0  ;;  %4304 = vmatpush.bf16.msrb.mxu2 %v8381_v5  ;;  %v8848_v0 = vld [vmem:[#allocation11 + $0xa0] sm:$0xf]  ;;  %v9137_v5 = vor.u32 %v10540_v59, %v9136_v57  ;;  %v10524_v57 = vld [vmem:[#allocation11 + $0x26c] sm:$0xf0]  ;;  %v8801_v59 = vor.u32 %v10456_v54, %v8800_v55 }
 0x315   :  { %v7802_v4 = vld [vmem:[#allocation8 + $0x878] sm:$0xf0]  ;;  %v8849_v17 = vor.u32 %v10468_v2, %v8848_v0  ;;  %v8912_v2 = vld [vmem:[#allocation11 + $0x120] sm:$0xf]  ;;  %v10632_v54 = vld [vmem:[#allocation11 + $0x5cc] sm:$0xf0] }
 0x316   :  { %v10265_v7 = vld [vmem:[#allocation8 + $0xa5c] sm:$0xf]  ;;  %v7805_v18 = vor.u32 %v10201_v3, %v7802_v4  ;;  %4317 = vmatpush.bf16.msrb.mxu3 %v8637_v11  ;;  %v4051_v3 = vpop.f32.mrf.mxu2  ;;  %v9265_v11 = vor.u32 %v10572_v62, %v9264_v61  ;;  %v10556_v61 = vld [vmem:[#allocation11 + $0x36c] sm:$0xf0]  ;;  %v4090_v10 = vpop.f32.mrf.mxu1  ;;  %v9504_v55 = vld [vmem:[#allocation11 + $0x5c0] sm:$0xf] }
 0x317   :  { %v8058_v9 = vld [vmem:[#allocation8 + $0xa78] sm:$0xf0]  ;;  %v10484_v3 = vld [vmem:[#allocation11 + $0x12c] sm:$0xf0] }
 0x318   :  { %v10337_v13 = vld [vmem:[#allocation8 + $0xc9c] sm:$0xf]  ;;  %v8061_v21 = vor.u32 %v10265_v7, %v8058_v9  ;;  %4280 = vmatpush.bf16.msrb.mxu0 %v7805_v18  ;;  %v8976_v7 = vld [vmem:[#allocation11 + $0x1a0] sm:$0xf]  ;;  %v10500_v9 = vld [vmem:[#allocation11 + $0x1ac] sm:$0xf0] }
 0x319   :  { %v8346_v15 = vld [vmem:[#allocation8 + $0xcb8] sm:$0xf0]  ;;  %v9248_v18 = vld [vmem:[#allocation11 + $0x3c0] sm:$0xf] }
 0x31a   :  { %v10401_v51 = vld [vmem:[#allocation8 + $0xe9c] sm:$0xf]  ;;  %v8349_v27 = vor.u32 %v10337_v13, %v8346_v15  ;;  %4293 = vmatpush.bf16.msrb.mxu1 %v8061_v21  ;;  %v9120_v13 = vld [vmem:[#allocation11 + $0x2c0] sm:$0xf]  ;;  %v10536_v15 = vld [vmem:[#allocation11 + $0x2cc] sm:$0xf0] }
 0x31b   :  { %v8602_v19 = vld [vmem:[#allocation8 + $0xeb8] sm:$0xf0]  ;;  %v10464_v21 = vld [vmem:[#allocation11 + $0x8c] sm:$0xf0] }
 0x31c   :  { %v10193_v20 = vld [vmem:[#allocation8 + $0x81c] sm:$0xf]  ;;  %v8605_v6 = vor.u32 %v10401_v51, %v8602_v19  ;;  %4305 = vmatpush.bf16.msrb.mxu2 %v8349_v27  ;;  %v10568_v51 = vld [vmem:[#allocation11 + $0x3cc] sm:$0xf0]  ;;  %v8977_v19 = vor.u32 %v10500_v9, %v8976_v7  ;;  %v9056_v7 = vld [vmem:[#allocation11 + $0x240] sm:$0xf] }
 0x31d   :  { %v7770_v22 = vld [vmem:[#allocation8 + $0x838] sm:$0xf0]  ;;  %v10532_v27 = vld [vmem:[#allocation11 + $0x2ac] sm:$0xf0] }
 0x31e   :  { %v10257_v23 = vld [vmem:[#allocation8 + $0xa1c] sm:$0xf]  ;;  %v7773_v42 = vor.u32 %v10193_v20, %v7770_v22  ;;  %4318 = vmatpush.bf16.msrb.mxu3 %v8605_v6  ;;  %v8832_v20 = vld [vmem:[#allocation11 + $0x80] sm:$0xf]  ;;  %v10520_v9 = vld [vmem:[#allocation11 + $0x24c] sm:$0xf0] }
 0x31f   :  { %v8026_v24 = vld [vmem:[#allocation8 + $0xa38] sm:$0xf0]  ;;  %v8960_v22 = vld [vmem:[#allocation11 + $0x180] sm:$0xf]  ;;  %v8833_v1 = vor.u32 %v10464_v21, %v8832_v20  ;;  %v10480_v20 = vld [vmem:[#allocation11 + $0x10c] sm:$0xf0]  ;;  %v9057_v21 = vor.u32 %v10520_v9, %v9056_v7 }
 0x320   :  { %v10329_v38 = vld [vmem:[#allocation8 + $0xc5c] sm:$0xf]  ;;  %v8029_v32 = vor.u32 %v10257_v23, %v8026_v24  ;;  %4281 = vmatpush.bf16.msrb.mxu0 %v7773_v42  ;;  %v10496_v23 = vld [vmem:[#allocation11 + $0x18c] sm:$0xf0]  ;;  %v9249_v24 = vor.u32 %v10568_v51, %v9248_v18  ;;  %v8944_v42 = vld [vmem:[#allocation11 + $0x160] sm:$0xf]  ;;  %v8913_v18 = vor.u32 %v10484_v3, %v8912_v2 }
 0x321   :  { %v8314_v40 = vld [vmem:[#allocation8 + $0xc78] sm:$0xf0]  ;;  %v8961_v6 = vor.u32 %v10496_v23, %v8960_v22  ;;  %v10448_v51 = vld [vmem:[#allocation11 + $0xc] sm:$0xf0]  ;;  %v9520_v23 = vld [vmem:[#allocation11 + $0x5e0] sm:$0xf] }
 0x322   :  { %v10393_v45 = vld [vmem:[#allocation8 + $0xe5c] sm:$0xf]  ;;  %v8317_v50 = vor.u32 %v10329_v38, %v8314_v40  ;;  %4294 = vmatpush.bf16.msrb.mxu1 %v8029_v32  ;;  %v10460_v38 = vld [vmem:[#allocation11 + $0x6c] sm:$0xf0]  ;;  %v9233_v32 = vor.u32 %v10564_v31, %v9232_v29  ;;  %v11252_v31 = vld [vmem:[#allocation10] sm:$0xff]  ;;  %v4328_v2 = vmax.f32 %v11198_v39, 0.0 }
 0x323   :  { %v8570_v44 = vld [vmem:[#allocation8 + $0xe78] sm:$0xf0]  ;;  %4282 = vmatmul.bf16.vlgmr.msrb.gmra.mxu0 %v11139_v8  ;;  %v9121_v8 = vor.u32 %v10536_v15, %v9120_v13  ;;  %v9184_v13 = vld [vmem:[#allocation11 + $0x340] sm:$0xf]  ;;  %v10552_v15 = vld [vmem:[#allocation11 + $0x34c] sm:$0xf0] }
 0x324   :  { %v8573_v36 = vor.u32 %v10393_v45, %v8570_v44  ;;  %v10321_v37 = vld [vmem:[#allocation8 + $0xc1c] sm:$0xf]  ;;  %5888 = vmatpush.bf16.msra.mxu0 %v8881_v47  ;;  %4306 = vmatpush.bf16.msrb.mxu2 %v8317_v50  ;;  %v10492_v45 = vld [vmem:[#allocation11 + $0x16c] sm:$0xf0]  ;;  %v11246_v44 = vpop.f32.mrf.mxu0  ;;  %v9088_v47 = vld [vmem:[#allocation11 + $0x280] sm:$0xf] }
 0x325   :  { %v8282_v26 = vld [vmem:[#allocation8 + $0xc38] sm:$0xf0]  ;;  %4295 = vmatmul.bf16.vlgmr.msrb.gmra.mxu1 %v11141_v14  ;;  %v9104_v14 = vld [vmem:[#allocation11 + $0x2a0] sm:$0xf]  ;;  %v8945_v30 = vor.u32 %v10492_v45, %v8944_v42  ;;  %v10604_v22 = vld [vmem:[#allocation11 + $0x4ec] sm:$0xf0] }
 0x326   :  { %v10385_v56 = vld [vmem:[#allocation8 + $0xe1c] sm:$0xf]  ;;  %5901 = vmatpush.bf16.msra.mxu1 %v9009_v48  ;;  %v8285_v28 = vor.u32 %v10321_v37, %v8282_v26  ;;  %4319 = vmatpush.bf16.msrb.mxu3 %v8573_v36  ;;  %v9105_v40 = vor.u32 %v10532_v27, %v9104_v14  ;;  %v8817_v48 = vor.u32 %v10460_v38, %v8816_v35  ;;  %v9216_v50 = vld [vmem:[#allocation11 + $0x380] sm:$0xf]  ;;  %v10488_v26 = vld [vmem:[#allocation11 + $0x14c] sm:$0xf0]  ;;  %v11255_v35 = vpop.f32.mrf.mxu3 }
 0x327   :  { %v8538_v58 = vld [vmem:[#allocation8 + $0xe38] sm:$0xf0]  ;;  %v8928_v37 = vld [vmem:[#allocation11 + $0x140] sm:$0xf]  ;;  %v9185_v14 = vor.u32 %v10552_v15, %v9184_v13  ;;  %v10636_v27 = vld [vmem:[#allocation11 + $0x5ec] sm:$0xf0] }
 0x328   :  { %v8541_v4 = vor.u32 %v10385_v56, %v8538_v58  ;;  %5889 = vmatpush.bf16.msra.mxu0 %v8865_v60  ;;  %4307 = vmatpush.bf16.msrb.mxu2 %v8285_v28  ;;  %v9072_v58 = vld [vmem:[#allocation11 + $0x260] sm:$0xf]  ;;  %v8929_v62 = vor.u32 %v10488_v26, %v8928_v37  ;;  %v10452_v28 = vld [vmem:[#allocation11 + $0x2c] sm:$0xf0]  ;;  %v4326_v45 = vmax.f32 %v11175_v16, 0.0  ;;  %v4329_v9 = vmax.f32 %v11214_v43, 0.0 }
 0x329   :  { %v9200_v60 = vld [vmem:[#allocation11 + $0x360] sm:$0xf]  ;;  %v9073_v0 = vor.u32 %v10524_v57, %v9072_v58  ;;  %v10516_v29 = vld [vmem:[#allocation11 + $0x22c] sm:$0xf0] }
 0x32a   :  { %5902 = vmatpush.bf16.msra.mxu1 %v8993_v63  ;;  %4320 = vmatpush.bf16.msrb.mxu3 %v8541_v4  ;;  %v8784_v63 = vld [vmem:[#allocation11 + $0x20] sm:$0xf]  ;;  %v10548_v42 = vld [vmem:[#allocation11 + $0x32c] sm:$0xf0] }
 0x32b   :  { %4308 = vmatmul.bf16.vlgmr.msrb.gmra.mxu2 %v11145_v41  ;;  %v10528_v41 = vld [vmem:[#allocation11 + $0x28c] sm:$0xf0]  ;;  %v9024_v37 = vld [vmem:[#allocation11 + $0x200] sm:$0xf] }
 0x32c   :  { %5914 = vmatpush.bf16.msra.mxu2 %v9137_v5  ;;  %5890 = vmatpush.bf16.msra.mxu0 %v8849_v17  ;;  %v9089_v36 = vor.u32 %v10528_v41, %v9088_v47  ;;  %v4077_v4 = vpop.f32.mrf.mxu0  ;;  %v9201_v5 = vor.u32 %v10556_v61, %v9200_v60  ;;  %v8768_v17 = vld [vmem:[#allocation11] sm:$0xf]  ;;  %v10512_v26 = vld [vmem:[#allocation11 + $0x20c] sm:$0xf0] }
 0x32d   :  { %4321 = vmatmul.bf16.vlgmr.msrb.gmra.mxu3 %v11147_v46  ;;  %v10560_v46 = vld [vmem:[#allocation11 + $0x38c] sm:$0xf0]  ;;  %v8769_v38 = vor.u32 %v10448_v51, %v8768_v17  ;;  %v9632_v13 = vld [vmem:[#allocation11 + $0x6c0] sm:$0xf] }
 0x32e   :  { %5927 = vmatpush.bf16.msra.mxu3 %v9265_v11  ;;  %5903 = vmatpush.bf16.msra.mxu1 %v8977_v19  ;;  %v9217_v56 = vor.u32 %v10560_v46, %v9216_v50  ;;  %v8785_v11 = vor.u32 %v10452_v28, %v8784_v63  ;;  %v8896_v19 = vld [vmem:[#allocation11 + $0x100] sm:$0xf]  ;;  %v9521_v50 = vor.u32 %v10636_v27, %v9520_v23  ;;  %v10544_v16 = vld [vmem:[#allocation11 + $0x30c] sm:$0xf0] }
 0x32f   :  { %v8897_v47 = vor.u32 %v10480_v20, %v8896_v19  ;;  %v10668_v57 = vld [vmem:[#allocation11 + $0x6ec] sm:$0xf0]  ;;  %v9025_v63 = vor.u32 %v10512_v26, %v9024_v37  ;;  %v9360_v28 = vld [vmem:[#allocation11 + $0x4a0] sm:$0xf]  ;;  %v11270_v20 = vpack.c.bf16 %v4328_v2, %v4328_v2 }
 0x330   :  { %5915 = vmatpush.bf16.msra.mxu2 %v9121_v8  ;;  %5891 = vmatpush.bf16.msra.mxu0 %v8833_v1  ;;  %v9392_v8 = vld [vmem:[#allocation11 + $0x4e0] sm:$0xf]  ;;  %v10628_v7 = vld [vmem:[#allocation11 + $0x5ac] sm:$0xf0] }
 0x331   :  { %v9040_v1 = vld [vmem:[#allocation11 + $0x220] sm:$0xf]  ;;  %v9393_v41 = vor.u32 %v10604_v22, %v9392_v8  ;;  %v10664_v15 = vld [vmem:[#allocation11 + $0x6cc] sm:$0xf0]  ;;  %v11272_v8 = vpack.c.bf16 %v4329_v9, %v4329_v9 }
 0x332   :  { %5928 = vmatpush.bf16.msra.mxu3 %v9249_v24  ;;  %5904 = vmatpush.bf16.msra.mxu1 %v8961_v6  ;;  %v11250_v24 = vpop.f32.mrf.mxu2  ;;  %v923_v6 = vperm.slane %v11252_v31, 5  ;;  %v9041_v46 = vor.u32 %v10516_v29, %v9040_v1  ;;  %v9344_v51 = vld [vmem:[#allocation11 + $0x480] sm:$0xf]  ;;  %v10592_v19 = vld [vmem:[#allocation11 + $0x48c] sm:$0xf0]  ;;  %v9633_v43 = vor.u32 %v10664_v15, %v9632_v13 }
 0x333   :  { %v9616_v22 = vld [vmem:[#allocation11 + $0x6a0] sm:$0xf]  ;;  %v10660_v23 = vld [vmem:[#allocation11 + $0x6ac] sm:$0xf0]  ;;  %v10506_v13 = vld [vmem:[#allocation11 + $0x1e4] sm:$0xf] }
 0x334   :  { %5916 = vmatpush.bf16.msra.mxu2 %v9105_v40  ;;  %5892 = vmatpush.bf16.msra.mxu0 %v8817_v48  ;;  %v9168_v40 = vld [vmem:[#allocation11 + $0x320] sm:$0xf]  ;;  %v4024_v58 = vadd.f32 %v11234_v49, %v923_v6  ;;  %v10588_v29 = vld [vmem:[#allocation11 + $0x46c] sm:$0xf0]  ;;  %v9617_v6 = vor.u32 %v10660_v23, %v9616_v22  ;;  %v10470_v22 = vld [vmem:[#allocation11 + $0xc4] sm:$0xf] }
 0x335   :  { %v9376_v48 = vld [vmem:[#allocation11 + $0x4c0] sm:$0xf]  ;;  %v8866_v23 = vld [vmem:[#allocation11 + $0xd0] sm:$0xf0] }
 0x336   :  { %5929 = vmatpush.bf16.msra.mxu3 %v9233_v32  ;;  %5905 = vmatpush.bf16.msra.mxu1 %v8945_v30  ;;  %v4327_v32 = vmax.f32 %v11184_v25, 0.0  ;;  %v10600_v30 = vld [vmem:[#allocation11 + $0x4cc] sm:$0xf0]  ;;  %v9648_v25 = vld [vmem:[#allocation11 + $0x6e0] sm:$0xf]  ;;  %v4037_v10 = vadd.f32 %v11236_v52, %v4024_v58 }
 0x337   :  { %v9377_v60 = vor.u32 %v10600_v30, %v9376_v48  ;;  %v9649_v4 = vor.u32 %v10668_v57, %v9648_v25  ;;  %v9472_v52 = vld [vmem:[#allocation11 + $0x580] sm:$0xf]  ;;  %v10580_v25 = vld [vmem:[#allocation11 + $0x42c] sm:$0xf0] }
 0x338   :  { %5917 = vmatpush.bf16.msra.mxu2 %v9089_v36  ;;  %5893 = vmatpush.bf16.msra.mxu0 %v8801_v59  ;;  %v9169_v36 = vor.u32 %v10548_v42, %v9168_v40  ;;  %v11260_v59 = vpack.c.bf16 %v4326_v45, %v4326_v45  ;;  %v11262_v61 = vpack.c.bf16 %v4327_v32, %v4327_v32  ;;  %v9328_v1 = vld [vmem:[#allocation11 + $0x460] sm:$0xf]  ;;  %v10620_v40 = vld [vmem:[#allocation11 + $0x56c] sm:$0xf0]  ;;  %v11278_v45 = vpop.f32.mrf.mxu0 }
 0x339   :  { %v4050_v39 = vadd.f32 %v11238_v34, %v4037_v10  ;;  %v9345_v34 = vor.u32 %v10592_v19, %v9344_v51  ;;  %v9600_v32 = vld [vmem:[#allocation11 + $0x680] sm:$0xf]  ;;  %v10474_v10 = vld [vmem:[#allocation11 + $0xe4] sm:$0xf] }
 0x33a   :  { %5930 = vmatpush.bf16.msra.mxu3 %v9217_v56  ;;  %5906 = vmatpush.bf16.msra.mxu1 %v8929_v62  ;;  %v9152_v56 = vld [vmem:[#allocation11 + $0x300] sm:$0xf]  ;;  %v9505_v62 = vor.u32 %v10632_v54, %v9504_v55  ;;  %v4103_v49 = vpop.f32.mrf.mxu2  ;;  %v10616_v54 = vld [vmem:[#allocation11 + $0x54c] sm:$0xf0] }
 0x33b   :  { %v9153_v3 = vor.u32 %v10544_v16, %v9152_v56  ;;  %v9440_v55 = vld [vmem:[#allocation11 + $0x540] sm:$0xf] }
 0x33c   :  { %5918 = vmatpush.bf16.msra.mxu2 %v9073_v0  ;;  %5894 = vmatpush.bf16.msra.mxu0 %v8785_v11  ;;  %v10596_v0 = vld [vmem:[#allocation11 + $0x4ac] sm:$0xf0]  ;;  %v4116_v11 = vpop.f32.mrf.mxu3  ;;  %v9584_v37 = vld [vmem:[#allocation11 + $0x660] sm:$0xf]  ;;  %v9441_v58 = vor.u32 %v10616_v54, %v9440_v55  ;;  %v10466_v55 = vld [vmem:[#allocation11 + $0xa4] sm:$0xf] }
 0x33d   :  { %v9361_v17 = vor.u32 %v10596_v0, %v9360_v28  ;;  %v9296_v16 = vld [vmem:[#allocation11 + $0x420] sm:$0xf]  ;;  %v10648_v0 = vld [vmem:[#allocation11 + $0x64c] sm:$0xf0]  ;;  %v8882_v11 = vld [vmem:[#allocation11 + $0xf0] sm:$0xf0] }
 0x33e   :  { %5931 = vmatpush.bf16.msra.mxu3 %v9201_v5  ;;  %5907 = vmatpush.bf16.msra.mxu1 %v8913_v18  ;;  %v9488_v5 = vld [vmem:[#allocation11 + $0x5a0] sm:$0xf]  ;;  %v8850_v54 = vld [vmem:[#allocation11 + $0xb0] sm:$0xf0] }
 0x33f   :  { %v9489_v18 = vor.u32 %v10628_v7, %v9488_v5  ;;  %v9568_v28 = vld [vmem:[#allocation11 + $0x640] sm:$0xf]  ;;  %v10608_v7 = vld [vmem:[#allocation11 + $0x50c] sm:$0xf0] }
 0x340   :  { %5919 = vmatpush.bf16.msra.mxu2 %v9057_v21  ;;  %5895 = vmatpush.bf16.msra.mxu0 %v8769_v38  ;;  %v10624_v21 = vld [vmem:[#allocation11 + $0x58c] sm:$0xf0]  ;;  %v9456_v38 = vld [vmem:[#allocation11 + $0x560] sm:$0xf]  ;;  %v9569_v9 = vor.u32 %v10648_v0, %v9568_v28  ;;  %v10462_v28 = vld [vmem:[#allocation11 + $0x84] sm:$0xf] }
 0x341   :  { %v9473_v27 = vor.u32 %v10624_v21, %v9472_v52  ;;  %v9457_v48 = vor.u32 %v10620_v40, %v9456_v38  ;;  %v9280_v49 = vld [vmem:[#allocation11 + $0x400] sm:$0xf]  ;;  %v8885_v21 = vor.u32 %v10474_v10, %v8882_v11  ;;  %v10700_v40 = vld [vmem:[#allocation11 + $0x7ec] sm:$0xf0]  ;;  %v8834_v0 = vld [vmem:[#allocation11 + $0x90] sm:$0xf0] }
 0x342   :  { %5932 = vmatpush.bf16.msra.mxu3 %v9185_v14  ;;  %5908 = vmatpush.bf16.msra.mxu1 %v8897_v47  ;;  %v4063_v14 = vadd.f32 %v11240_v33, %v4050_v39  ;;  %v10656_v47 = vld [vmem:[#allocation11 + $0x68c] sm:$0xf0]  ;;  %v9329_v33 = vor.u32 %v10588_v29, %v9328_v1  ;;  %v9408_v5 = vld [vmem:[#allocation11 + $0x500] sm:$0xf]  ;;  %v11285_v15 = vpop.f32.mrf.mxu2  ;;  %v8994_v1 = vld [vmem:[#allocation11 + $0x1d0] sm:$0xf0]  ;;  %v8837_v10 = vor.u32 %v10462_v28, %v8834_v0 }
 0x343   :  { %5896 = vmatmul.bf16.vlgmr.msra.gmra.mxu0 %v11260_v59  ;;  %v9601_v30 = vor.u32 %v10656_v47, %v9600_v32  ;;  %v9552_v39 = vld [vmem:[#allocation11 + $0x620] sm:$0xf]  ;;  %v9409_v52 = vor.u32 %v10608_v7, %v9408_v5  ;;  %v9138_v32 = vld [vmem:[#allocation11 + $0x2f0] sm:$0xf0]  ;;  %v10530_v5 = vld [vmem:[#allocation11 + $0x2a4] sm:$0xf] }
 0x344   :  { %5940 = vmatpush.bf16.msrb.mxu0 %v9393_v41  ;;  %5920 = vmatpush.bf16.msra.mxu2 %v9041_v46  ;;  %v4076_v42 = vadd.f32 %v11246_v44, %v4063_v14  ;;  %v11280_v41 = vpop.f32.mrf.mxu1  ;;  %v10584_v46 = vld [vmem:[#allocation11 + $0x44c] sm:$0xf0]  ;;  %v11287_v51 = vpop.f32.mrf.mxu3  ;;  %v9536_v29 = vld [vmem:[#allocation11 + $0x600] sm:$0xf]  ;;  %v9106_v7 = vld [vmem:[#allocation11 + $0x2b0] sm:$0xf0] }
 0x345   :  { %5909 = vmatmul.bf16.vlgmr.msra.gmra.mxu1 %v11262_v61  ;;  %v10652_v44 = vld [vmem:[#allocation11 + $0x66c] sm:$0xf0]  ;;  %v9776_v38 = vld [vmem:[#allocation11 + $0x7e0] sm:$0xf]  ;;  %v8770_v28 = vld [vmem:[#allocation11 + $0x10] sm:$0xf0] }
 0x346   :  { %5953 = vmatpush.bf16.msrb.mxu1 %v9521_v50  ;;  %5933 = vmatpush.bf16.msra.mxu3 %v9169_v36  ;;  %v9312_v50 = vld [vmem:[#allocation11 + $0x440] sm:$0xf]  ;;  %v4089_v36 = vadd.f32 %v11248_v12, %v4076_v42  ;;  %v9585_v57 = vor.u32 %v10652_v44, %v9584_v37  ;;  %v9297_v12 = vor.u32 %v10580_v25, %v9296_v16  ;;  %v10538_v42 = vld [vmem:[#allocation11 + $0x2e4] sm:$0xf] }
 0x347   :  { %v9313_v26 = vor.u32 %v10584_v46, %v9312_v50  ;;  %v9777_v47 = vor.u32 %v10700_v40, %v9776_v38  ;;  %v9141_v44 = vor.u32 %v10538_v42, %v9138_v32  ;;  %v10534_v25 = vld [vmem:[#allocation11 + $0x2c4] sm:$0xf]  ;;  %v8930_v40 = vld [vmem:[#allocation11 + $0x150] sm:$0xf0]  ;;  %v9712_v42 = vld [vmem:[#allocation11 + $0x760] sm:$0xf] }
 0x348   :  { %5941 = vmatpush.bf16.msrb.mxu0 %v9377_v60  ;;  %5921 = vmatpush.bf16.msra.mxu2 %v9025_v63  ;;  %v4102_v56 = vadd.f32 %v11250_v24, %v4089_v36  ;;  %v9424_v60 = vld [vmem:[#allocation11 + $0x520] sm:$0xf]  ;;  %v4129_v63 = vpop.f32.mrf.mxu0  ;;  %v10576_v24 = vld [vmem:[#allocation11 + $0x40c] sm:$0xf0]  ;;  %v10498_v36 = vld [vmem:[#allocation11 + $0x1a4] sm:$0xf] }
 0x349   :  { %v9281_v19 = vor.u32 %v10576_v24, %v9280_v49  ;;  %v10692_v24 = vld [vmem:[#allocation11 + $0x7ac] sm:$0xf0]  ;;  %v10478_v0 = vld [vmem:[#allocation11 + $0x104] sm:$0xf] }
 0x34a   :  { %5954 = vmatpush.bf16.msrb.mxu1 %v9505_v62  ;;  %5934 = vmatpush.bf16.msra.mxu3 %v9153_v3  ;;  %v10612_v62 = vld [vmem:[#allocation11 + $0x52c] sm:$0xf0]  ;;  %v4115_v3 = vadd.f32 %v11255_v35, %v4102_v56  ;;  %v4330_v35 = vmax.f32 %v11228_v53, 0.0  ;;  %v4155_v37 = vpop.f32.mrf.mxu2  ;;  %v9760_v56 = vld [vmem:[#allocation11 + $0x7c0] sm:$0xf] }
 0x34b   :  { %5922 = vmatmul.bf16.vlgmr.msra.gmra.mxu2 %v11270_v20  ;;  %v10684_v32 = vld [vmem:[#allocation11 + $0x76c] sm:$0xf0] }
 0x34c   :  { %5966 = vmatpush.bf16.msrb.mxu2 %v9649_v4  ;;  %5942 = vmatpush.bf16.msrb.mxu0 %v9361_v17  ;;  %v4142_v2 = vpop.f32.mrf.mxu1  ;;  %v9425_v4 = vor.u32 %v10612_v62, %v9424_v60  ;;  %v9010_v17 = vld [vmem:[#allocation11 + $0x1f0] sm:$0xf0]  ;;  %v11290_v53 = vpack.c.bf16 %v4330_v35, %v4330_v35  ;;  %v4168_v16 = vpop.f32.mrf.mxu3  ;;  %v8853_v62 = vor.u32 %v10466_v55, %v8850_v54  ;;  %v9728_v35 = vld [vmem:[#allocation11 + $0x780] sm:$0xf]  ;;  %v10450_v55 = vld [vmem:[#allocation11 + $0x24] sm:$0xf] }
 0x34d   :  { %5935 = vmatmul.bf16.vlgmr.msra.gmra.mxu3 %v11272_v8  ;;  %v10494_v2 = vld [vmem:[#allocation11 + $0x184] sm:$0xf]  ;;  %v8786_v54 = vld [vmem:[#allocation11 + $0x30] sm:$0xf0] }
 0x34e   :  { %5955 = vmatpush.bf16.msrb.mxu1 %v9489_v18  ;;  %v10644_v18 = vld [vmem:[#allocation11 + $0x62c] sm:$0xf0]  ;;  %5979 = vmatpush.bf16.msrb.mxu3 %v9777_v47  ;;  %v10522_v47 = vld [vmem:[#allocation11 + $0x264] sm:$0xf] }
 0x34f   :  { %v9553_v14 = vor.u32 %v10644_v18, %v9552_v39  ;;  %v10490_v39 = vld [vmem:[#allocation11 + $0x164] sm:$0xf] }
 0x350   :  { %5967 = vmatpush.bf16.msrb.mxu2 %v9633_v43  ;;  %5943 = vmatpush.bf16.msrb.mxu0 %v9345_v34  ;;  %v4331_v43 = vmax.f32 %v4115_v3, 0.0  ;;  %v9013_v34 = vor.u32 %v10506_v13, %v9010_v17  ;;  %v8962_v3 = vld [vmem:[#allocation11 + $0x190] sm:$0xf0]  ;;  %v10458_v13 = vld [vmem:[#allocation11 + $0x64] sm:$0xf] }
 0x351   :  { %v8965_v11 = vor.u32 %v10494_v2, %v8962_v3  ;;  %v8818_v17 = vld [vmem:[#allocation11 + $0x70] sm:$0xf0] }
 0x352   :  { %5956 = vmatpush.bf16.msrb.mxu1 %v9473_v27  ;;  %v10502_v27 = vld [vmem:[#allocation11 + $0x1c4] sm:$0xf]  ;;  %v11293_v50 = vpack.c.bf16 %v4331_v43, %v4331_v43  ;;  %v10688_v43 = vld [vmem:[#allocation11 + $0x78c] sm:$0xf0]  ;;  %v9394_v3 = vld [vmem:[#allocation11 + $0x4f0] sm:$0xf0] }
 0x353   :  { %v8997_v46 = vor.u32 %v10502_v27, %v8994_v1  ;;  %v8821_v27 = vor.u32 %v10458_v13, %v8818_v17  ;;  %v10514_v13 = vld [vmem:[#allocation11 + $0x224] sm:$0xf]  ;;  %v9042_v17 = vld [vmem:[#allocation11 + $0x230] sm:$0xf0] }
 0x354   :  { %5968 = vmatpush.bf16.msrb.mxu2 %v9617_v6  ;;  %5944 = vmatpush.bf16.msrb.mxu0 %v9329_v33  ;;  %v10640_v6 = vld [vmem:[#allocation11 + $0x60c] sm:$0xf0]  ;;  %v924_v33 = vperm.slane %v11252_v31, 6 }
 0x356   :  { %5957 = vmatpush.bf16.msrb.mxu1 %v9457_v48  ;;  %v8869_v48 = vor.u32 %v10470_v22, %v8866_v23  ;;  %v9090_v22 = vld [vmem:[#allocation11 + $0x290] sm:$0xf0]  ;;  %v9729_v23 = vor.u32 %v10688_v43, %v9728_v35  ;;  %v10598_v35 = vld [vmem:[#allocation11 + $0x4c4] sm:$0xf] }
 0x358   :  { %5969 = vmatpush.bf16.msrb.mxu2 %v9601_v30  ;;  %5945 = vmatpush.bf16.msrb.mxu0 %v9313_v26  ;;  %v9537_v30 = vor.u32 %v10640_v6, %v9536_v29  ;;  %v8978_v26 = vld [vmem:[#allocation11 + $0x1b0] sm:$0xf0]  ;;  %v10454_v29 = vld [vmem:[#allocation11 + $0x44] sm:$0xf] }
 0x359   :  { %v8981_v63 = vor.u32 %v10498_v36, %v8978_v26  ;;  %v8802_v6 = vld [vmem:[#allocation11 + $0x50] sm:$0xf0]  ;;  %v10482_v36 = vld [vmem:[#allocation11 + $0x124] sm:$0xf] }
 0x35a   :  { %5958 = vmatpush.bf16.msrb.mxu1 %v9441_v58  ;;  %v10696_v58 = vld [vmem:[#allocation11 + $0x7cc] sm:$0xf0]  ;;  %v8914_v26 = vld [vmem:[#allocation11 + $0x130] sm:$0xf0] }
 0x35b   :  { %v9761_v60 = vor.u32 %v10696_v58, %v9760_v56  ;;  %v9696_v56 = vld [vmem:[#allocation11 + $0x740] sm:$0xf]  ;;  %v10680_v58 = vld [vmem:[#allocation11 + $0x74c] sm:$0xf0]  ;;  %v8917_v2 = vor.u32 %v10482_v36, %v8914_v26  ;;  %v9362_v36 = vld [vmem:[#allocation11 + $0x4b0] sm:$0xf0] }
 0x35c   :  { %5970 = vmatpush.bf16.msrb.mxu2 %v9585_v57  ;;  %5946 = vmatpush.bf16.msrb.mxu0 %v9297_v12  ;;  %v9122_v57 = vld [vmem:[#allocation11 + $0x2d0] sm:$0xf0]  ;;  %v4128_v12 = vadd.f32 %v11278_v45, %v924_v33  ;;  %v9109_v45 = vor.u32 %v10530_v5, %v9106_v7  ;;  %v10634_v5 = vld [vmem:[#allocation11 + $0x5e4] sm:$0xf]  ;;  %v9680_v7 = vld [vmem:[#allocation11 + $0x720] sm:$0xf] }
 0x35d   :  { %v9125_v49 = vor.u32 %v10534_v25, %v9122_v57  ;;  %5980 = vmatpush.bf16.msrb.mxu3 %v9761_v60  ;;  %v9074_v33 = vld [vmem:[#allocation11 + $0x270] sm:$0xf0]  ;;  %v10518_v25 = vld [vmem:[#allocation11 + $0x244] sm:$0xf]  ;;  %v9697_v60 = vor.u32 %v10680_v58, %v9696_v56 }
 0x35e   :  { %5959 = vmatpush.bf16.msrb.mxu1 %v9425_v4  ;;  %v9744_v4 = vld [vmem:[#allocation11 + $0x7a0] sm:$0xf]  ;;  %v4141_v18 = vadd.f32 %v11280_v41, %v4128_v12  ;;  %v10486_v41 = vld [vmem:[#allocation11 + $0x144] sm:$0xf]  ;;  %v9058_v57 = vld [vmem:[#allocation11 + $0x250] sm:$0xf0] }
 0x35f   :  { %v8898_v12 = vld [vmem:[#allocation11 + $0x110] sm:$0xf0]  ;;  %v10566_v58 = vld [vmem:[#allocation11 + $0x3c4] sm:$0xf] }
 0x360   :  { %5971 = vmatpush.bf16.msrb.mxu2 %v9569_v9  ;;  %5947 = vmatpush.bf16.msrb.mxu0 %v9281_v19  ;;  %v9745_v9 = vor.u32 %v10692_v24, %v9744_v4  ;;  %v8946_v19 = vld [vmem:[#allocation11 + $0x170] sm:$0xf0]  ;;  %v9061_v24 = vor.u32 %v10518_v25, %v9058_v57  ;;  %v8901_v43 = vor.u32 %v10478_v0, %v8898_v12  ;;  %v10662_v57 = vld [vmem:[#allocation11 + $0x6c4] sm:$0xf] }
 0x361   :  { %v8949_v1 = vor.u32 %v10490_v39, %v8946_v19  ;;  %v9490_v56 = vld [vmem:[#allocation11 + $0x5b0] sm:$0xf0] }
 0x362   :  { %5960 = vmatpush.bf16.msrb.mxu1 %v9409_v52  ;;  %5981 = vmatpush.bf16.msrb.mxu3 %v9745_v9  ;;  %v4179_v52 = vpop.f32.mrf.mxu0  ;;  %v10676_v9 = vld [vmem:[#allocation11 + $0x72c] sm:$0xf0]  ;;  %v9346_v0 = vld [vmem:[#allocation11 + $0x490] sm:$0xf0] }
 0x363   :  { %5948 = vmatmul.bf16.vlgmr.msrb.gmra.mxu0 %v11290_v53  ;;  %v9681_v39 = vor.u32 %v10676_v9, %v9680_v7 }
 0x364   :  { %5992 = vmatpush.bf16.msra.mxu0 %v8885_v21  ;;  %5972 = vmatpush.bf16.msrb.mxu2 %v9553_v14  ;;  %v10526_v21 = vld [vmem:[#allocation11 + $0x284] sm:$0xf]  ;;  %v4192_v14 = vpop.f32.mrf.mxu1 }
 0x365   :  { %5961 = vmatmul.bf16.vlgmr.msrb.gmra.mxu1 %v11293_v50  ;;  %v9093_v38 = vor.u32 %v10526_v21, %v9090_v22  ;;  %v9378_v21 = vld [vmem:[#allocation11 + $0x4d0] sm:$0xf0]  ;;  %v10630_v22 = vld [vmem:[#allocation11 + $0x5c4] sm:$0xf] }
 0x366   :  { %6005 = vmatpush.bf16.msra.mxu1 %v9013_v34  ;;  %v4154_v34 = vadd.f32 %v11285_v15, %v4141_v18  ;;  %5982 = vmatpush.bf16.msrb.mxu3 %v9729_v23  ;;  %v8805_v15 = vor.u32 %v10454_v29, %v8802_v6  ;;  %v9506_v23 = vld [vmem:[#allocation11 + $0x5d0] sm:$0xf0]  ;;  %v9664_v29 = vld [vmem:[#allocation11 + $0x700] sm:$0xf]  ;;  %v10672_v6 = vld [vmem:[#allocation11 + $0x70c] sm:$0xf0] }
 0x368   :  { %5993 = vmatpush.bf16.msra.mxu0 %v8869_v48  ;;  %5973 = vmatpush.bf16.msrb.mxu2 %v9537_v30  ;;  %v9713_v48 = vor.u32 %v10684_v32, %v9712_v42  ;;  %v8933_v30 = vor.u32 %v10486_v41, %v8930_v40  ;;  %v9026_v41 = vld [vmem:[#allocation11 + $0x210] sm:$0xf0]  ;;  %v10570_v40 = vld [vmem:[#allocation11 + $0x3e4] sm:$0xf] }
 0x369   :  { %v9266_v42 = vld [vmem:[#allocation11 + $0x3f0] sm:$0xf0] }
 0x36a   :  { %6006 = vmatpush.bf16.msra.mxu1 %v8997_v46  ;;  %v4167_v46 = vadd.f32 %v11287_v51, %v4154_v34  ;;  %5983 = vmatpush.bf16.msrb.mxu3 %v9713_v48  ;;  %v4181_v16 = vpop.f32.mrf.mxu0  ;;  %v8789_v51 = vor.u32 %v10450_v55, %v8786_v54  ;;  %v9381_v48 = vor.u32 %v10598_v35, %v9378_v21  ;;  %v10594_v54 = vld [vmem:[#allocation11 + $0x4a4] sm:$0xf] }
 0x36b   :  { %v9250_v16 = vld [vmem:[#allocation11 + $0x3d0] sm:$0xf0] }
 0x36c   :  { %6018 = vmatpush.bf16.msra.mxu2 %v9141_v44  ;;  %5994 = vmatpush.bf16.msra.mxu0 %v8853_v62  ;;  %v4180_v37 = vadd.f32 %v4179_v52, %v4167_v46  ;;  %v9077_v44 = vor.u32 %v10522_v47, %v9074_v33  ;;  %v4194_v62 = vpop.f32.mrf.mxu1  ;;  %v10666_v47 = vld [vmem:[#allocation11 + $0x6e4] sm:$0xf]  ;;  %v9650_v33 = vld [vmem:[#allocation11 + $0x6f0] sm:$0xf0]  ;;  %v9269_v46 = vor.u32 %v10570_v40, %v9266_v42 }
 0x36d   :  { %v9653_v26 = vor.u32 %v10666_v47, %v9650_v33  ;;  %v9365_v62 = vor.u32 %v10594_v54, %v9362_v36  ;;  %v10650_v40 = vld [vmem:[#allocation11 + $0x664] sm:$0xf]  ;;  %v9586_v42 = vld [vmem:[#allocation11 + $0x670] sm:$0xf0] }
 0x36e   :  { %6007 = vmatpush.bf16.msra.mxu1 %v8981_v63  ;;  %v10446_v63 = vld [vmem:[#allocation11 + $0x4] sm:$0xf]  ;;  %v4193_v4 = vadd.f32 %v4192_v14, %v4180_v37  ;;  %5984 = vmatpush.bf16.msrb.mxu3 %v9697_v60  ;;  %v9634_v60 = vld [vmem:[#allocation11 + $0x6d0] sm:$0xf0] }
 0x36f   :  { %v8773_v19 = vor.u32 %v10446_v63, %v8770_v28  ;;  %v10626_v37 = vld [vmem:[#allocation11 + $0x5a4] sm:$0xf]  ;;  %v9637_v12 = vor.u32 %v10662_v57, %v9634_v60  ;;  %v9426_v54 = vld [vmem:[#allocation11 + $0x530] sm:$0xf0] }
 0x370   :  { %6019 = vmatpush.bf16.msra.mxu2 %v9125_v49  ;;  %5995 = vmatpush.bf16.msra.mxu0 %v8837_v10  ;;  %v10602_v49 = vld [vmem:[#allocation11 + $0x4e4] sm:$0xf]  ;;  %v4205_v10 = vpop.f32.mrf.mxu2  ;;  %v9493_v63 = vor.u32 %v10626_v37, %v9490_v56  ;;  %v9186_v37 = vld [vmem:[#allocation11 + $0x350] sm:$0xf0] }
 0x371   :  { %v4206_v18 = vadd.f32 %v4205_v10, %v4193_v4  ;;  %v9397_v52 = vor.u32 %v10602_v49, %v9394_v3  ;;  %v10590_v28 = vld [vmem:[#allocation11 + $0x484] sm:$0xf]  ;;  %v9474_v49 = vld [vmem:[#allocation11 + $0x590] sm:$0xf0] }
 0x372   :  { %6008 = vmatpush.bf16.msra.mxu1 %v8965_v11  ;;  %v9522_v11 = vld [vmem:[#allocation11 + $0x5f0] sm:$0xf0]  ;;  %5985 = vmatpush.bf16.msrb.mxu3 %v9681_v39  ;;  %v10562_v3 = vld [vmem:[#allocation11 + $0x3a4] sm:$0xf]  ;;  %v9349_v7 = vor.u32 %v10590_v28, %v9346_v0  ;;  %v11306_v35 = vpop.f32.mrf.mxu0  ;;  %v8888_v28 = vld [vmem:[#allocation11 + $0xe8] sm:$0xf] }
 0x373   :  { %v9525_v14 = vor.u32 %v10634_v5, %v9522_v11  ;;  %v9234_v4 = vld [vmem:[#allocation11 + $0x3b0] sm:$0xf0]  ;;  %v10586_v11 = vld [vmem:[#allocation11 + $0x464] sm:$0xf]  ;;  %v10477_v0 = vld [vmem:[#allocation11 + $0xf4] sm:$0xf0] }
 0x374   :  { %6020 = vmatpush.bf16.msra.mxu2 %v9109_v45  ;;  %5996 = vmatpush.bf16.msra.mxu0 %v8821_v27  ;;  %v4218_v45 = vpop.f32.mrf.mxu3  ;;  %v9045_v27 = vor.u32 %v10514_v13, %v9042_v17  ;;  %v9618_v5 = vld [vmem:[#allocation11 + $0x6b0] sm:$0xf0]  ;;  %v9237_v9 = vor.u32 %v10562_v3, %v9234_v4  ;;  %v10618_v17 = vld [vmem:[#allocation11 + $0x564] sm:$0xf]  ;;  %v11308_v21 = vpop.f32.mrf.mxu1 }
 0x375   :  { %v4219_v34 = vadd.f32 %v4218_v45, %v4206_v18  ;;  %v9330_v13 = vld [vmem:[#allocation11 + $0x470] sm:$0xf0]  ;;  %v10558_v45 = vld [vmem:[#allocation11 + $0x384] sm:$0xf] }
 0x376   :  { %6009 = vmatpush.bf16.msra.mxu1 %v8949_v1  ;;  %v10510_v1 = vld [vmem:[#allocation11 + $0x204] sm:$0xf]  ;;  %v9458_v18 = vld [vmem:[#allocation11 + $0x570] sm:$0xf0] }
 0x377   :  { %v4332_v32 = vmax.f32 %v4219_v34, 0.0  ;;  %v9029_v55 = vor.u32 %v10510_v1, %v9026_v41  ;;  %v9461_v34 = vor.u32 %v10618_v17, %v9458_v18  ;;  %v10614_v1 = vld [vmem:[#allocation11 + $0x544] sm:$0xf]  ;;  %v9570_v56 = vld [vmem:[#allocation11 + $0x650] sm:$0xf0]  ;;  %v8889_v17 = vor.u32 %v10477_v0, %v8888_v28 }
 0x378   :  { %6021 = vmatpush.bf16.msra.mxu2 %v9093_v38  ;;  %5997 = vmatpush.bf16.msra.mxu0 %v8805_v15  ;;  %v9665_v38 = vor.u32 %v10672_v6, %v9664_v29  ;;  %v9442_v6 = vld [vmem:[#allocation11 + $0x550] sm:$0xf0]  ;;  %v10554_v41 = vld [vmem:[#allocation11 + $0x364] sm:$0xf]  ;;  %v10473_v18 = vld [vmem:[#allocation11 + $0xd4] sm:$0xf0] }
 0x379   :  { %v11301_v15 = vpack.c.bf16 %v4332_v32, %v4332_v32  ;;  %v9445_v33 = vor.u32 %v10614_v1, %v9442_v6  ;;  %v10550_v36 = vld [vmem:[#allocation11 + $0x344] sm:$0xf]  ;;  %v9282_v57 = vld [vmem:[#allocation11 + $0x410] sm:$0xf0]  ;;  %v10541_v1 = vld [vmem:[#allocation11 + $0x2f4] sm:$0xf0] }
 0x37a   :  { %6010 = vmatpush.bf16.msra.mxu1 %v8933_v30  ;;  %v9509_v30 = vor.u32 %v10630_v22, %v9506_v23  ;;  %5986 = vmatpush.bf16.msrb.mxu3 %v9665_v38  ;;  %v9333_v22 = vor.u32 %v10586_v11, %v9330_v13  ;;  %v9202_v38 = vld [vmem:[#allocation11 + $0x370] sm:$0xf0]  ;;  %v10606_v60 = vld [vmem:[#allocation11 + $0x504] sm:$0xf] }
 0x37b   :  { %5974 = vmatmul.bf16.vlgmr.msrb.gmra.mxu2 %v11301_v15  ;;  %v9205_v47 = vor.u32 %v10554_v41, %v9202_v38  ;;  %v9170_v3 = vld [vmem:[#allocation11 + $0x330] sm:$0xf0] }
 0x37c   :  { %6022 = vmatpush.bf16.msra.mxu2 %v9077_v44  ;;  %5998 = vmatpush.bf16.msra.mxu0 %v8789_v51  ;;  %v4207_v44 = vpop.f32.mrf.mxu2  ;;  %v4220_v25 = vpop.f32.mrf.mxu3  ;;  %v9253_v51 = vor.u32 %v10566_v58, %v9250_v16 }
 0x37d   :  { %v4233_v44 = vpop.f32.mrf.mxu0  ;;  %v4246_v58 = vpop.f32.mrf.mxu1  ;;  %v10574_v25 = vld [vmem:[#allocation11 + $0x404] sm:$0xf] }
 0x37e   :  { %6011 = vmatpush.bf16.msra.mxu1 %v8917_v2  ;;  %6031 = vmatpush.bf16.msra.mxu3 %v9269_v46  ;;  %v10622_v2 = vld [vmem:[#allocation11 + $0x584] sm:$0xf]  ;;  %v9298_v46 = vld [vmem:[#allocation11 + $0x430] sm:$0xf0]  ;;  %v8840_v44 = vld [vmem:[#allocation11 + $0x88] sm:$0xf] }
 0x37f   :  { %v9477_v10 = vor.u32 %v10622_v2, %v9474_v49  ;;  %v10546_v49 = vld [vmem:[#allocation11 + $0x324] sm:$0xf]  ;;  %v8968_v58 = vld [vmem:[#allocation11 + $0x188] sm:$0xf] }
 0x380   :  { %6023 = vmatpush.bf16.msra.mxu2 %v9061_v24  ;;  %5999 = vmatpush.bf16.msra.mxu0 %v8773_v19  ;;  %v10658_v24 = vld [vmem:[#allocation11 + $0x6a4] sm:$0xf]  ;;  %v9218_v19 = vld [vmem:[#allocation11 + $0x390] sm:$0xf0]  ;;  %v9173_v11 = vor.u32 %v10546_v49, %v9170_v3  ;;  %v9096_v49 = vld [vmem:[#allocation11 + $0x288] sm:$0xf] }
 0x381   :  { %v9621_v39 = vor.u32 %v10658_v24, %v9618_v5  ;;  %v9221_v23 = vor.u32 %v10558_v45, %v9218_v19  ;;  %v10509_v24 = vld [vmem:[#allocation11 + $0x1f4] sm:$0xf0]  ;;  %v10642_v5 = vld [vmem:[#allocation11 + $0x624] sm:$0xf] }
 0x382   :  { %6012 = vmatpush.bf16.msra.mxu1 %v8901_v43  ;;  %6032 = vmatpush.bf16.msra.mxu3 %v9253_v51  ;;  %v10654_v43 = vld [vmem:[#allocation11 + $0x684] sm:$0xf]  ;;  %v10529_v3 = vld [vmem:[#allocation11 + $0x294] sm:$0xf0] }
 0x383   :  { %6000 = vmatmul.bf16.vlgmr.msra.gmra.mxu0 %v11260_v59 }
 0x384   :  { %6044 = vmatpush.bf16.msrb.mxu0 %v9397_v52  ;;  %6024 = vmatpush.bf16.msra.mxu2 %v9045_v27  ;;  %v9602_v52 = vld [vmem:[#allocation11 + $0x690] sm:$0xf0]  ;;  %v11311_v4 = vpop.f32.mrf.mxu2 }
 0x385   :  { %6013 = vmatmul.bf16.vlgmr.msra.gmra.mxu1 %v11262_v61  ;;  %v9314_v27 = vld [vmem:[#allocation11 + $0x450] sm:$0xf0]  ;;  %v9605_v29 = vor.u32 %v10654_v43, %v9602_v52  ;;  %v9000_v43 = vld [vmem:[#allocation11 + $0x1c8] sm:$0xf]  ;;  %v10542_v52 = vld [vmem:[#allocation11 + $0x304] sm:$0xf] }
 0x386   :  { %6057 = vmatpush.bf16.msrb.mxu1 %v9525_v14  ;;  %6033 = vmatpush.bf16.msra.mxu3 %v9237_v9  ;;  %v10582_v14 = vld [vmem:[#allocation11 + $0x444] sm:$0xf]  ;;  %v11313_v9 = vpop.f32.mrf.mxu3 }
 0x387   :  { %v9317_v32 = vor.u32 %v10582_v14, %v9314_v27  ;;  %v9538_v14 = vld [vmem:[#allocation11 + $0x610] sm:$0xf0]  ;;  %v9144_v27 = vld [vmem:[#allocation11 + $0x2e8] sm:$0xf] }
 0x388   :  { %6045 = vmatpush.bf16.msrb.mxu0 %v9381_v48  ;;  %6025 = vmatpush.bf16.msra.mxu2 %v9029_v55  ;;  %v10578_v48 = vld [vmem:[#allocation11 + $0x424] sm:$0xf]  ;;  %v9589_v55 = vor.u32 %v10650_v40, %v9586_v42  ;;  %v8856_v40 = vld [vmem:[#allocation11 + $0xa8] sm:$0xf]  ;;  %v10469_v42 = vld [vmem:[#allocation11 + $0xb4] sm:$0xf0] }
 0x389   :  { %v9301_v16 = vor.u32 %v10578_v48, %v9298_v46  ;;  %v8984_v48 = vld [vmem:[#allocation11 + $0x1a8] sm:$0xf]  ;;  %v10501_v46 = vld [vmem:[#allocation11 + $0x1b4] sm:$0xf0] }
 0x38a   :  { %6058 = vmatpush.bf16.msrb.mxu1 %v9509_v30  ;;  %6034 = vmatpush.bf16.msra.mxu3 %v9221_v23  ;;  %v10610_v30 = vld [vmem:[#allocation11 + $0x524] sm:$0xf]  ;;  %v10505_v23 = vld [vmem:[#allocation11 + $0x1d4] sm:$0xf0] }
 0x38b   :  { %6026 = vmatmul.bf16.vlgmr.msra.gmra.mxu2 %v11270_v20  ;;  %v9429_v51 = vor.u32 %v10610_v30, %v9426_v54  ;;  %v9001_v41 = vor.u32 %v10505_v23, %v9000_v43  ;;  %v10537_v54 = vld [vmem:[#allocation11 + $0x2d4] sm:$0xf0] }
 0x38c   :  { %6070 = vmatpush.bf16.msrb.mxu2 %v9653_v26  ;;  %6046 = vmatpush.bf16.msrb.mxu0 %v9365_v62  ;;  %v10646_v26 = vld [vmem:[#allocation11 + $0x644] sm:$0xf]  ;;  %v9189_v62 = vor.u32 %v10550_v36, %v9186_v37  ;;  %v8857_v36 = vor.u32 %v10469_v42, %v8856_v40  ;;  %v8985_v37 = vor.u32 %v10501_v46, %v8984_v48  ;;  %v8776_v40 = vld [vmem:[#allocation11 + $0x8] sm:$0xf]  ;;  %v10449_v42 = vld [vmem:[#allocation11 + $0x14] sm:$0xf0] }
 0x38d   :  { %v9573_v2 = vor.u32 %v10646_v26, %v9570_v56  ;;  %v10465_v26 = vld [vmem:[#allocation11 + $0x94] sm:$0xf0]  ;;  %v9400_v46 = vld [vmem:[#allocation11 + $0x4e8] sm:$0xf] }
 0x38e   :  { %6059 = vmatpush.bf16.msrb.mxu1 %v9493_v63  ;;  %6035 = vmatpush.bf16.msra.mxu3 %v9205_v47  ;;  %v9410_v63 = vld [vmem:[#allocation11 + $0x510] sm:$0xf0]  ;;  %v4259_v47 = vpop.f32.mrf.mxu2  ;;  %v4272_v30 = vpop.f32.mrf.mxu3 }
 0x38f   :  { %v9413_v13 = vor.u32 %v10606_v60, %v9410_v63  ;;  %v8841_v60 = vor.u32 %v10465_v26, %v8840_v44  ;;  %v10461_v63 = vld [vmem:[#allocation11 + $0x74] sm:$0xf0] }
 0x390   :  { %6071 = vmatpush.bf16.msrb.mxu2 %v9637_v12  ;;  %6047 = vmatpush.bf16.msrb.mxu0 %v9349_v7  ;;  %v9016_v12 = vld [vmem:[#allocation11 + $0x1e8] sm:$0xf]  ;;  %v9554_v7 = vld [vmem:[#allocation11 + $0x630] sm:$0xf0]  ;;  %v10481_v47 = vld [vmem:[#allocation11 + $0x114] sm:$0xf0] }
 0x391   :  { %v9017_v45 = vor.u32 %v10509_v24, %v9016_v12  ;;  %v9557_v19 = vor.u32 %v10642_v5, %v9554_v7  ;;  %v10605_v30 = vld [vmem:[#allocation11 + $0x4f4] sm:$0xf0] }
 0x392   :  { %6060 = vmatpush.bf16.msrb.mxu1 %v9477_v10  ;;  %v9285_v10 = vor.u32 %v10574_v25, %v9282_v57  ;;  %6036 = vmatpush.bf16.msra.mxu3 %v9189_v62  ;;  %v9112_v25 = vld [vmem:[#allocation11 + $0x2a8] sm:$0xf]  ;;  %v10533_v57 = vld [vmem:[#allocation11 + $0x2b4] sm:$0xf0] }
 0x393   :  { %v9113_v0 = vor.u32 %v10533_v57, %v9112_v25  ;;  %v10517_v44 = vld [vmem:[#allocation11 + $0x234] sm:$0xf0]  ;;  %v10698_v25 = vld [vmem:[#allocation11 + $0x7e4] sm:$0xf]  ;;  %v9778_v57 = vld [vmem:[#allocation11 + $0x7f0] sm:$0xf0] }
 0x394   :  { %6072 = vmatpush.bf16.msrb.mxu2 %v9621_v39  ;;  %6048 = vmatpush.bf16.msrb.mxu0 %v9333_v22  ;;  %v8872_v39 = vld [vmem:[#allocation11 + $0xc8] sm:$0xf]  ;;  %v9154_v22 = vld [vmem:[#allocation11 + $0x310] sm:$0xf0] }
 0x395   :  { %v8873_v6 = vor.u32 %v10473_v18, %v8872_v39  ;;  %v8936_v39 = vld [vmem:[#allocation11 + $0x148] sm:$0xf] }
 0x396   :  { %6061 = vmatpush.bf16.msrb.mxu1 %v9461_v34  ;;  %v10638_v34 = vld [vmem:[#allocation11 + $0x604] sm:$0xf]  ;;  %6037 = vmatpush.bf16.msra.mxu3 %v9173_v11  ;;  %v8808_v11 = vld [vmem:[#allocation11 + $0x48] sm:$0xf] }
 0x397   :  { %v9541_v38 = vor.u32 %v10638_v34, %v9538_v14  ;;  %v9080_v18 = vld [vmem:[#allocation11 + $0x268] sm:$0xf] }
 0x398   :  { %6073 = vmatpush.bf16.msrb.mxu2 %v9605_v29  ;;  %6049 = vmatpush.bf16.msrb.mxu0 %v9317_v32  ;;  %v9157_v29 = vor.u32 %v10542_v52, %v9154_v22  ;;  %v925_v32 = vperm.slane %v11252_v31, 7  ;;  %v10453_v22 = vld [vmem:[#allocation11 + $0x34] sm:$0xf0]  ;;  %v8920_v14 = vld [vmem:[#allocation11 + $0x128] sm:$0xf] }
 0x39a   :  { %6062 = vmatpush.bf16.msrb.mxu1 %v9445_v33  ;;  %v9145_v33 = vor.u32 %v10541_v1, %v9144_v27  ;;  %6038 = vmatpush.bf16.msra.mxu3 %v9157_v29  ;;  %v4232_v31 = vadd.f32 %v11306_v35, %v925_v32  ;;  %v10493_v35 = vld [vmem:[#allocation11 + $0x174] sm:$0xf0]  ;;  %v9064_v29 = vld [vmem:[#allocation11 + $0x248] sm:$0xf] }
 0x39b   :  { %v10485_v27 = vld [vmem:[#allocation11 + $0x134] sm:$0xf0]  ;;  %v8904_v32 = vld [vmem:[#allocation11 + $0x108] sm:$0xf] }
 0x39c   :  { %6074 = vmatpush.bf16.msrb.mxu2 %v9589_v55  ;;  %6050 = vmatpush.bf16.msrb.mxu0 %v9301_v16  ;;  %v9128_v55 = vld [vmem:[#allocation11 + $0x2c8] sm:$0xf]  ;;  %v10497_v16 = vld [vmem:[#allocation11 + $0x194] sm:$0xf0]  ;;  %v4245_v28 = vadd.f32 %v11308_v21, %v4232_v31 }
 0x39d   :  { %v9129_v56 = vor.u32 %v10537_v54, %v9128_v55  ;;  %v8969_v62 = vor.u32 %v10497_v16, %v8968_v58  ;;  %v10489_v21 = vld [vmem:[#allocation11 + $0x154] sm:$0xf0]  ;;  %v9528_v55 = vld [vmem:[#allocation11 + $0x5e8] sm:$0xf]  ;;  %v8905_v58 = vor.u32 %v10481_v47, %v8904_v32  ;;  %v9401_v16 = vor.u32 %v10605_v30, %v9400_v46 }
 0x39e   :  { %6063 = vmatpush.bf16.msrb.mxu1 %v9429_v51  ;;  %v8824_v51 = vld [vmem:[#allocation11 + $0x68] sm:$0xf]  ;;  %v4258_v24 = vadd.f32 %v11311_v4, %v4245_v28  ;;  %v8937_v52 = vor.u32 %v10489_v21, %v8936_v39  ;;  %v10601_v28 = vld [vmem:[#allocation11 + $0x4d4] sm:$0xf0]  ;;  %v9762_v39 = vld [vmem:[#allocation11 + $0x7d0] sm:$0xf0] }
 0x39f   :  { %v8825_v7 = vor.u32 %v10461_v63, %v8824_v51  ;;  %v8792_v4 = vld [vmem:[#allocation11 + $0x28] sm:$0xf]  ;;  %v10661_v47 = vld [vmem:[#allocation11 + $0x6b4] sm:$0xf0] }
 0x3a0   :  { %6075 = vmatpush.bf16.msrb.mxu2 %v9573_v2  ;;  %6051 = vmatpush.bf16.msrb.mxu0 %v9285_v10  ;;  %v8952_v2 = vld [vmem:[#allocation11 + $0x168] sm:$0xf]  ;;  %v4283_v12 = vpop.f32.mrf.mxu0 }
 0x3a1   :  { %v8953_v10 = vor.u32 %v10493_v35, %v8952_v2  ;;  %v9384_v63 = vld [vmem:[#allocation11 + $0x4c8] sm:$0xf]  ;;  %v10633_v2 = vld [vmem:[#allocation11 + $0x5d4] sm:$0xf0] }
 0x3a2   :  { %6064 = vmatpush.bf16.msrb.mxu1 %v9413_v13  ;;  %v4296_v5 = vpop.f32.mrf.mxu1  ;;  %v10457_v13 = vld [vmem:[#allocation11 + $0x54] sm:$0xf0]  ;;  %v9032_v35 = vld [vmem:[#allocation11 + $0x208] sm:$0xf] }
 0x3a3   :  { %6052 = vmatmul.bf16.vlgmr.msrb.gmra.mxu0 %v11290_v53  ;;  %v8809_v43 = vor.u32 %v10457_v13, %v8808_v11  ;;  %v9368_v21 = vld [vmem:[#allocation11 + $0x4a8] sm:$0xf] }
 0x3a4   :  { %6096 = vmatpush.bf16.msra.mxu0 %v8889_v17  ;;  %6076 = vmatpush.bf16.msrb.mxu2 %v9557_v19  ;;  %v9097_v17 = vor.u32 %v10529_v3, %v9096_v49  ;;  %v4271_v19 = vadd.f32 %v11313_v9, %v4258_v24  ;;  %v8921_v9 = vor.u32 %v10485_v27, %v8920_v14  ;;  %v9656_v3 = vld [vmem:[#allocation11 + $0x6e8] sm:$0xf]  ;;  %v10669_v24 = vld [vmem:[#allocation11 + $0x6f4] sm:$0xf0]  ;;  %v10690_v14 = vld [vmem:[#allocation11 + $0x7a4] sm:$0xf] }
 0x3a5   :  { %6065 = vmatmul.bf16.vlgmr.msrb.gmra.mxu1 %v11293_v50  ;;  %v9624_v32 = vld [vmem:[#allocation11 + $0x6a8] sm:$0xf] }
 0x3a6   :  { %6109 = vmatpush.bf16.msra.mxu1 %v9017_v45  ;;  %v10525_v45 = vld [vmem:[#allocation11 + $0x274] sm:$0xf0]  ;;  %v4284_v23 = vadd.f32 %v4283_v12, %v4271_v19 }
 0x3a7   :  { %v9081_v34 = vor.u32 %v10525_v45, %v9080_v18  ;;  %v10513_v12 = vld [vmem:[#allocation11 + $0x214] sm:$0xf0]  ;;  %v9657_v45 = vor.u32 %v10669_v24, %v9656_v3  ;;  %v9592_v24 = vld [vmem:[#allocation11 + $0x668] sm:$0xf] }
 0x3a8   :  { %6097 = vmatpush.bf16.msra.mxu0 %v8873_v6  ;;  %6077 = vmatpush.bf16.msrb.mxu2 %v9541_v38  ;;  %v4285_v1 = vpop.f32.mrf.mxu0  ;;  %v10521_v6 = vld [vmem:[#allocation11 + $0x254] sm:$0xf0]  ;;  %v8793_v38 = vor.u32 %v10453_v22, %v8792_v4  ;;  %v9033_v13 = vor.u32 %v10513_v12, %v9032_v35  ;;  %v9640_v22 = vld [vmem:[#allocation11 + $0x6c8] sm:$0xf] }
 0x3a9   :  { %v9065_v48 = vor.u32 %v10521_v6, %v9064_v29  ;;  %v10597_v19 = vld [vmem:[#allocation11 + $0x4b4] sm:$0xf0]  ;;  %v11328_v29 = vld [vmem:[#allocation13] sm:$0xf]  ;;  %v9746_v6 = vld [vmem:[#allocation11 + $0x7b0] sm:$0xf0] }
 0x3aa   :  { %6110 = vmatpush.bf16.msra.mxu1 %v9001_v41  ;;  %v4298_v41 = vpop.f32.mrf.mxu1  ;;  %v9369_v27 = vor.u32 %v10597_v19, %v9368_v21  ;;  %v10585_v12 = vld [vmem:[#allocation11 + $0x454] sm:$0xf0]  ;;  %v9304_v21 = vld [vmem:[#allocation11 + $0x428] sm:$0xf] }
 0x3ab   :  { %6078 = vmatmul.bf16.vlgmr.msrb.gmra.mxu2 %v11301_v15  ;;  %v9352_v41 = vld [vmem:[#allocation11 + $0x488] sm:$0xf]  ;;  %v10617_v3 = vld [vmem:[#allocation11 + $0x554] sm:$0xf0] }
 0x3ac   :  { %6122 = vmatpush.bf16.msra.mxu2 %v9145_v33  ;;  %6098 = vmatpush.bf16.msra.mxu0 %v8857_v36  ;;  %v4297_v33 = vadd.f32 %v4296_v5, %v4284_v23  ;;  %v10637_v36 = vld [vmem:[#allocation11 + $0x5f4] sm:$0xf0]  ;;  %v9781_v5 = vor.u32 %v10698_v25, %v9778_v57  ;;  %v9432_v19 = vld [vmem:[#allocation11 + $0x528] sm:$0xf] }
 0x3ad   :  { %v10665_v23 = vld [vmem:[#allocation11 + $0x6d4] sm:$0xf0] }
 0x3ae   :  { %6111 = vmatpush.bf16.msra.mxu1 %v8985_v37  ;;  %v4309_v54 = vpop.f32.mrf.mxu2  ;;  %v9048_v37 = vld [vmem:[#allocation11 + $0x228] sm:$0xf] }
 0x3af   :  { %v4310_v26 = vadd.f32 %v4309_v54, %v4297_v33  ;;  %v9049_v51 = vor.u32 %v10517_v44, %v9048_v37  ;;  %v4600_v33 = vperm.slane %v11328_v29, 0  ;;  %v9730_v54 = vld [vmem:[#allocation11 + $0x790] sm:$0xf0]  ;;  %v9625_v37 = vor.u32 %v10661_v47, %v9624_v32  ;;  %v10589_v44 = vld [vmem:[#allocation11 + $0x474] sm:$0xf0] }
 0x3b0   :  { %6123 = vmatpush.bf16.msra.mxu2 %v9129_v56  ;;  %6099 = vmatpush.bf16.msra.mxu0 %v8841_v60  ;;  %v4322_v31 = vpop.f32.mrf.mxu3  ;;  %v8777_v56 = vor.u32 %v10449_v42, %v8776_v40  ;;  %v10593_v40 = vld [vmem:[#allocation11 + $0x494] sm:$0xf0]  ;;  %v10475_v32 = vld [vmem:[#allocation11 + $0xec] sm:$0xf] }
 0x3b1   :  { %v4323_v60 = vadd.f32 %v4322_v31, %v4310_v26  ;;  %v10625_v42 = vld [vmem:[#allocation11 + $0x594] sm:$0xf0]  ;;  %v9353_v46 = vor.u32 %v10593_v40, %v9352_v41  ;;  %v9464_v26 = vld [vmem:[#allocation11 + $0x568] sm:$0xf] }
 0x3b2   :  { %6112 = vmatpush.bf16.msra.mxu1 %v8969_v62  ;;  %v9529_v62 = vor.u32 %v10637_v36, %v9528_v55  ;;  %v10686_v55 = vld [vmem:[#allocation11 + $0x784] sm:$0xf]  ;;  %v9336_v36 = vld [vmem:[#allocation11 + $0x468] sm:$0xf]  ;;  %v10621_v31 = vld [vmem:[#allocation11 + $0x574] sm:$0xf0] }
 0x3b3   :  { %v4333_v49 = vmax.f32 %v4323_v60, 0.0  ;;  %v9733_v60 = vor.u32 %v10686_v55, %v9730_v54  ;;  %v9288_v41 = vld [vmem:[#allocation11 + $0x408] sm:$0xf] }
 0x3b4   :  { %6124 = vmatpush.bf16.msra.mxu2 %v9113_v0  ;;  %6100 = vmatpush.bf16.msra.mxu0 %v8825_v7  ;;  %v9512_v0 = vld [vmem:[#allocation11 + $0x5c8] sm:$0xf]  ;;  %v9385_v7 = vor.u32 %v10601_v28, %v9384_v63  ;;  %v10682_v63 = vld [vmem:[#allocation11 + $0x764] sm:$0xf]  ;;  %v9714_v28 = vld [vmem:[#allocation11 + $0x770] sm:$0xf0] }
 0x3b5   :  { %v9513_v11 = vor.u32 %v10633_v2, %v9512_v0  ;;  %v9320_v0 = vld [vmem:[#allocation11 + $0x448] sm:$0xf] }
 0x3b6   :  { %6113 = vmatpush.bf16.msra.mxu1 %v8953_v10  ;;  %v11323_v10 = vpack.c.bf16 %v4333_v49, %v4333_v49  ;;  %v4311_v18 = vpop.f32.mrf.mxu2  ;;  %v9448_v49 = vld [vmem:[#allocation11 + $0x548] sm:$0xf] }
 0x3b8   :  { %6125 = vmatpush.bf16.msra.mxu2 %v9097_v17  ;;  %6101 = vmatpush.bf16.msra.mxu0 %v8809_v43  ;;  %v10694_v17 = vld [vmem:[#allocation11 + $0x7c4] sm:$0xf]  ;;  %v9496_v43 = vld [vmem:[#allocation11 + $0x5a8] sm:$0xf]  ;;  %v4324_v4 = vpop.f32.mrf.mxu3 }
 0x3b9   :  { %5987 = vmatmul.bf16.vlgmr.msrb.gmra.mxu3 %v11323_v10  ;;  %v9576_v4 = vld [vmem:[#allocation11 + $0x648] sm:$0xf] }
 0x3ba   :  { %6114 = vmatpush.bf16.msra.mxu1 %v8937_v52  ;;  %v10629_v52 = vld [vmem:[#allocation11 + $0x5b4] sm:$0xf0]  ;;  %6083 = vmatpush.bf16.msrb.mxu3 %v9781_v5 }
 0x3bb   :  { %v9497_v1 = vor.u32 %v10629_v52, %v9496_v43  ;;  %v10653_v5 = vld [vmem:[#allocation11 + $0x674] sm:$0xf0] }
 0x3bc   :  { %6126 = vmatpush.bf16.msra.mxu2 %v9081_v34  ;;  %6102 = vmatpush.bf16.msra.mxu0 %v8793_v38  ;;  %v9765_v34 = vor.u32 %v10694_v17, %v9762_v39  ;;  %v9641_v38 = vor.u32 %v10665_v23, %v9640_v22  ;;  %v10678_v17 = vld [vmem:[#allocation11 + $0x744] sm:$0xf]  ;;  %v9698_v39 = vld [vmem:[#allocation11 + $0x750] sm:$0xf0]  ;;  %v9593_v18 = vor.u32 %v10653_v5, %v9592_v24  ;;  %v10613_v43 = vld [vmem:[#allocation11 + $0x534] sm:$0xf0] }
 0x3bd   :  { %v10649_v22 = vld [vmem:[#allocation11 + $0x654] sm:$0xf0]  ;;  %v9146_v24 = vld [vmem:[#allocation11 + $0x2f8] sm:$0xf0] }
 0x3be   :  { %6115 = vmatpush.bf16.msra.mxu1 %v8921_v9  ;;  %v9480_v9 = vld [vmem:[#allocation11 + $0x588] sm:$0xf]  ;;  %6084 = vmatpush.bf16.msrb.mxu3 %v9765_v34  ;;  %v9701_v34 = vor.u32 %v10678_v17, %v9698_v39  ;;  %v9577_v40 = vor.u32 %v10649_v22, %v9576_v4  ;;  %v10535_v22 = vld [vmem:[#allocation11 + $0x2cc] sm:$0xf] }
 0x3bf   :  { %v9481_v30 = vor.u32 %v10625_v42, %v9480_v9  ;;  %v9416_v9 = vld [vmem:[#allocation11 + $0x508] sm:$0xf]  ;;  %v10609_v42 = vld [vmem:[#allocation11 + $0x514] sm:$0xf0] }
 0x3c0   :  { %6127 = vmatpush.bf16.msra.mxu2 %v9065_v48  ;;  %6103 = vmatpush.bf16.msra.mxu0 %v8777_v56  ;;  %v9749_v48 = vor.u32 %v10690_v14, %v9746_v6  ;;  %v5897_v56 = vpop.f32.mrf.mxu0  ;;  %v10674_v14 = vld [vmem:[#allocation11 + $0x724] sm:$0xf]  ;;  %v9682_v6 = vld [vmem:[#allocation11 + $0x730] sm:$0xf0] }
 0x3c1   :  { %v5898_v25 = vadd.f32 %v5897_v56, %v4600_v33  ;;  %v8890_v33 = vld [vmem:[#allocation11 + $0xf8] sm:$0xf0]  ;;  %v9685_v54 = vor.u32 %v10674_v14, %v9682_v6  ;;  %v9666_v56 = vld [vmem:[#allocation11 + $0x710] sm:$0xf0]  ;;  %v9240_v14 = vld [vmem:[#allocation11 + $0x3a8] sm:$0xf] }
 0x3c2   :  { %6116 = vmatpush.bf16.msra.mxu1 %v8905_v58  ;;  %v9608_v58 = vld [vmem:[#allocation11 + $0x688] sm:$0xf]  ;;  %v5910_v57 = vpop.f32.mrf.mxu1  ;;  %6085 = vmatpush.bf16.msrb.mxu3 %v9749_v48  ;;  %v10507_v48 = vld [vmem:[#allocation11 + $0x1ec] sm:$0xf] }
 0x3c3   :  { %6104 = vmatmul.bf16.vlgmr.msra.gmra.mxu0 %v11260_v59  ;;  %v5911_v2 = vadd.f32 %v5910_v57, %v5898_v25  ;;  %v9272_v57 = vld [vmem:[#allocation11 + $0x3e8] sm:$0xf]  ;;  %v10463_v6 = vld [vmem:[#allocation11 + $0x8c] sm:$0xf] }
 0x3c4   :  { %6148 = vmatpush.bf16.msrb.mxu0 %v9401_v16  ;;  %6128 = vmatpush.bf16.msra.mxu2 %v9049_v51  ;;  %v10657_v16 = vld [vmem:[#allocation11 + $0x694] sm:$0xf0]  ;;  %v9465_v51 = vor.u32 %v10621_v31, %v9464_v26  ;;  %v9417_v26 = vor.u32 %v10609_v42, %v9416_v9  ;;  %v10670_v31 = vld [vmem:[#allocation11 + $0x704] sm:$0xf]  ;;  %v8970_v9 = vld [vmem:[#allocation11 + $0x198] sm:$0xf0] }
 0x3c5   :  { %6117 = vmatmul.bf16.vlgmr.msra.gmra.mxu1 %v11262_v61  ;;  %v9609_v35 = vor.u32 %v10657_v16, %v9608_v58  ;;  %v8893_v16 = vor.u32 %v10475_v32, %v8890_v33  ;;  %v10531_v32 = vld [vmem:[#allocation11 + $0x2ac] sm:$0xf] }
 0x3c6   :  { %6161 = vmatpush.bf16.msrb.mxu1 %v9529_v62  ;;  %v9337_v62 = vor.u32 %v10589_v44, %v9336_v36  ;;  %6086 = vmatpush.bf16.msrb.mxu3 %v9733_v60  ;;  %v9560_v36 = vld [vmem:[#allocation11 + $0x628] sm:$0xf]  ;;  %v10573_v60 = vld [vmem:[#allocation11 + $0x3f4] sm:$0xf0] }
 0x3c8   :  { %6149 = vmatpush.bf16.msrb.mxu0 %v9385_v7  ;;  %6129 = vmatpush.bf16.msra.mxu2 %v9033_v13  ;;  %v9717_v7 = vor.u32 %v10682_v63, %v9714_v28  ;;  %v9449_v13 = vor.u32 %v10617_v3, %v9448_v49  ;;  %v5899_v52 = vpop.f32.mrf.mxu0  ;;  %v8874_v63 = vld [vmem:[#allocation11 + $0xd8] sm:$0xf0]  ;;  %v10503_v28 = vld [vmem:[#allocation11 + $0x1cc] sm:$0xf]  ;;  %v9273_v49 = vor.u32 %v10573_v60, %v9272_v57 }
 0x3c9   :  { %6039 = vmatmul.bf16.vlgmr.msra.gmra.mxu3 %v11272_v8  ;;  %v10539_v3 = vld [vmem:[#allocation11 + $0x2ec] sm:$0xf]  ;;  %v8986_v52 = vld [vmem:[#allocation11 + $0x1b8] sm:$0xf0] }
 0x3ca   :  { %6162 = vmatpush.bf16.msrb.mxu1 %v9513_v11  ;;  %v9321_v11 = vor.u32 %v10585_v12, %v9320_v0  ;;  %v5912_v23 = vpop.f32.mrf.mxu1  ;;  %6087 = vmatpush.bf16.msrb.mxu3 %v9717_v7  ;;  %v9002_v0 = vld [vmem:[#allocation11 + $0x1d8] sm:$0xf0]  ;;  %v10641_v12 = vld [vmem:[#allocation11 + $0x614] sm:$0xf0] }
 0x3cb   :  { %6130 = vmatmul.bf16.vlgmr.msra.gmra.mxu2 %v11270_v20  ;;  %v9005_v7 = vor.u32 %v10503_v28, %v9002_v0  ;;  %v9130_v23 = vld [vmem:[#allocation11 + $0x2d8] sm:$0xf0]  ;;  %v10455_v0 = vld [vmem:[#allocation11 + $0x4c] sm:$0xf] }
 0x3cc   :  { %6174 = vmatpush.bf16.msrb.mxu2 %v9657_v45  ;;  %6150 = vmatpush.bf16.msrb.mxu0 %v9369_v27  ;;  %v10581_v45 = vld [vmem:[#allocation11 + $0x434] sm:$0xf0]  ;;  %v9098_v57 = vld [vmem:[#allocation11 + $0x298] sm:$0xf0] }
 0x3cd   :  { %v9305_v27 = vor.u32 %v10581_v45, %v9304_v21  ;;  %v10467_v21 = vld [vmem:[#allocation11 + $0xac] sm:$0xf] }
 0x3ce   :  { %6163 = vmatpush.bf16.msrb.mxu1 %v9497_v1  ;;  %v9433_v1 = vor.u32 %v10613_v43, %v9432_v19  ;;  %v5923_v47 = vpop.f32.mrf.mxu2  ;;  %6088 = vmatpush.bf16.msrb.mxu3 %v9701_v34  ;;  %v9149_v19 = vor.u32 %v10539_v3, %v9146_v24  ;;  %v10499_v43 = vld [vmem:[#allocation11 + $0x1ac] sm:$0xf]  ;;  %v9082_v24 = vld [vmem:[#allocation11 + $0x278] sm:$0xf0] }
 0x3cf   :  { %v10523_v3 = vld [vmem:[#allocation11 + $0x26c] sm:$0xf] }
 0x3d0   :  { %6175 = vmatpush.bf16.msrb.mxu2 %v9641_v38  ;;  %6151 = vmatpush.bf16.msrb.mxu0 %v9353_v46  ;;  %v10577_v38 = vld [vmem:[#allocation11 + $0x414] sm:$0xf0]  ;;  %v9018_v46 = vld [vmem:[#allocation11 + $0x1f8] sm:$0xf0]  ;;  %v5936_v55 = vpop.f32.mrf.mxu3 }
 0x3d1   :  { %v9289_v44 = vor.u32 %v10577_v38, %v9288_v41  ;;  %v9021_v25 = vor.u32 %v10507_v48, %v9018_v46  ;;  %v8842_v41 = vld [vmem:[#allocation11 + $0x98] sm:$0xf0]  ;;  %v9133_v38 = vor.u32 %v10535_v22, %v9130_v23  ;;  %v9224_v48 = vld [vmem:[#allocation11 + $0x388] sm:$0xf]  ;;  %v10561_v46 = vld [vmem:[#allocation11 + $0x394] sm:$0xf0] }
 0x3d2   :  { %6164 = vmatpush.bf16.msrb.mxu1 %v9481_v30  ;;  %v5924_v30 = vadd.f32 %v5923_v47, %v5911_v2  ;;  %6089 = vmatpush.bf16.msrb.mxu3 %v9685_v54  ;;  %v9669_v2 = vor.u32 %v10670_v31, %v9666_v56  ;;  %v9114_v47 = vld [vmem:[#allocation11 + $0x2b8] sm:$0xf0]  ;;  %v8845_v33 = vor.u32 %v10463_v6, %v8842_v41  ;;  %v10479_v41 = vld [vmem:[#allocation11 + $0x10c] sm:$0xf] }
 0x3d3   :  { %v8826_v54 = vld [vmem:[#allocation11 + $0x78] sm:$0xf0] }
 0x3d4   :  { %6176 = vmatpush.bf16.msrb.mxu2 %v9625_v37  ;;  %6152 = vmatpush.bf16.msrb.mxu0 %v9337_v62  ;;  %v10645_v37 = vld [vmem:[#allocation11 + $0x634] sm:$0xf0]  ;;  %v11333_v58 = vadd.f32 %v5936_v55, %v5924_v30  ;;  %v10471_v62 = vld [vmem:[#allocation11 + $0xcc] sm:$0xf]  ;;  %v9066_v22 = vld [vmem:[#allocation11 + $0x258] sm:$0xf0] }
 0x3d5   :  { %v8877_v5 = vor.u32 %v10471_v62, %v8874_v63  ;;  %v10459_v55 = vld [vmem:[#allocation11 + $0x6c] sm:$0xf]  ;;  %v9208_v62 = vld [vmem:[#allocation11 + $0x368] sm:$0xf]  ;;  %v8778_v6 = vld [vmem:[#allocation11 + $0x18] sm:$0xf0] }
 0x3d6   :  { %6165 = vmatpush.bf16.msrb.mxu1 %v9465_v51  ;;  %v9561_v51 = vor.u32 %v10645_v37, %v9560_v36  ;;  %v5925_v17 = vpop.f32.mrf.mxu2  ;;  %6090 = vmatpush.bf16.msrb.mxu3 %v9669_v2  ;;  %v9117_v37 = vor.u32 %v10531_v32, %v9114_v47  ;;  %v8829_v60 = vor.u32 %v10459_v55, %v8826_v54  ;;  %v8810_v2 = vld [vmem:[#allocation11 + $0x58] sm:$0xf0]  ;;  %v10635_v32 = vld [vmem:[#allocation11 + $0x5ec] sm:$0xf]  ;;  %v9160_v55 = vld [vmem:[#allocation11 + $0x308] sm:$0xf] }
 0x3d7   :  { %v10451_v17 = vld [vmem:[#allocation11 + $0x2c] sm:$0xf]  ;;  %v10545_v54 = vld [vmem:[#allocation11 + $0x314] sm:$0xf0] }
 0x3d8   :  { %6177 = vmatpush.bf16.msrb.mxu2 %v9609_v35  ;;  %6153 = vmatpush.bf16.msrb.mxu0 %v9321_v11  ;;  %v9544_v35 = vld [vmem:[#allocation11 + $0x608] sm:$0xf]  ;;  %v5938_v45 = vpop.f32.mrf.mxu3 }
 0x3d9   :  { %v9256_v11 = vld [vmem:[#allocation11 + $0x3c8] sm:$0xf]  ;;  %v9545_v39 = vor.u32 %v10641_v12, %v9544_v35  ;;  %6091 = vmatmul.bf16.vlgmr.msrb.gmra.mxu3 %v11323_v10  ;;  %v10487_v12 = vld [vmem:[#allocation11 + $0x14c] sm:$0xf] }
 0x3da   :  { %6166 = vmatpush.bf16.msrb.mxu1 %v9449_v13  ;;  %v10569_v13 = vld [vmem:[#allocation11 + $0x3d4] sm:$0xf0]  ;;  %6135 = vmatpush.bf16.msra.mxu3 %v9273_v49  ;;  %v8938_v49 = vld [vmem:[#allocation11 + $0x158] sm:$0xf0]  ;;  %v10483_v45 = vld [vmem:[#allocation11 + $0x12c] sm:$0xf] }
 0x3db   :  { %v9257_v4 = vor.u32 %v10569_v13, %v9256_v11  ;;  %v10553_v11 = vld [vmem:[#allocation11 + $0x354] sm:$0xf0]  ;;  %v8941_v13 = vor.u32 %v10487_v12, %v8938_v49  ;;  %v9658_v12 = vld [vmem:[#allocation11 + $0x6f8] sm:$0xf0]  ;;  %v9768_v49 = vld [vmem:[#allocation11 + $0x7c8] sm:$0xf] }
 0x3dc   :  { %6178 = vmatpush.bf16.msrb.mxu2 %v9593_v18  ;;  %6154 = vmatpush.bf16.msrb.mxu0 %v9305_v27  ;;  %v8858_v18 = vld [vmem:[#allocation11 + $0xb8] sm:$0xf0]  ;;  %v10565_v27 = vld [vmem:[#allocation11 + $0x3b4] sm:$0xf0] }
 0x3dd   :  { %v8861_v34 = vor.u32 %v10467_v21, %v8858_v18  ;;  %v9241_v42 = vor.u32 %v10565_v27, %v9240_v14  ;;  %v9085_v18 = vor.u32 %v10523_v3, %v9082_v24  ;;  %v10549_v14 = vld [vmem:[#allocation11 + $0x334] sm:$0xf0]  ;;  %v10447_v27 = vld [vmem:[#allocation11 + $0xc] sm:$0xf] }
 0x3de   :  { %6167 = vmatpush.bf16.msrb.mxu1 %v9433_v1  ;;  %v8989_v1 = vor.u32 %v10499_v43, %v8986_v52  ;;  %6136 = vmatpush.bf16.msra.mxu3 %v9257_v4  ;;  %v10519_v4 = vld [vmem:[#allocation11 + $0x24c] sm:$0xf] }
 0x3df   :  { %v10595_v24 = vld [vmem:[#allocation11 + $0x4ac] sm:$0xf] }
 0x3e0   :  { %6179 = vmatpush.bf16.msrb.mxu2 %v9577_v40  ;;  %6155 = vmatpush.bf16.msrb.mxu0 %v9289_v44  ;;  %v10495_v40 = vld [vmem:[#allocation11 + $0x18c] sm:$0xf]  ;;  %v5949_v36 = vpop.f32.mrf.mxu0 }
 0x3e1   :  { %v8973_v30 = vor.u32 %v10495_v40, %v8970_v9  ;;  %v10491_v44 = vld [vmem:[#allocation11 + $0x16c] sm:$0xf]  ;;  %v5950_v31 = vadd.f32 %v5949_v36, %v11333_v58  ;;  %v9069_v40 = vor.u32 %v10519_v4, %v9066_v22 }
 0x3e2   :  { %6168 = vmatpush.bf16.msrb.mxu1 %v9417_v26  ;;  %v8954_v26 = vld [vmem:[#allocation11 + $0x178] sm:$0xf0]  ;;  %v5962_v56 = vpop.f32.mrf.mxu1  ;;  %6137 = vmatpush.bf16.msra.mxu3 %v9241_v42  ;;  %v10603_v9 = vld [vmem:[#allocation11 + $0x4ec] sm:$0xf] }
 0x3e3   :  { %6156 = vmatmul.bf16.vlgmr.msrb.gmra.mxu0 %v11290_v53  ;;  %v11340_v63 = vadd.f32 %v5962_v56, %v5950_v31  ;;  %v8957_v28 = vor.u32 %v10491_v44, %v8954_v26  ;;  %v9402_v42 = vld [vmem:[#allocation11 + $0x4f8] sm:$0xf0]  ;;  %v9784_v44 = vld [vmem:[#allocation11 + $0x7e8] sm:$0xf]  ;;  %v10701_v26 = vld [vmem:[#allocation11 + $0x7f4] sm:$0xf0] }
 0x3e4   :  { %6200 = vmatpush.bf16.msra.mxu0 %v8893_v16  ;;  %6180 = vmatpush.bf16.msrb.mxu2 %v9561_v51  ;;  %v9225_v16 = vor.u32 %v10561_v46, %v9224_v48  ;;  %v10557_v51 = vld [vmem:[#allocation11 + $0x374] sm:$0xf0]  ;;  %v10515_v48 = vld [vmem:[#allocation11 + $0x22c] sm:$0xf]  ;;  %v9050_v46 = vld [vmem:[#allocation11 + $0x238] sm:$0xf0] }
 0x3e5   :  { %6169 = vmatmul.bf16.vlgmr.msrb.gmra.mxu1 %v11293_v50  ;;  %v9209_v58 = vor.u32 %v10557_v51, %v9208_v62  ;;  %v9053_v56 = vor.u32 %v10515_v48, %v9050_v46  ;;  %v9514_v62 = vld [vmem:[#allocation11 + $0x5d8] sm:$0xf0]  ;;  %v9785_v51 = vor.u32 %v10701_v26, %v9784_v44  ;;  %v10591_v4 = vld [vmem:[#allocation11 + $0x48c] sm:$0xf]  ;;  %v9720_v44 = vld [vmem:[#allocation11 + $0x768] sm:$0xf] }
 0x3e6   :  { %6213 = vmatpush.bf16.msra.mxu1 %v9021_v25  ;;  %v10527_v25 = vld [vmem:[#allocation11 + $0x28c] sm:$0xf]  ;;  %6138 = vmatpush.bf16.msra.mxu3 %v9225_v16  ;;  %v10685_v26 = vld [vmem:[#allocation11 + $0x774] sm:$0xf0] }
 0x3e7   :  { %v9101_v35 = vor.u32 %v10527_v25, %v9098_v57  ;;  %v10599_v16 = vld [vmem:[#allocation11 + $0x4cc] sm:$0xf]  ;;  %v9386_v25 = vld [vmem:[#allocation11 + $0x4d8] sm:$0xf0]  ;;  %v9161_v57 = vor.u32 %v10545_v54, %v9160_v55 }
 0x3e8   :  { %6201 = vmatpush.bf16.msra.mxu0 %v8877_v5  ;;  %6181 = vmatpush.bf16.msrb.mxu2 %v9545_v39  ;;  %v8813_v5 = vor.u32 %v10455_v0, %v8810_v2  ;;  %v8794_v39 = vld [vmem:[#allocation11 + $0x38] sm:$0xf0]  ;;  %v5951_v21 = vpop.f32.mrf.mxu0  ;;  %v10667_v2 = vld [vmem:[#allocation11 + $0x6ec] sm:$0xf] }
 0x3e9   :  { %v8797_v23 = vor.u32 %v10451_v17, %v8794_v39  ;;  %v9034_v0 = vld [vmem:[#allocation11 + $0x218] sm:$0xf0]  ;;  %v9661_v17 = vor.u32 %v10667_v2, %v9658_v12  ;;  %v10663_v21 = vld [vmem:[#allocation11 + $0x6cc] sm:$0xf]  ;;  %v9704_v2 = vld [vmem:[#allocation11 + $0x748] sm:$0xf] }
 0x3ea   :  { %6214 = vmatpush.bf16.msra.mxu1 %v9005_v7  ;;  %v9192_v7 = vld [vmem:[#allocation11 + $0x348] sm:$0xf]  ;;  %v5964_v43 = vpop.f32.mrf.mxu1  ;;  %6139 = vmatpush.bf16.msra.mxu3 %v9209_v58  ;;  %v10697_v58 = vld [vmem:[#allocation11 + $0x7d4] sm:$0xf0]  ;;  %v10623_v22 = vld [vmem:[#allocation11 + $0x58c] sm:$0xf] }
 0x3eb   :  { %6182 = vmatmul.bf16.vlgmr.msrb.gmra.mxu2 %v11301_v15  ;;  %v9193_v52 = vor.u32 %v10553_v11, %v9192_v7  ;;  %v10627_v11 = vld [vmem:[#allocation11 + $0x5ac] sm:$0xf]  ;;  %v9769_v39 = vor.u32 %v10697_v58, %v9768_v49  ;;  %v10693_v43 = vld [vmem:[#allocation11 + $0x7b4] sm:$0xf0] }
 0x3ec   :  { %6226 = vmatpush.bf16.msra.mxu2 %v9149_v19  ;;  %6202 = vmatpush.bf16.msra.mxu0 %v8861_v34  ;;  %v8922_v19 = vld [vmem:[#allocation11 + $0x138] sm:$0xf0]  ;;  %v9176_v34 = vld [vmem:[#allocation11 + $0x328] sm:$0xf]  ;;  %v10655_v54 = vld [vmem:[#allocation11 + $0x68c] sm:$0xf] }
 0x3ed   :  { %v9177_v47 = vor.u32 %v10549_v14, %v9176_v34  ;;  %v4601_v34 = vperm.slane %v11328_v29, 1  ;;  %v10579_v58 = vld [vmem:[#allocation11 + $0x42c] sm:$0xf] }
 0x3ee   :  { %6215 = vmatpush.bf16.msra.mxu1 %v8989_v1  ;;  %v8925_v1 = vor.u32 %v10483_v45, %v8922_v19  ;;  %6140 = vmatpush.bf16.msra.mxu3 %v9193_v52  ;;  %v9642_v45 = vld [vmem:[#allocation11 + $0x6d8] sm:$0xf0]  ;;  %v9752_v19 = vld [vmem:[#allocation11 + $0x7a8] sm:$0xf] }
 0x3ef   :  { %v9753_v14 = vor.u32 %v10693_v43, %v9752_v19  ;;  %v10677_v19 = vld [vmem:[#allocation11 + $0x734] sm:$0xf0] }
 0x3f0   :  { %6227 = vmatpush.bf16.msra.mxu2 %v9133_v38  ;;  %6203 = vmatpush.bf16.msra.mxu0 %v8845_v33  ;;  %v8906_v38 = vld [vmem:[#allocation11 + $0x118] sm:$0xf0] }
 0x3f1   :  { %v9530_v33 = vld [vmem:[#allocation11 + $0x5f8] sm:$0xf0]  ;;  %v8909_v36 = vor.u32 %v10479_v41, %v8906_v38  ;;  %v9736_v41 = vld [vmem:[#allocation11 + $0x788] sm:$0xf]  ;;  %v10689_v38 = vld [vmem:[#allocation11 + $0x794] sm:$0xf0] }
 0x3f2   :  { %6216 = vmatpush.bf16.msra.mxu1 %v8973_v30  ;;  %v8781_v30 = vor.u32 %v10447_v27, %v8778_v6  ;;  %v9533_v31 = vor.u32 %v10635_v32, %v9530_v33  ;;  %6141 = vmatpush.bf16.msra.mxu3 %v9177_v47  ;;  %v10659_v27 = vld [vmem:[#allocation11 + $0x6ac] sm:$0xf]  ;;  %v9626_v6 = vld [vmem:[#allocation11 + $0x6b8] sm:$0xf0]  ;;  %v9737_v55 = vor.u32 %v10689_v38, %v9736_v41 }
 0x3f3   :  { %v10619_v47 = vld [vmem:[#allocation11 + $0x56c] sm:$0xf]  ;;  %v9466_v33 = vld [vmem:[#allocation11 + $0x578] sm:$0xf0] }
 0x3f4   :  { %6228 = vmatpush.bf16.msra.mxu2 %v9117_v37  ;;  %6204 = vmatpush.bf16.msra.mxu0 %v8829_v60  ;;  %v9405_v37 = vor.u32 %v10603_v9, %v9402_v42  ;;  %v10631_v60 = vld [vmem:[#allocation11 + $0x5cc] sm:$0xf]  ;;  %v9338_v42 = vld [vmem:[#allocation11 + $0x478] sm:$0xf0] }
 0x3f5   :  { %v9517_v3 = vor.u32 %v10631_v60, %v9514_v62  ;;  %v10587_v9 = vld [vmem:[#allocation11 + $0x46c] sm:$0xf]  ;;  %v9721_v62 = vor.u32 %v10685_v26, %v9720_v44 }
 0x3f6   :  { %6217 = vmatpush.bf16.msra.mxu1 %v8957_v28  ;;  %v10511_v28 = vld [vmem:[#allocation11 + $0x20c] sm:$0xf]  ;;  %6142 = vmatpush.bf16.msra.mxu3 %v9161_v57  ;;  %v9450_v57 = vld [vmem:[#allocation11 + $0x558] sm:$0xf0] }
 0x3f7   :  { %v9037_v7 = vor.u32 %v10511_v28, %v9034_v0  ;;  %v9594_v0 = vld [vmem:[#allocation11 + $0x678] sm:$0xf0]  ;;  %v10707_v26 = vld [vmem:[#allocation14 + $0x28] sm:$0xff] }
 0x3f8   :  { %6229 = vmatpush.bf16.msra.mxu2 %v9101_v35  ;;  %6205 = vmatpush.bf16.msra.mxu0 %v8813_v5  ;;  %v9389_v35 = vor.u32 %v10599_v16, %v9386_v25  ;;  %v9370_v5 = vld [vmem:[#allocation11 + $0x4b8] sm:$0xf0]  ;;  %v10615_v25 = vld [vmem:[#allocation11 + $0x54c] sm:$0xf] }
 0x3f9   :  { %6143 = vmatmul.bf16.vlgmr.msra.gmra.mxu3 %v11272_v8  ;;  %v9322_v16 = vld [vmem:[#allocation11 + $0x458] sm:$0xf0]  ;;  %v9453_v49 = vor.u32 %v10615_v25, %v9450_v57  ;;  %v10706_v57 = vld [vmem:[#allocation14 + $0x20] sm:$0xff] }
 0x3fa   :  { %6218 = vmatpush.bf16.msra.mxu1 %v8941_v13  ;;  %v9498_v13 = vld [vmem:[#allocation11 + $0x5b8] sm:$0xf0]  ;;  %6187 = vmatpush.bf16.msrb.mxu3 %v9785_v51  ;;  %v10651_v51 = vld [vmem:[#allocation11 + $0x66c] sm:$0xf] }
 0x3fb   :  { %v9501_v52 = vor.u32 %v10627_v11, %v9498_v13  ;;  %v9597_v13 = vor.u32 %v10651_v51, %v9594_v0  ;;  %v10555_v0 = vld [vmem:[#allocation11 + $0x36c] sm:$0xf] }
 0x3fc   :  { %6230 = vmatpush.bf16.msra.mxu2 %v9085_v18  ;;  %6206 = vmatpush.bf16.msra.mxu0 %v8797_v23  ;;  %v9373_v18 = vor.u32 %v10595_v24, %v9370_v5  ;;  %v9482_v23 = vld [vmem:[#allocation11 + $0x598] sm:$0xf0]  ;;  %v10611_v5 = vld [vmem:[#allocation11 + $0x52c] sm:$0xf] }
 0x3fe   :  { %6219 = vmatpush.bf16.msra.mxu1 %v8925_v1  ;;  %6188 = vmatpush.bf16.msrb.mxu3 %v9769_v39  ;;  %v11349_v12 = vpop.f32.mrf.mxu2  ;;  %v10647_v39 = vld [vmem:[#allocation11 + $0x64c] sm:$0xf] }
 0x400   :  { %6231 = vmatpush.bf16.msra.mxu2 %v9069_v40  ;;  %6207 = vmatpush.bf16.msra.mxu0 %v8781_v30  ;;  %v9485_v40 = vor.u32 %v10623_v22, %v9482_v23  ;;  %v6001_v32 = vpop.f32.mrf.mxu0  ;;  %v9629_v30 = vor.u32 %v10659_v27, %v9626_v6  ;;  %v9418_v22 = vld [vmem:[#allocation11 + $0x518] sm:$0xf0]  ;;  %v10673_v6 = vld [vmem:[#allocation11 + $0x714] sm:$0xf0] }
 0x401   :  { %v6002_v48 = vadd.f32 %v6001_v32, %v4601_v34  ;;  %v10643_v34 = vld [vmem:[#allocation11 + $0x62c] sm:$0xf]  ;;  %v9562_v27 = vld [vmem:[#allocation11 + $0x638] sm:$0xf0] }
 0x402   :  { %6220 = vmatpush.bf16.msra.mxu1 %v8909_v36  ;;  %v6014_v46 = vpop.f32.mrf.mxu1  ;;  %6189 = vmatpush.bf16.msrb.mxu3 %v9753_v14  ;;  %v9341_v36 = vor.u32 %v10587_v9, %v9338_v42  ;;  %v10571_v9 = vld [vmem:[#allocation11 + $0x3ec] sm:$0xf]  ;;  %v9274_v42 = vld [vmem:[#allocation11 + $0x3f8] sm:$0xf0]  ;;  %v9565_v32 = vor.u32 %v10643_v34, %v9562_v27 }
 0x403   :  { %6208 = vmatmul.bf16.vlgmr.msra.gmra.mxu0 %v11260_v59  ;;  %v9354_v59 = vld [vmem:[#allocation11 + $0x498] sm:$0xf0] }
 0x404   :  { %6252 = vmatpush.bf16.msrb.mxu0 %v9405_v37  ;;  %6232 = vmatpush.bf16.msra.mxu2 %v9053_v56  ;;  %v9357_v1 = vor.u32 %v10591_v4, %v9354_v59  ;;  %v9610_v37 = vld [vmem:[#allocation11 + $0x698] sm:$0xf0]  ;;  %v10583_v56 = vld [vmem:[#allocation11 + $0x44c] sm:$0xf] }
 0x405   :  { %6221 = vmatmul.bf16.vlgmr.msra.gmra.mxu1 %v11262_v61  ;;  %v9645_v61 = vor.u32 %v10663_v21, %v9642_v45  ;;  %v9613_v60 = vor.u32 %v10655_v54, %v9610_v37  ;;  %v9325_v28 = vor.u32 %v10583_v56, %v9322_v16  ;;  %v9688_v45 = vld [vmem:[#allocation11 + $0x728] sm:$0xf]  ;;  %v9290_v4 = vld [vmem:[#allocation11 + $0x418] sm:$0xf0]  ;;  %v10607_v59 = vld [vmem:[#allocation11 + $0x50c] sm:$0xf] }
 0x406   :  { %6265 = vmatpush.bf16.msrb.mxu1 %v9533_v31  ;;  %v9469_v31 = vor.u32 %v10619_v47, %v9466_v33  ;;  %6190 = vmatpush.bf16.msrb.mxu3 %v9737_v55  ;;  %v5977_v41 = vpop.f32.mrf.mxu2  ;;  %v9421_v38 = vor.u32 %v10607_v59, %v9418_v22  ;;  %v10639_v33 = vld [vmem:[#allocation11 + $0x60c] sm:$0xf]  ;;  %v9258_v54 = vld [vmem:[#allocation11 + $0x3d8] sm:$0xf0] }
 0x407   :  { %v10567_v55 = vld [vmem:[#allocation11 + $0x3cc] sm:$0xf]  ;;  %v9242_v16 = vld [vmem:[#allocation11 + $0x3b8] sm:$0xf0] }
 0x408   :  { %6253 = vmatpush.bf16.msrb.mxu0 %v9389_v35  ;;  %6233 = vmatpush.bf16.msra.mxu2 %v9037_v7  ;;  %v10681_v35 = vld [vmem:[#allocation11 + $0x754] sm:$0xf0]  ;;  %v6003_v24 = vpop.f32.mrf.mxu0  ;;  %v9434_v7 = vld [vmem:[#allocation11 + $0x538] sm:$0xf0]  ;;  %v9261_v44 = vor.u32 %v10567_v55, %v9258_v54  ;;  %v10563_v56 = vld [vmem:[#allocation11 + $0x3ac] sm:$0xf] }
 0x409   :  { %v9437_v43 = vor.u32 %v10611_v5, %v9434_v7  ;;  %v9245_v25 = vor.u32 %v10563_v56, %v9242_v16  ;;  %v10703_v7 = vld [vmem:[#allocation14 + $0x8] sm:$0xff]  ;;  %v9770_v34 = vld [vmem:[#allocation11 + $0x7d8] sm:$0xf0] }
 0x40a   :  { %6266 = vmatpush.bf16.msrb.mxu1 %v9517_v3  ;;  %v9306_v3 = vld [vmem:[#allocation11 + $0x438] sm:$0xf0]  ;;  %v6016_v11 = vpop.f32.mrf.mxu1  ;;  %6191 = vmatpush.bf16.msrb.mxu3 %v9721_v62  ;;  %v10683_v54 = vld [vmem:[#allocation11 + $0x76c] sm:$0xf] }
 0x40b   :  { %6234 = vmatmul.bf16.vlgmr.msra.gmra.mxu2 %v11270_v20  ;;  %v11347_v20 = vadd.f32 %v6014_v46, %v6002_v48  ;;  %v9309_v21 = vor.u32 %v10579_v58, %v9306_v3  ;;  %v9546_v48 = vld [vmem:[#allocation11 + $0x618] sm:$0xf0]  ;;  %v9277_v46 = vor.u32 %v10571_v9, %v9274_v42  ;;  %v10551_v58 = vld [vmem:[#allocation11 + $0x34c] sm:$0xf] }
 0x40c   :  { %6278 = vmatpush.bf16.msrb.mxu2 %v9661_v17  ;;  %6254 = vmatpush.bf16.msrb.mxu0 %v9373_v18  ;;  %v9705_v17 = vor.u32 %v10681_v35, %v9704_v2  ;;  %v9578_v18 = vld [vmem:[#allocation11 + $0x658] sm:$0xf0]  ;;  %v10547_v11 = vld [vmem:[#allocation11 + $0x32c] sm:$0xf] }
 0x40d   :  { %v9581_v23 = vor.u32 %v10647_v39, %v9578_v18  ;;  %v9210_v2 = vld [vmem:[#allocation11 + $0x378] sm:$0xf0]  ;;  %v10702_v18 = vld [vmem:[#allocation14] sm:$0xff]  ;;  %v10687_v9 = vld [vmem:[#allocation11 + $0x78c] sm:$0xf] }
 0x40e   :  { %6267 = vmatpush.bf16.msrb.mxu1 %v9501_v52  ;;  %v10575_v52 = vld [vmem:[#allocation11 + $0x40c] sm:$0xf]  ;;  %6192 = vmatpush.bf16.msrb.mxu3 %v9705_v17  ;;  %v6027_v37 = vpop.f32.mrf.mxu2  ;;  %v9213_v35 = vor.u32 %v10555_v0, %v9210_v2  ;;  %v9194_v3 = vld [vmem:[#allocation11 + $0x358] sm:$0xf0] }
 0x40f   :  { %v9293_v14 = vor.u32 %v10575_v52, %v9290_v4  ;;  %v9197_v5 = vor.u32 %v10551_v58, %v9194_v3  ;;  %v10717_v39 = vld [vmem:[#allocation14 + $0x78] sm:$0xff]  ;;  %v10699_v52 = vld [vmem:[#allocation11 + $0x7ec] sm:$0xf] }
 0x410   :  { %6279 = vmatpush.bf16.msrb.mxu2 %v9645_v61  ;;  %6255 = vmatpush.bf16.msrb.mxu0 %v9357_v1  ;;  %v9689_v61 = vor.u32 %v10677_v19, %v9688_v45  ;;  %v9672_v1 = vld [vmem:[#allocation11 + $0x708] sm:$0xf]  ;;  %v10543_v45 = vld [vmem:[#allocation11 + $0x30c] sm:$0xf]  ;;  %v9162_v19 = vld [vmem:[#allocation11 + $0x318] sm:$0xf0] }
 0x411   :  { %v9673_v47 = vor.u32 %v10673_v6, %v9672_v1  ;;  %v9786_v4 = vld [vmem:[#allocation11 + $0x7f8] sm:$0xf0]  ;;  %v9165_v59 = vor.u32 %v10543_v45, %v9162_v19  ;;  %v10714_v1 = vld [vmem:[#allocation14 + $0x60] sm:$0xff]  ;;  %v10691_v6 = vld [vmem:[#allocation11 + $0x7ac] sm:$0xf] }
 0x412   :  { %6268 = vmatpush.bf16.msrb.mxu1 %v9485_v40  ;;  %v10709_v40 = vld [vmem:[#allocation14 + $0x38] sm:$0xff]  ;;  %6193 = vmatpush.bf16.msrb.mxu3 %v9689_v61  ;;  %v9789_v22 = vor.u32 %v10699_v52, %v9786_v4  ;;  %v10695_v61 = vld [vmem:[#allocation11 + $0x7cc] sm:$0xf] }
 0x413   :  { %v9773_v27 = vor.u32 %v10695_v61, %v9770_v34  ;;  %v9754_v41 = vld [vmem:[#allocation11 + $0x7b8] sm:$0xf0]  ;;  %v10711_v56 = vld [vmem:[#allocation14 + $0x48] sm:$0xff]  ;;  %v10722_v34 = vld [vmem:[#allocation14 + $0xa0] sm:$0xff] }
 0x414   :  { %6280 = vmatpush.bf16.msrb.mxu2 %v9629_v30  ;;  %6256 = vmatpush.bf16.msrb.mxu0 %v9341_v36  ;;  %v10708_v30 = vld [vmem:[#allocation14 + $0x30] sm:$0xff]  ;;  %v9549_v36 = vor.u32 %v10639_v33, %v9546_v48  ;;  %v9738_v42 = vld [vmem:[#allocation11 + $0x798] sm:$0xf0] }
 0x415   :  { %v9674_v58 = vld [vmem:[#allocation11 + $0x718] sm:$0xf0] }
 0x416   :  { %6269 = vmatpush.bf16.msrb.mxu1 %v9469_v31  ;;  %6194 = vmatpush.bf16.msrb.mxu3 %v9673_v47  ;;  %v11354_v31 = vadd.f32 %v6027_v37, %v11347_v20  ;;  %v6029_v20 = vpop.f32.mrf.mxu2  ;;  %v10725_v4 = vld [vmem:[#allocation14 + $0xb8] sm:$0xff] }
 0x417   :  { %v10675_v20 = vld [vmem:[#allocation11 + $0x72c] sm:$0xf] }
 0x418   :  { %6281 = vmatpush.bf16.msrb.mxu2 %v9613_v60  ;;  %6257 = vmatpush.bf16.msrb.mxu0 %v9325_v28  ;;  %v10705_v28 = vld [vmem:[#allocation14 + $0x18] sm:$0xff] }
 0x419   :  { %6195 = vmatmul.bf16.vlgmr.msrb.gmra.mxu3 %v11323_v10 }
 0x41a   :  { %6270 = vmatpush.bf16.msrb.mxu1 %v9453_v49  ;;  %6239 = vmatpush.bf16.msra.mxu3 %v9277_v46  ;;  %v10704_v49 = vld [vmem:[#allocation14 + $0x10] sm:$0xff]  ;;  %v9741_v46 = vor.u32 %v10687_v9, %v9738_v42 }
 0x41c   :  { %6282 = vmatpush.bf16.msrb.mxu2 %v9597_v13  ;;  %6258 = vmatpush.bf16.msrb.mxu0 %v9309_v21  ;;  %v9178_v13 = vld [vmem:[#allocation11 + $0x338] sm:$0xf0] }
 0x41d   :  { %v9181_v21 = vor.u32 %v10547_v11, %v9178_v13 }
 0x41e   :  { %6271 = vmatpush.bf16.msrb.mxu1 %v9437_v43  ;;  %6240 = vmatpush.bf16.msra.mxu3 %v9261_v44  ;;  %v10716_v43 = vld [vmem:[#allocation14 + $0x70] sm:$0xff]  ;;  %v10679_v44 = vld [vmem:[#allocation11 + $0x74c] sm:$0xf] }
 0x420   :  { %6283 = vmatpush.bf16.msrb.mxu2 %v9581_v23  ;;  %6259 = vmatpush.bf16.msrb.mxu0 %v9293_v14  ;;  %v11358_v60 = vpop.f32.mrf.mxu0  ;;  %v10715_v14 = vld [vmem:[#allocation14 + $0x68] sm:$0xff] }
 0x422   :  { %6272 = vmatpush.bf16.msrb.mxu1 %v9421_v38  ;;  %v11360_v62 = vpop.f32.mrf.mxu1  ;;  %6241 = vmatpush.bf16.msra.mxu3 %v9245_v25  ;;  %v4602_v38 = vperm.slane %v11328_v29, 2 }
 0x423   :  { %6260 = vmatmul.bf16.vlgmr.msrb.gmra.mxu0 %v11290_v53  ;;  %v10559_v53 = vld [vmem:[#allocation11 + $0x38c] sm:$0xf] }
 0x424   :  { %6572 = vmatpush.bf16.msra.mxu0 %v10709_v40  ;;  %6284 = vmatpush.bf16.msrb.mxu2 %v9565_v32  ;;  %v9757_v40 = vor.u32 %v10691_v6, %v9754_v41  ;;  %v10713_v32 = vld [vmem:[#allocation14 + $0x58] sm:$0xff] }
 0x425   :  { %6273 = vmatmul.bf16.vlgmr.msrb.gmra.mxu1 %v11293_v50  ;;  %v9226_v50 = vld [vmem:[#allocation11 + $0x398] sm:$0xf0] }
 0x426   :  { %v9229_v51 = vor.u32 %v10559_v53, %v9226_v50  ;;  %6585 = vmatpush.bf16.msra.mxu1 %v10717_v39 }
 0x428   :  { %6573 = vmatpush.bf16.msra.mxu0 %v10708_v30  ;;  %6285 = vmatpush.bf16.msrb.mxu2 %v9549_v36  ;;  %v10712_v30 = vld [vmem:[#allocation14 + $0x50] sm:$0xff]  ;;  %v9722_v36 = vld [vmem:[#allocation11 + $0x778] sm:$0xf0] }
 0x429   :  { %6242 = vmatpush.bf16.msra.mxu3 %v9229_v51  ;;  %v9725_v29 = vor.u32 %v10683_v54, %v9722_v36  ;;  %v9690_v51 = vld [vmem:[#allocation11 + $0x738] sm:$0xf0] }
 0x42a   :  { %v6068_v24 = vpop.f32.mrf.mxu1  ;;  %6586 = vmatpush.bf16.msra.mxu1 %v10716_v43 }
 0x42b   :  { %6286 = vmatmul.bf16.vlgmr.msrb.gmra.mxu2 %v11301_v15  ;;  %v6055_v15 = vpop.f32.mrf.mxu0 }
 0x42c   :  { %6574 = vmatpush.bf16.msra.mxu0 %v10707_v26  ;;  %v9706_v26 = vld [vmem:[#allocation11 + $0x758] sm:$0xf0]  ;;  %6598 = vmatpush.bf16.msra.mxu2 %v10725_v4 }
 0x42d   :  { %6243 = vmatpush.bf16.msra.mxu3 %v9213_v35  ;;  %v9709_v50 = vor.u32 %v10679_v44, %v9706_v26 }
 0x42e   :  { %v11362_v17 = vpop.f32.mrf.mxu2  ;;  %6587 = vmatpush.bf16.msra.mxu1 %v10715_v14 }
 0x430   :  { %6575 = vmatpush.bf16.msra.mxu0 %v10706_v57 }
 0x431   :  { %6244 = vmatpush.bf16.msra.mxu3 %v9197_v5 }
 0x432   :  { %6588 = vmatpush.bf16.msra.mxu1 %v10714_v1 }
 0x434   :  { %6576 = vmatpush.bf16.msra.mxu0 %v10705_v28  ;;  %v10710_v28 = vld [vmem:[#allocation14 + $0x40] sm:$0xff] }
 0x435   :  { %6245 = vmatpush.bf16.msra.mxu3 %v9181_v21 }
 0x436   :  { %v6081_v23 = vpop.f32.mrf.mxu2  ;;  %6589 = vmatpush.bf16.msra.mxu1 %v10713_v32 }
 0x437   :  { %v10724_v23 = vld [vmem:[#allocation14 + $0xb0] sm:$0xff] }
 0x438   :  { %6577 = vmatpush.bf16.msra.mxu0 %v10704_v49  ;;  %v10671_v49 = vld [vmem:[#allocation11 + $0x70c] sm:$0xf]  ;;  %6599 = vmatpush.bf16.msra.mxu2 %v10724_v23 }
 0x439   :  { %6246 = vmatpush.bf16.msra.mxu3 %v9165_v59  ;;  %v9677_v3 = vor.u32 %v10671_v49, %v9674_v58  ;;  %v10726_v49 = vld [vmem:[#allocation14 + $0xc0] sm:$0xff] }
 0x43a   :  { %6590 = vmatpush.bf16.msra.mxu1 %v10712_v30 }
 0x43c   :  { %6578 = vmatpush.bf16.msra.mxu0 %v10703_v7  ;;  %6247 = vmatmul.bf16.vlgmr.msra.gmra.mxu3 %v11272_v8  ;;  %v5976_v8 = vadd.f32 %v11349_v12, %v11340_v63  ;;  %v5988_v37 = vpop.f32.mrf.mxu3  ;;  %v9693_v12 = vor.u32 %v10675_v20, %v9690_v51  ;;  %v10731_v51 = vld [vmem:[#allocation14 + $0xe8] sm:$0xff] }
 0x43d   :  { %6291 = vmatpush.bf16.msrb.mxu3 %v9789_v22 }
 0x43e   :  { %v5989_v16 = vadd.f32 %v5988_v37, %v5976_v8  ;;  %6591 = vmatpush.bf16.msra.mxu1 %v10711_v56 }
 0x440   :  { %6579 = vmatpush.bf16.msra.mxu0 %v10702_v18  ;;  %v6105_v47 = vpop.f32.mrf.mxu0  ;;  %v6304_v53 = vmax.f32 %v5989_v16, 0.0  ;;  %v10733_v16 = vld [vmem:[#allocation14 + $0xf8] sm:$0xff] }
 0x441   :  { %6292 = vmatpush.bf16.msrb.mxu3 %v9773_v27  ;;  %v6106_v33 = vadd.f32 %v6105_v47, %v4602_v38  ;;  %v10720_v27 = vld [vmem:[#allocation14 + $0x90] sm:$0xff]  ;;  %v10718_v47 = vld [vmem:[#allocation14 + $0x80] sm:$0xff] }
 0x442   :  { %v6118_v48 = vpop.f32.mrf.mxu1  ;;  %v6308_v0 = vpack.c.bf16 %v6304_v53, %v6304_v53  ;;  %6592 = vmatpush.bf16.msra.mxu1 %v10710_v28 }
 0x443   :  { %v6119_v55 = vadd.f32 %v6118_v48, %v6106_v33 }
 0x444   :  { %6580 = vmatmul.bf16.vlgmr.msra.gmra.mxu0 %v6308_v0  ;;  %v5990_v35 = vpop.f32.mrf.mxu3  ;;  %v10730_v0 = vld [vmem:[#allocation14 + $0xe0] sm:$0xff] }
 0x445   :  { %6293 = vmatpush.bf16.msrb.mxu3 %v9757_v40  ;;  %v10719_v40 = vld [vmem:[#allocation14 + $0x88] sm:$0xff] }
 0x446   :  { %v10727_v35 = vld [vmem:[#allocation14 + $0xc8] sm:$0xff] }
 0x448   :  { %v6107_v25 = vpop.f32.mrf.mxu0 }
 0x449   :  { %6294 = vmatpush.bf16.msrb.mxu3 %v9741_v46 }
 0x44a   :  { %v6120_v57 = vpop.f32.mrf.mxu1 }
 0x44c   :  { %v6040_v24 = vpop.f32.mrf.mxu3 }
 0x44d   :  { %6295 = vmatpush.bf16.msrb.mxu3 %v9725_v29  ;;  %v6041_v5 = vadd.f32 %v6040_v24, %v11354_v31 }
 0x44e   :  { %v6131_v2 = vpop.f32.mrf.mxu2 }
 0x44f   :  { %v6132_v63 = vadd.f32 %v6131_v2, %v6119_v55  ;;  %v6054_v7 = vadd.f32 %v11358_v60, %v6041_v5  ;;  %v10723_v60 = vld [vmem:[#allocation14 + $0xa8] sm:$0xff] }
 0x450   :  { %6600 = vmatpush.bf16.msra.mxu2 %v10723_v60 }
 0x451   :  { %6296 = vmatpush.bf16.msrb.mxu3 %v9709_v50  ;;  %v6067_v21 = vadd.f32 %v11360_v62, %v6054_v7  ;;  %v10753_v62 = vld [vmem:[#allocation13] sm:$0xf]  ;;  %v10732_v50 = vld [vmem:[#allocation14 + $0xf0] sm:$0xff] }
 0x452   :  { %v4603_v14 = vperm.slane %v10753_v62, 3 }
 0x453   :  { %v6080_v45 = vadd.f32 %v11362_v17, %v6067_v21  ;;  %v10721_v17 = vld [vmem:[#allocation14 + $0x98] sm:$0xff] }
 0x454   :  { %v6042_v39 = vpop.f32.mrf.mxu3  ;;  %6601 = vmatpush.bf16.msra.mxu2 %v10722_v34 }
 0x455   :  { %6297 = vmatpush.bf16.msrb.mxu3 %v9693_v12  ;;  %v10728_v12 = vld [vmem:[#allocation14 + $0xd0] sm:$0xff] }
 0x456   :  { %v6133_v15 = vpop.f32.mrf.mxu2 }
 0x458   :  { %6602 = vmatpush.bf16.msra.mxu2 %v10721_v17 }
 0x459   :  { %6298 = vmatpush.bf16.msrb.mxu3 %v9677_v3 }
 0x45c   :  { %6299 = vmatmul.bf16.vlgmr.msrb.gmra.mxu3 %v11323_v10  ;;  %v6092_v43 = vpop.f32.mrf.mxu3  ;;  %6603 = vmatpush.bf16.msra.mxu2 %v10720_v27 }
 0x45d   :  { %v6093_v52 = vadd.f32 %v6092_v43, %v6080_v45  ;;  %6611 = vmatpush.bf16.msra.mxu3 %v10733_v16  ;;  %v10750_v43 = vld [vmem:[#allocation16] ss:$0 sm:$0xff] }
 0x45f   :  { %v6305_v59 = vmax.f32 %v6093_v52, 0.0 }
 0x460   :  { %v6157_v11 = vpop.f32.mrf.mxu0  ;;  %6604 = vmatpush.bf16.msra.mxu2 %v10719_v40 }
 0x461   :  { %v6309_v10 = vpack.c.bf16 %v6305_v59, %v6305_v59  ;;  %6612 = vmatpush.bf16.msra.mxu3 %v10732_v50 }
 0x462   :  { %v6170_v13 = vpop.f32.mrf.mxu1 }
 0x463   :  { %6593 = vmatmul.bf16.vlgmr.msra.gmra.mxu1 %v6309_v10 }
 0x464   :  { %v6094_v31 = vpop.f32.mrf.mxu3  ;;  %6605 = vmatpush.bf16.msra.mxu2 %v10718_v47 }
 0x465   :  { %6613 = vmatpush.bf16.msra.mxu3 %v10731_v51 }
 0x468   :  { %v6159_v18 = vpop.f32.mrf.mxu0 }
 0x469   :  { %6614 = vmatpush.bf16.msra.mxu3 %v10730_v0 }
 0x46a   :  { %v6172_v19 = vpop.f32.mrf.mxu1 }
 0x46e   :  { %v6183_v22 = vpop.f32.mrf.mxu2 }
 0x476   :  { %v6185_v61 = vpop.f32.mrf.mxu2 }
 0x47c   :  { %v6144_v32 = vpop.f32.mrf.mxu3 }
 0x47d   :  { %v6145_v55 = vadd.f32 %v6144_v32, %v6132_v63  ;;  %v10729_v63 = vld [vmem:[#allocation14 + $0xd8] sm:$0xff] }
 0x47e   :  { %6615 = vmatpush.bf16.msra.mxu3 %v10729_v63 }
 0x47f   :  { %v6158_v54 = vadd.f32 %v6157_v11, %v6145_v55 }
 0x480   :  { %v6209_v1 = vpop.f32.mrf.mxu0 }
 0x481   :  { %v6210_v6 = vadd.f32 %v6209_v1, %v4603_v14  ;;  %v6171_v29 = vadd.f32 %v6170_v13, %v6158_v54 }
 0x482   :  { %v6222_v41 = vpop.f32.mrf.mxu1  ;;  %6616 = vmatpush.bf16.msra.mxu3 %v10728_v12 }
 0x483   :  { %v6223_v38 = vadd.f32 %v6222_v41, %v6210_v6  ;;  %v6184_v26 = vadd.f32 %v6183_v22, %v6171_v29 }
 0x484   :  { %v6146_v46 = vpop.f32.mrf.mxu3 }
 0x486   :  { %6617 = vmatpush.bf16.msra.mxu3 %v10727_v35 }
 0x488   :  { %v6211_v9 = vpop.f32.mrf.mxu0 }
 0x48a   :  { %v6224_v42 = vpop.f32.mrf.mxu1  ;;  %6618 = vmatpush.bf16.msra.mxu3 %v10726_v49 }
 0x48e   :  { %v6235_v33 = vpop.f32.mrf.mxu2 }
 0x48f   :  { %v6236_v48 = vadd.f32 %v6235_v33, %v6223_v38 }
 0x496   :  { %v6237_v30 = vpop.f32.mrf.mxu2 }
 0x49c   :  { %v6196_v56 = vpop.f32.mrf.mxu3 }
 0x49d   :  { %v6197_v25 = vadd.f32 %v6196_v56, %v6184_v26 }
 0x49f   :  { %v6306_v57 = vmax.f32 %v6197_v25, 0.0 }
 0x4a0   :  { %v6261_v36 = vpop.f32.mrf.mxu0 }
 0x4a1   :  { %v6310_v20 = vpack.c.bf16 %v6306_v57, %v6306_v57 }
 0x4a2   :  { %v6274_v8 = vpop.f32.mrf.mxu1 }
 0x4a3   :  { %6606 = vmatmul.bf16.vlgmr.msra.gmra.mxu2 %v6310_v20 }
 0x4a4   :  { %v6198_v28 = vpop.f32.mrf.mxu3 }
 0x4a8   :  { %v6263_v37 = vpop.f32.mrf.mxu0 }
 0x4aa   :  { %v6276_v44 = vpop.f32.mrf.mxu1 }
 0x4ae   :  { %v6287_v53 = vpop.f32.mrf.mxu2 }
 0x4b6   :  { %v6289_v2 = vpop.f32.mrf.mxu2 }
 0x4bf   :  { %v6248_v58 = vpop.f32.mrf.mxu3 }
 0x4c0   :  { %v6249_v24 = vadd.f32 %v6248_v58, %v6236_v48 }
 0x4c1   :  { %v6581_v15 = vpop.f32.mrf.mxu0 }
 0x4c2   :  { %v6262_v5 = vadd.f32 %v6261_v36, %v6249_v24  ;;  %v6582_v52 = vadd.f32 %v10750_v43, %v6581_v15 }
 0x4c4   :  { %v6275_v11 = vadd.f32 %v6274_v8, %v6262_v5 }
 0x4c6   :  { %v6288_v13 = vadd.f32 %v6287_v53, %v6275_v11 }
 0x4c7   :  { %v6250_v3 = vpop.f32.mrf.mxu3 }
 0x4c9   :  { %v6583_v7 = vpop.f32.mrf.mxu0 }
 0x4df   :  { %v6300_v39 = vpop.f32.mrf.mxu3 }
 0x4e0   :  { %v6301_v21 = vadd.f32 %v6300_v39, %v6288_v13  ;;  %v6594_v4 = vpop.f32.mrf.mxu1 }
 0x4e1   :  { %v6595_v59 = vadd.f32 %v6594_v4, %v6582_v52 }
 0x4e2   :  { %v6307_v18 = vmax.f32 %v6301_v21, 0.0 }
 0x4e4   :  { %v6311_v45 = vpack.c.bf16 %v6307_v18, %v6307_v18 }
 0x4e6   :  { %6619 = vmatmul.bf16.vlgmr.msra.gmra.mxu3 %v6311_v45 }
 0x4e7   :  { %v6302_v19 = vpop.f32.mrf.mxu3 }
 0x4e8   :  { %v6596_v22 = vpop.f32.mrf.mxu1 }
 0x526   :  { %v6607_v10 = vpop.f32.mrf.mxu2 }
 0x527   :  { %v6608_v31 = vadd.f32 %v6607_v10, %v6595_v59 }
 0x52e   :  { %v6609_v23 = vpop.f32.mrf.mxu2 }
 0x569   :  { %v6620_v60 = vpop.f32.mrf.mxu3 }
 0x56a   :  { %v6621_v61 = vadd.f32 %v6620_v60, %v6608_v31 }
 0x56c   :  { %6624 = vst [vmem:[#allocation17] sm:$0xff] %v6621_v61 }
 0x56d   :  { %6635 = dma.vmem_to_hbm [thread:$0]  %s6631_s8, 128, %s6633_s11, [#allocation4]  }
 0x571   :  { %v6622_v34 = vpop.f32.mrf.mxu3 }
 0x572   :  { %11004 = dma.done.wait [#allocation4], 128  }
 0x573   :  { %11005 = vsyncadd [#allocation4], 4294967168 }
 0x574   :  { %6640 = vsyncpa [#allocation3], 1 }
 0x575   :  { %6641 = vsyncpa [#allocation6], 1 }
 0x576   :  { %6642 = vsyncpa [#allocation9], 1 }
 0x577   :  { %6643 = vsyncpa [#allocation12], 1 }
 0x578   :  { %6644 = vsyncpa [#allocation15], 1 }
 0x579   :  { %6645 = vsyncpa [#allocation4], 1 }

</bundles_post_ra>
